<compile_context>
chip_gen: v5e
topology: v5e:2x2
jax: 0.10.0
libtpu: 0.0.40
codegen_flags: <defaults>
</compile_context>

<pallas_src>
import functools

import jax
import jax.numpy as jnp
from jax.experimental import pallas as pl
from jax.experimental.pallas import tpu as pltpu


# ----------------------------------------------------------------------------
# helpers
# ----------------------------------------------------------------------------
def _round_up(x, m):
    return ((x + m - 1) // m) * m


_VMEM_TILE_BUDGET = 40 * 1024 * 1024   # keep tiles well under v7x's 64 MiB


def _tile_vmem_bytes(tm, tk, tn, out_bytes):
    # Double-buffered inputs/outputs + f32 accumulator scratch.
    return (2 * tm * tk * 2            # A tiles (bf16)
            + 2 * tk * tn * 2          # W tiles (bf16)
            + 2 * 1 * tn * 4           # bias tiles (f32)
            + 2 * tm * tn * out_bytes  # output tiles
            + tm * tn * 4)             # f32 accumulator


def _select_tiles(Mp, Kp, Np, out_bytes):
    # N tile: 256 fills the v6e/v7x 256-wide MXU; 128 is native on v5e.
    tn = 256 if Np % 256 == 0 else 128
    # M tile: large to amortize per-step overhead, but always >= 2 blocks when
    # Mp is big enough so both v7x TensorCores get work on the parallel axis.
    if Mp >= 256:
        tm = next((c for c in (1024, 512, 256, 128)
                   if c <= Mp // 2 and Mp % c == 0), 128)
    else:
        tm = Mp
    # K tile: biggest candidate dividing Kp that fits the VMEM budget.
    tk = 128
    for cand in (2048, 1024, 512, 256, 128):
        if Kp % cand == 0 and _tile_vmem_bytes(tm, cand, tn,
                                               out_bytes) <= _VMEM_TILE_BUDGET:
            tk = cand
            break
    return tm, tn, tk


# ----------------------------------------------------------------------------
# Pallas kernel: tiled matmul + bias + activation with K-axis accumulator
# ----------------------------------------------------------------------------
def _matmul_bias_act_kernel(a_ref, w_ref, b_ref, o_ref, acc_ref, *, act):
    # a_ref: (tm, tk) bf16 patches   w_ref: (tk, tn) bf16 weights
    # b_ref: (1, tn)  f32 bias       o_ref: (tm, tn) bf16/f32 output
    k = pl.program_id(2)

    @pl.when(k == 0)
    def _init():
        acc_ref[...] = jnp.zeros_like(acc_ref)

    acc_ref[...] += jnp.dot(a_ref[...], w_ref[...],
                            preferred_element_type=jnp.float32)

    @pl.when(k == pl.num_programs(2) - 1)
    def _finalize():
        acc = acc_ref[...] + b_ref[...]            # f32 epilogue
        if act == "leaky_relu":
            acc = jnp.where(acc > 0, acc, 0.2 * acc)   # matches LeakyReLU(0.2)
        # act == "none": identity
        o_ref[...] = acc.astype(o_ref.dtype)


def _pallas_matmul_bias_act(a, w, b2d, act, out_dtype, n_valid):
    # a: (Mp, Kp) bf16, w: (Kp, Np) bf16, b2d: (1, Np) f32 -- all pre-padded.
    Mp, Kp = a.shape
    Kp2, Np = w.shape
    assert Kp == Kp2 and Np % 128 == 0 and Kp % 128 == 0 and Mp % 8 == 0

    out_bytes = jnp.dtype(out_dtype).itemsize
    tm, tn, tk = _select_tiles(Mp, Kp, Np, out_bytes)
    grid = (Mp // tm, Np // tn, Kp // tk)

    cost = pl.CostEstimate(
        flops=2 * Mp * Kp * n_valid,                 # unpadded output channels
        transcendentals=0,
        bytes_accessed=(Mp * Kp * 2 + Kp * n_valid * 2 + n_valid * 4
                        + Mp * n_valid * out_bytes),
    )

    vmem_limit = min(48 * 1024 * 1024,
                     max(32 * 1024 * 1024,
                         _tile_vmem_bytes(tm, tk, tn, out_bytes)
                         + 4 * 1024 * 1024))

    out = pl.pallas_call(
        functools.partial(_matmul_bias_act_kernel, act=act),
        grid=grid,
        in_specs=[
            pl.BlockSpec((tm, tk), lambda i, j, k: (i, k)),
            pl.BlockSpec((tk, tn), lambda i, j, k: (k, j)),
            pl.BlockSpec((1, tn), lambda i, j, k: (0, j)),
        ],
        out_specs=pl.BlockSpec((tm, tn), lambda i, j, k: (i, j)),
        out_shape=jax.ShapeDtypeStruct((Mp, Np), out_dtype),
        scratch_shapes=[pltpu.VMEM((tm, tn), jnp.float32)],
        compiler_params=pltpu.CompilerParams(
            dimension_semantics=("parallel", "parallel", "arbitrary"),
            vmem_limit_bytes=vmem_limit),
        cost_estimate=cost,
    )(a, w, b2d)
    return out


# ----------------------------------------------------------------------------
# Plain-JAX glue: im2col on bf16 NHWC activations (channels already padded).
# K ordering is (ki, kj, cin_pad) and matches the weight packing below.
# ----------------------------------------------------------------------------
def _im2col_nhwc(x, k, stride, pad):
    # x: (B, H, W, C) bf16
    B, H, W, C = x.shape
    if pad > 0:
        x = jnp.pad(x, ((0, 0), (pad, pad), (pad, pad), (0, 0)))
    OH = (H + 2 * pad - k) // stride + 1
    OW = (W + 2 * pad - k) // stride + 1
    cols = []
    for i in range(k):
        for j in range(k):
            cols.append(
                x[:, i:i + stride * OH:stride, j:j + stride * OW:stride, :])
    col = jnp.stack(cols, axis=3)                    # (B, OH, OW, k*k, C)
    col = col.reshape(B * OH * OW, k * k * C)        # (M, K) bf16
    return col, OH, OW


def _conv_layer_nhwc(x_nhwc, layer, ksize, stride, pad, act, out_dtype,
                     n_valid):
    # x_nhwc: (B, H, W, Cin_pad) bf16.  Returns (B, OH, OW, Np) with padded
    # output channels kept (they are exactly zero) so the next layer needs no
    # slice/re-pad.
    w2d, b2d = layer                 # (Kp, Np) bf16, (1, Np) f32
    B = x_nhwc.shape[0]
    col, OH, OW = _im2col_nhwc(x_nhwc, ksize, stride, pad)
    M, K = col.shape
    Kp, Np = w2d.shape
    assert K == Kp, (K, Kp)

    Mp = _round_up(M, 128) if M >= 128 else _round_up(M, 8)
    if Mp != M:
        col = jnp.pad(col, ((0, Mp - M), (0, 0)))
    out = _pallas_matmul_bias_act(col, w2d, b2d, act, out_dtype, n_valid)
    if Mp != M:
        out = out[:M]
    return out.reshape(B, OH, OW, Np)


# ----------------------------------------------------------------------------
# Parameter init (PyTorch-style) + one-time packing to TPU-friendly layout
# ----------------------------------------------------------------------------
def _pack_conv(w, b, cin_pad):
    # w: (Cout, Cin, KH, KW) PyTorch layout -> (KH*KW*cin_pad, Np) bf16 with
    # zero rows for padded input channels and zero columns / bias for padded
    # output channels.  K ordering matches _im2col_nhwc's (ki, kj, cin).
    Cout, Cin, KH, KW = w.shape
    wt = jnp.transpose(w, (2, 3, 1, 0))                          # (KH,KW,Cin,Cout)
    wt = jnp.pad(wt, ((0, 0), (0, 0), (0, cin_pad - Cin), (0, 0)))
    w2d = wt.reshape(KH * KW * cin_pad, Cout)
    Np = _round_up(Cout, 128)
    w2d = jnp.pad(w2d, ((0, 0), (0, Np - Cout))).astype(jnp.bfloat16)
    b2d = jnp.pad(b.astype(jnp.float32), (0, Np - Cout)).reshape(1, Np)
    return (w2d, b2d)


def init_discriminator_params(key, nz, ndf, img_channels):
    def conv_init(k, cout, cin, ksize):
        kw, kb = jax.random.split(k)
        fan_in = cin * ksize * ksize
        bound = 1.0 / jnp.sqrt(fan_in)
        w = jax.random.uniform(kw, (cout, cin, ksize, ksize),
                               jnp.float32, -bound, bound)
        b = jax.random.uniform(kb, (cout,), jnp.float32, -bound, bound)
        return w, b

    ks = jax.random.split(key, 5)
    w1, b1 = conv_init(ks[0], ndf, img_channels, 4)
    w2, b2 = conv_init(ks[1], ndf * 2, ndf, 4)
    w3, b3 = conv_init(ks[2], ndf * 4, ndf * 2, 4)
    w4, b4 = conv_init(ks[3], nz, ndf * 4, 4)          # encoder head (conv4)
    wd, bd = conv_init(ks[4], 1, ndf * 4, 4)           # dis head

    # Fuse the two heads: they consume the same im2col(h, k=4, s=2, p=0).
    w_head = jnp.concatenate([w4, wd], axis=0)         # (nz + 1, 4ndf, 4, 4)
    b_head = jnp.concatenate([b4, bd], axis=0)

    # Channel-padding chain: input padded to mult of 8 (so K is mult of 128);
    # after that each layer consumes the previous layer's padded Cout.
    cpad0 = _round_up(img_channels, 8)
    np1 = _round_up(ndf, 128)
    np2 = _round_up(ndf * 2, 128)
    np3 = _round_up(ndf * 4, 128)

    return {
        "conv1": _pack_conv(w1, b1, cpad0),
        "conv2": _pack_conv(w2, b2, np1),
        "conv3": _pack_conv(w3, b3, np2),
        "head":  _pack_conv(w_head, b_head, np3),
    }


# ----------------------------------------------------------------------------
# Forward (external API: NCHW f32 input, same outputs as the PyTorch module)
# ----------------------------------------------------------------------------
def discriminator_forward(params, x, *, ndf, nz):
    B, C = x.shape[0], x.shape[1]
    # NCHW -> NHWC once; bf16 once; pad input channels to the packed width.
    h = jnp.transpose(x, (0, 2, 3, 1)).astype(jnp.bfloat16)
    cpad0 = params["conv1"][0].shape[0] // 16          # Kp1 / (4*4)
    if cpad0 > C:
        h = jnp.pad(h, ((0, 0), (0, 0), (0, 0), (0, cpad0 - C)))

    h = _conv_layer_nhwc(h, params["conv1"], 4, 2, 1, "leaky_relu",
                         jnp.bfloat16, ndf)
    h = _conv_layer_nhwc(h, params["conv2"], 4, 2, 1, "leaky_relu",
                         jnp.bfloat16, ndf * 2)
    h = _conv_layer_nhwc(h, params["conv3"], 4, 2, 1, "leaky_relu",
                         jnp.bfloat16, ndf * 4)

    # Fused encoder + dis head: one shared im2col, one matmul, N = nz + 1.
    head = _conv_layer_nhwc(h, params["head"], 4, 2, 0, "none",
                            jnp.float32, nz + 1)
    enc = head[..., :nz]                               # (B, OH, OW, nz)
    dis = head[..., nz:nz + 1]                         # (B, OH, OW, 1)

    # Match PyTorch Flatten over (C, H, W).
    fc_enc = jnp.transpose(enc, (0, 3, 1, 2)).reshape(B, -1)
    fc_dis = jax.nn.sigmoid(jnp.transpose(dis, (0, 3, 1, 2)).reshape(B, -1))
    realfake = fc_dis.reshape(-1, 1)[:, 0]             # .view(-1,1).squeeze(1)
    return fc_enc, realfake


if __name__ == "__main__":
    # Small but shape-consistent config: 32x32 images so that
    # 32 -> 16 -> 8 -> 4 (k4 s2 p1 x3), then k4 s2 p0 -> 1x1.
    B, IMG_C, H, W = 2, 3, 32, 32
    NDF, NZ = 8, 16

    key = jax.random.PRNGKey(0)
    kp, kx = jax.random.split(key)
    params = init_discriminator_params(kp, NZ, NDF, IMG_C)
    x = jax.random.normal(kx, (B, IMG_C, H, W), jnp.float32)

    fwd = jax.jit(functools.partial(discriminator_forward, ndf=NDF, nz=NZ))
    fc_enc, realfake = fwd(params, x)
    jax.block_until_ready((fc_enc, realfake))

    assert fc_enc.shape == (B, NZ), fc_enc.shape
    assert realfake.shape == (B,), realfake.shape
    assert bool(jnp.all(jnp.isfinite(fc_enc)))
    assert bool(jnp.all(jnp.isfinite(realfake)))
    assert bool(jnp.all((realfake >= 0.0) & (realfake <= 1.0)))
    print("KERNEL_OK")
</pallas_src>

<mosaic_0001>
module attributes {stable_mosaic.version = 11 : i64} {
  func.func @_matmul_bias_act_kernel(%arg0: i32, %arg1: i32, %arg2: i32, %arg3: memref<256x128xbf16, #tpu.memory_space<vmem>>, %arg4: memref<128x128xbf16, #tpu.memory_space<vmem>>, %arg5: memref<1x128xf32, #tpu.memory_space<vmem>>, %arg6: memref<256x128xbf16, #tpu.memory_space<vmem>>, %arg7: memref<256x128xf32, #tpu.memory_space<vmem>>) attributes {dimension_semantics = [#tpu.dimension_semantics<parallel>, #tpu.dimension_semantics<parallel>, #tpu.dimension_semantics<arbitrary>], iteration_bounds = array<i64: 2, 1, 1>, scalar_prefetch = 0 : i64, scratch_operands = 1 : i64, tpu.core_type = #tpu.core_type<tc>, window_params = [{transform_indices = @transform_0, window_bounds = array<i64: 256, 128>}, {transform_indices = @transform_1, window_bounds = array<i64: 128, 128>}, {transform_indices = @transform_2, window_bounds = array<i64: 1, 128>}, {transform_indices = @transform_3, window_bounds = array<i64: 256, 128>}]} {
    %c0_i32 = arith.constant 0 : i32
    %0 = arith.cmpi eq, %arg2, %c0_i32 : i32
    %1 = arith.extui %0 : i1 to i32
    %c0_i32_0 = arith.constant 0 : i32
    %2 = arith.cmpi ne, %1, %c0_i32_0 : i32
    scf.if %2 {
      %cst_10 = arith.constant 0.000000e+00 : f32
      %12 = vector.broadcast %cst_10 : f32 to vector<256x128xf32>
      %c0_11 = arith.constant 0 : index
      %c0_12 = arith.constant 0 : index
      %13 = vector.load %arg7[%c0_11, %c0_12] : memref<256x128xf32, #tpu.memory_space<vmem>>, vector<256x128xf32>
      tpu.vector_store %arg7[%c0_11, %c0_12], %12 {strides = array<i32>} : memref<256x128xf32, #tpu.memory_space<vmem>>, vector<256x128xf32>,
    } else {
    }
    %c0 = arith.constant 0 : index
    %c0_1 = arith.constant 0 : index
    %3 = vector.load %arg7[%c0, %c0_1] : memref<256x128xf32, #tpu.memory_space<vmem>>, vector<256x128xf32>
    %c0_2 = arith.constant 0 : index
    %c0_3 = arith.constant 0 : index
    %4 = vector.load %arg3[%c0_2, %c0_3] : memref<256x128xbf16, #tpu.memory_space<vmem>>, vector<256x128xbf16>
    %c0_4 = arith.constant 0 : index
    %c0_5 = arith.constant 0 : index
    %5 = vector.load %arg4[%c0_4, %c0_5] : memref<128x128xbf16, #tpu.memory_space<vmem>>, vector<128x128xbf16>
    %cst = arith.constant dense<0.000000e+00> : vector<256x128xf32>
    %6 = tpu.matmul %4, %5, %cst {dimension_numbers = #tpu.dot_dimension_numbers<[1], [0], [0], [1], [0, 0, 1, 1], [], []>} : vector<256x128xbf16>, vector<128x128xbf16>, vector<256x128xf32> -> vector<256x128xf32>
    %7 = arith.addf %3, %6 : vector<256x128xf32>
    %c0_6 = arith.constant 0 : index
    %c0_7 = arith.constant 0 : index
    %8 = vector.load %arg7[%c0_6, %c0_7] : memref<256x128xf32, #tpu.memory_space<vmem>>, vector<256x128xf32>
    tpu.vector_store %arg7[%c0_6, %c0_7], %7 {strides = array<i32>} : memref<256x128xf32, #tpu.memory_space<vmem>>, vector<256x128xf32>,
    %c0_i32_8 = arith.constant 0 : i32
    %9 = arith.cmpi eq, %arg2, %c0_i32_8 : i32
    %10 = arith.extui %9 : i1 to i32
    %c0_i32_9 = arith.constant 0 : i32
    %11 = arith.cmpi ne, %10, %c0_i32_9 : i32
    scf.if %11 {
      %c0_10 = arith.constant 0 : index
      %c0_11 = arith.constant 0 : index
      %12 = vector.load %arg7[%c0_10, %c0_11] : memref<256x128xf32, #tpu.memory_space<vmem>>, vector<256x128xf32>
      %c0_12 = arith.constant 0 : index
      %c0_13 = arith.constant 0 : index
      %13 = vector.load %arg5[%c0_12, %c0_13] : memref<1x128xf32, #tpu.memory_space<vmem>>, vector<1x128xf32>
      %14 = vector.broadcast %13 : vector<1x128xf32> to vector<256x128xf32>
      %15 = arith.addf %12, %14 : vector<256x128xf32>
      %cst_14 = arith.constant 0.000000e+00 : f32
      %16 = vector.broadcast %cst_14 : f32 to vector<256x128xf32>
      %17 = arith.cmpf ogt, %15, %16 : vector<256x128xf32>
      %cst_15 = arith.constant 2.000000e-01 : f32
      %18 = vector.broadcast %cst_15 : f32 to vector<256x128xf32>
      %19 = arith.mulf %18, %15 : vector<256x128xf32>
      %20 = arith.select %17, %15, %19 : vector<256x128xi1>, vector<256x128xf32>
      %21 = arith.truncf %20 : vector<256x128xf32> to vector<256x128xbf16>
      %c0_16 = arith.constant 0 : index
      %c0_17 = arith.constant 0 : index
      %22 = vector.load %arg6[%c0_16, %c0_17] : memref<256x128xbf16, #tpu.memory_space<vmem>>, vector<256x128xbf16>
      tpu.vector_store %arg6[%c0_16, %c0_17], %21 {strides = array<i32>} : memref<256x128xbf16, #tpu.memory_space<vmem>>, vector<256x128xbf16>,
    } else {
    }
    return
  }
  func.func @transform_0(%arg0: i32, %arg1: i32, %arg2: i32) -> (i32, i32) {
    %c0_i32 = arith.constant 0 : i32
    return %arg0, %arg2 : i32, i32
  }
  func.func @transform_1(%arg0: i32, %arg1: i32, %arg2: i32) -> (i32, i32) {
    %c0_i32 = arith.constant 0 : i32
    return %arg2, %arg1 : i32, i32
  }
  func.func @transform_2(%arg0: i32, %arg1: i32, %arg2: i32) -> (i32, i32) {
    %c0_i32 = arith.constant 0 : i32
    %c0_i32_0 = arith.constant 0 : i32
    return %c0_i32, %arg1 : i32, i32
  }
  func.func @transform_3(%arg0: i32, %arg1: i32, %arg2: i32) -> (i32, i32) {
    %c0_i32 = arith.constant 0 : i32
    return %arg0, %arg1 : i32, i32
  }
}

module attributes {stable_mosaic.version = 11 : i64} {
  func.func @_matmul_bias_act_kernel(%arg0: i32, %arg1: i32, %arg2: i32, %arg3: memref<128x2048xbf16, #tpu.memory_space<vmem>>, %arg4: memref<2048x128xbf16, #tpu.memory_space<vmem>>, %arg5: memref<1x128xf32, #tpu.memory_space<vmem>>, %arg6: memref<128x128xbf16, #tpu.memory_space<vmem>>, %arg7: memref<128x128xf32, #tpu.memory_space<vmem>>) attributes {dimension_semantics = [#tpu.dimension_semantics<parallel>, #tpu.dimension_semantics<parallel>, #tpu.dimension_semantics<arbitrary>], iteration_bounds = array<i64: 1, 1, 1>, scalar_prefetch = 0 : i64, scratch_operands = 1 : i64, tpu.core_type = #tpu.core_type<tc>, window_params = [{transform_indices = @transform_0, window_bounds = array<i64: 128, 2048>}, {transform_indices = @transform_1, window_bounds = array<i64: 2048, 128>}, {transform_indices = @transform_2, window_bounds = array<i64: 1, 128>}, {transform_indices = @transform_3, window_bounds = array<i64: 128, 128>}]} {
    %c0_i32 = arith.constant 0 : i32
    %0 = arith.cmpi eq, %arg2, %c0_i32 : i32
    %1 = arith.extui %0 : i1 to i32
    %c0_i32_0 = arith.constant 0 : i32
    %2 = arith.cmpi ne, %1, %c0_i32_0 : i32
    scf.if %2 {
      %cst_10 = arith.constant 0.000000e+00 : f32
      %12 = vector.broadcast %cst_10 : f32 to vector<128x128xf32>
      %c0_11 = arith.constant 0 : index
      %c0_12 = arith.constant 0 : index
      %13 = vector.load %arg7[%c0_11, %c0_12] : memref<128x128xf32, #tpu.memory_space<vmem>>, vector<128x128xf32>
      tpu.vector_store %arg7[%c0_11, %c0_12], %12 {strides = array<i32>} : memref<128x128xf32, #tpu.memory_space<vmem>>, vector<128x128xf32>,
    } else {
    }
    %c0 = arith.constant 0 : index
    %c0_1 = arith.constant 0 : index
    %3 = vector.load %arg7[%c0, %c0_1] : memref<128x128xf32, #tpu.memory_space<vmem>>, vector<128x128xf32>
    %c0_2 = arith.constant 0 : index
    %c0_3 = arith.constant 0 : index
    %4 = vector.load %arg3[%c0_2, %c0_3] : memref<128x2048xbf16, #tpu.memory_space<vmem>>, vector<128x2048xbf16>
    %c0_4 = arith.constant 0 : index
    %c0_5 = arith.constant 0 : index
    %5 = vector.load %arg4[%c0_4, %c0_5] : memref<2048x128xbf16, #tpu.memory_space<vmem>>, vector<2048x128xbf16>
    %cst = arith.constant dense<0.000000e+00> : vector<128x128xf32>
    %6 = tpu.matmul %4, %5, %cst {dimension_numbers = #tpu.dot_dimension_numbers<[1], [0], [0], [1], [0, 0, 1, 1], [], []>} : vector<128x2048xbf16>, vector<2048x128xbf16>, vector<128x128xf32> -> vector<128x128xf32>
    %7 = arith.addf %3, %6 : vector<128x128xf32>
    %c0_6 = arith.constant 0 : index
    %c0_7 = arith.constant 0 : index
    %8 = vector.load %arg7[%c0_6, %c0_7] : memref<128x128xf32, #tpu.memory_space<vmem>>, vector<128x128xf32>
    tpu.vector_store %arg7[%c0_6, %c0_7], %7 {strides = array<i32>} : memref<128x128xf32, #tpu.memory_space<vmem>>, vector<128x128xf32>,
    %c0_i32_8 = arith.constant 0 : i32
    %9 = arith.cmpi eq, %arg2, %c0_i32_8 : i32
    %10 = arith.extui %9 : i1 to i32
    %c0_i32_9 = arith.constant 0 : i32
    %11 = arith.cmpi ne, %10, %c0_i32_9 : i32
    scf.if %11 {
      %c0_10 = arith.constant 0 : index
      %c0_11 = arith.constant 0 : index
      %12 = vector.load %arg7[%c0_10, %c0_11] : memref<128x128xf32, #tpu.memory_space<vmem>>, vector<128x128xf32>
      %c0_12 = arith.constant 0 : index
      %c0_13 = arith.constant 0 : index
      %13 = vector.load %arg5[%c0_12, %c0_13] : memref<1x128xf32, #tpu.memory_space<vmem>>, vector<1x128xf32>
      %14 = vector.broadcast %13 : vector<1x128xf32> to vector<128x128xf32>
      %15 = arith.addf %12, %14 : vector<128x128xf32>
      %cst_14 = arith.constant 0.000000e+00 : f32
      %16 = vector.broadcast %cst_14 : f32 to vector<128x128xf32>
      %17 = arith.cmpf ogt, %15, %16 : vector<128x128xf32>
      %cst_15 = arith.constant 2.000000e-01 : f32
      %18 = vector.broadcast %cst_15 : f32 to vector<128x128xf32>
      %19 = arith.mulf %18, %15 : vector<128x128xf32>
      %20 = arith.select %17, %15, %19 : vector<128x128xi1>, vector<128x128xf32>
      %21 = arith.truncf %20 : vector<128x128xf32> to vector<128x128xbf16>
      %c0_16 = arith.constant 0 : index
      %c0_17 = arith.constant 0 : index
      %22 = vector.load %arg6[%c0_16, %c0_17] : memref<128x128xbf16, #tpu.memory_space<vmem>>, vector<128x128xbf16>
      tpu.vector_store %arg6[%c0_16, %c0_17], %21 {strides = array<i32>} : memref<128x128xbf16, #tpu.memory_space<vmem>>, vector<128x128xbf16>,
    } else {
    }
    return
  }
  func.func @transform_0(%arg0: i32, %arg1: i32, %arg2: i32) -> (i32, i32) {
    %c0_i32 = arith.constant 0 : i32
    return %arg0, %arg2 : i32, i32
  }
  func.func @transform_1(%arg0: i32, %arg1: i32, %arg2: i32) -> (i32, i32) {
    %c0_i32 = arith.constant 0 : i32
    return %arg2, %arg1 : i32, i32
  }
  func.func @transform_2(%arg0: i32, %arg1: i32, %arg2: i32) -> (i32, i32) {
    %c0_i32 = arith.constant 0 : i32
    %c0_i32_0 = arith.constant 0 : i32
    return %c0_i32, %arg1 : i32, i32
  }
  func.func @transform_3(%arg0: i32, %arg1: i32, %arg2: i32) -> (i32, i32) {
    %c0_i32 = arith.constant 0 : i32
    return %arg0, %arg1 : i32, i32
  }
}

module attributes {stable_mosaic.version = 11 : i64} {
  func.func @_matmul_bias_act_kernel(%arg0: i32, %arg1: i32, %arg2: i32, %arg3: memref<32x2048xbf16, #tpu.memory_space<vmem>>, %arg4: memref<2048x128xbf16, #tpu.memory_space<vmem>>, %arg5: memref<1x128xf32, #tpu.memory_space<vmem>>, %arg6: memref<32x128xbf16, #tpu.memory_space<vmem>>, %arg7: memref<32x128xf32, #tpu.memory_space<vmem>>) attributes {dimension_semantics = [#tpu.dimension_semantics<parallel>, #tpu.dimension_semantics<parallel>, #tpu.dimension_semantics<arbitrary>], iteration_bounds = array<i64: 1, 1, 1>, scalar_prefetch = 0 : i64, scratch_operands = 1 : i64, tpu.core_type = #tpu.core_type<tc>, window_params = [{transform_indices = @transform_0, window_bounds = array<i64: 32, 2048>}, {transform_indices = @transform_1, window_bounds = array<i64: 2048, 128>}, {transform_indices = @transform_2, window_bounds = array<i64: 1, 128>}, {transform_indices = @transform_3, window_bounds = array<i64: 32, 128>}]} {
    %c0_i32 = arith.constant 0 : i32
    %0 = arith.cmpi eq, %arg2, %c0_i32 : i32
    %1 = arith.extui %0 : i1 to i32
    %c0_i32_0 = arith.constant 0 : i32
    %2 = arith.cmpi ne, %1, %c0_i32_0 : i32
    scf.if %2 {
      %cst_10 = arith.constant 0.000000e+00 : f32
      %12 = vector.broadcast %cst_10 : f32 to vector<32x128xf32>
      %c0_11 = arith.constant 0 : index
      %c0_12 = arith.constant 0 : index
      %13 = vector.load %arg7[%c0_11, %c0_12] : memref<32x128xf32, #tpu.memory_space<vmem>>, vector<32x128xf32>
      tpu.vector_store %arg7[%c0_11, %c0_12], %12 {strides = array<i32>} : memref<32x128xf32, #tpu.memory_space<vmem>>, vector<32x128xf32>,
    } else {
    }
    %c0 = arith.constant 0 : index
    %c0_1 = arith.constant 0 : index
    %3 = vector.load %arg7[%c0, %c0_1] : memref<32x128xf32, #tpu.memory_space<vmem>>, vector<32x128xf32>
    %c0_2 = arith.constant 0 : index
    %c0_3 = arith.constant 0 : index
    %4 = vector.load %arg3[%c0_2, %c0_3] : memref<32x2048xbf16, #tpu.memory_space<vmem>>, vector<32x2048xbf16>
    %c0_4 = arith.constant 0 : index
    %c0_5 = arith.constant 0 : index
    %5 = vector.load %arg4[%c0_4, %c0_5] : memref<2048x128xbf16, #tpu.memory_space<vmem>>, vector<2048x128xbf16>
    %cst = arith.constant dense<0.000000e+00> : vector<32x128xf32>
    %6 = tpu.matmul %4, %5, %cst {dimension_numbers = #tpu.dot_dimension_numbers<[1], [0], [0], [1], [0, 0, 1, 1], [], []>} : vector<32x2048xbf16>, vector<2048x128xbf16>, vector<32x128xf32> -> vector<32x128xf32>
    %7 = arith.addf %3, %6 : vector<32x128xf32>
    %c0_6 = arith.constant 0 : index
    %c0_7 = arith.constant 0 : index
    %8 = vector.load %arg7[%c0_6, %c0_7] : memref<32x128xf32, #tpu.memory_space<vmem>>, vector<32x128xf32>
    tpu.vector_store %arg7[%c0_6, %c0_7], %7 {strides = array<i32>} : memref<32x128xf32, #tpu.memory_space<vmem>>, vector<32x128xf32>,
    %c0_i32_8 = arith.constant 0 : i32
    %9 = arith.cmpi eq, %arg2, %c0_i32_8 : i32
    %10 = arith.extui %9 : i1 to i32
    %c0_i32_9 = arith.constant 0 : i32
    %11 = arith.cmpi ne, %10, %c0_i32_9 : i32
    scf.if %11 {
      %c0_10 = arith.constant 0 : index
      %c0_11 = arith.constant 0 : index
      %12 = vector.load %arg7[%c0_10, %c0_11] : memref<32x128xf32, #tpu.memory_space<vmem>>, vector<32x128xf32>
      %c0_12 = arith.constant 0 : index
      %c0_13 = arith.constant 0 : index
      %13 = vector.load %arg5[%c0_12, %c0_13] : memref<1x128xf32, #tpu.memory_space<vmem>>, vector<1x128xf32>
      %14 = vector.broadcast %13 : vector<1x128xf32> to vector<32x128xf32>
      %15 = arith.addf %12, %14 : vector<32x128xf32>
      %cst_14 = arith.constant 0.000000e+00 : f32
      %16 = vector.broadcast %cst_14 : f32 to vector<32x128xf32>
      %17 = arith.cmpf ogt, %15, %16 : vector<32x128xf32>
      %cst_15 = arith.constant 2.000000e-01 : f32
      %18 = vector.broadcast %cst_15 : f32 to vector<32x128xf32>
      %19 = arith.mulf %18, %15 : vector<32x128xf32>
      %20 = arith.select %17, %15, %19 : vector<32x128xi1>, vector<32x128xf32>
      %21 = arith.truncf %20 : vector<32x128xf32> to vector<32x128xbf16>
      %c0_16 = arith.constant 0 : index
      %c0_17 = arith.constant 0 : index
      %22 = vector.load %arg6[%c0_16, %c0_17] : memref<32x128xbf16, #tpu.memory_space<vmem>>, vector<32x128xbf16>
      tpu.vector_store %arg6[%c0_16, %c0_17], %21 {strides = array<i32>} : memref<32x128xbf16, #tpu.memory_space<vmem>>, vector<32x128xbf16>,
    } else {
    }
    return
  }
  func.func @transform_0(%arg0: i32, %arg1: i32, %arg2: i32) -> (i32, i32) {
    %c0_i32 = arith.constant 0 : i32
    return %arg0, %arg2 : i32, i32
  }
  func.func @transform_1(%arg0: i32, %arg1: i32, %arg2: i32) -> (i32, i32) {
    %c0_i32 = arith.constant 0 : i32
    return %arg2, %arg1 : i32, i32
  }
  func.func @transform_2(%arg0: i32, %arg1: i32, %arg2: i32) -> (i32, i32) {
    %c0_i32 = arith.constant 0 : i32
    %c0_i32_0 = arith.constant 0 : i32
    return %c0_i32, %arg1 : i32, i32
  }
  func.func @transform_3(%arg0: i32, %arg1: i32, %arg2: i32) -> (i32, i32) {
    %c0_i32 = arith.constant 0 : i32
    return %arg0, %arg1 : i32, i32
  }
}

module attributes {stable_mosaic.version = 11 : i64} {
  func.func @_matmul_bias_act_kernel(%arg0: i32, %arg1: i32, %arg2: i32, %arg3: memref<8x2048xbf16, #tpu.memory_space<vmem>>, %arg4: memref<2048x128xbf16, #tpu.memory_space<vmem>>, %arg5: memref<1x128xf32, #tpu.memory_space<vmem>>, %arg6: memref<8x128xf32, #tpu.memory_space<vmem>>, %arg7: memref<8x128xf32, #tpu.memory_space<vmem>>) attributes {dimension_semantics = [#tpu.dimension_semantics<parallel>, #tpu.dimension_semantics<parallel>, #tpu.dimension_semantics<arbitrary>], iteration_bounds = array<i64: 1, 1, 1>, scalar_prefetch = 0 : i64, scratch_operands = 1 : i64, tpu.core_type = #tpu.core_type<tc>, window_params = [{transform_indices = @transform_0, window_bounds = array<i64: 8, 2048>}, {transform_indices = @transform_1, window_bounds = array<i64: 2048, 128>}, {transform_indices = @transform_2, window_bounds = array<i64: 1, 128>}, {transform_indices = @transform_3, window_bounds = array<i64: 8, 128>}]} {
    %c0_i32 = arith.constant 0 : i32
    %0 = arith.cmpi eq, %arg2, %c0_i32 : i32
    %1 = arith.extui %0 : i1 to i32
    %c0_i32_0 = arith.constant 0 : i32
    %2 = arith.cmpi ne, %1, %c0_i32_0 : i32
    scf.if %2 {
      %cst_10 = arith.constant 0.000000e+00 : f32
      %12 = vector.broadcast %cst_10 : f32 to vector<8x128xf32>
      %c0_11 = arith.constant 0 : index
      %c0_12 = arith.constant 0 : index
      %13 = vector.load %arg7[%c0_11, %c0_12] : memref<8x128xf32, #tpu.memory_space<vmem>>, vector<8x128xf32>
      tpu.vector_store %arg7[%c0_11, %c0_12], %12 {strides = array<i32>} : memref<8x128xf32, #tpu.memory_space<vmem>>, vector<8x128xf32>,
    } else {
    }
    %c0 = arith.constant 0 : index
    %c0_1 = arith.constant 0 : index
    %3 = vector.load %arg7[%c0, %c0_1] : memref<8x128xf32, #tpu.memory_space<vmem>>, vector<8x128xf32>
    %c0_2 = arith.constant 0 : index
    %c0_3 = arith.constant 0 : index
    %4 = vector.load %arg3[%c0_2, %c0_3] : memref<8x2048xbf16, #tpu.memory_space<vmem>>, vector<8x2048xbf16>
    %c0_4 = arith.constant 0 : index
    %c0_5 = arith.constant 0 : index
    %5 = vector.load %arg4[%c0_4, %c0_5] : memref<2048x128xbf16, #tpu.memory_space<vmem>>, vector<2048x128xbf16>
    %cst = arith.constant dense<0.000000e+00> : vector<8x128xf32>
    %6 = tpu.matmul %4, %5, %cst {dimension_numbers = #tpu.dot_dimension_numbers<[1], [0], [0], [1], [0, 0, 1, 1], [], []>} : vector<8x2048xbf16>, vector<2048x128xbf16>, vector<8x128xf32> -> vector<8x128xf32>
    %7 = arith.addf %3, %6 : vector<8x128xf32>
    %c0_6 = arith.constant 0 : index
    %c0_7 = arith.constant 0 : index
    %8 = vector.load %arg7[%c0_6, %c0_7] : memref<8x128xf32, #tpu.memory_space<vmem>>, vector<8x128xf32>
    tpu.vector_store %arg7[%c0_6, %c0_7], %7 {strides = array<i32>} : memref<8x128xf32, #tpu.memory_space<vmem>>, vector<8x128xf32>,
    %c0_i32_8 = arith.constant 0 : i32
    %9 = arith.cmpi eq, %arg2, %c0_i32_8 : i32
    %10 = arith.extui %9 : i1 to i32
    %c0_i32_9 = arith.constant 0 : i32
    %11 = arith.cmpi ne, %10, %c0_i32_9 : i32
    scf.if %11 {
      %c0_10 = arith.constant 0 : index
      %c0_11 = arith.constant 0 : index
      %12 = vector.load %arg7[%c0_10, %c0_11] : memref<8x128xf32, #tpu.memory_space<vmem>>, vector<8x128xf32>
      %c0_12 = arith.constant 0 : index
      %c0_13 = arith.constant 0 : index
      %13 = vector.load %arg5[%c0_12, %c0_13] : memref<1x128xf32, #tpu.memory_space<vmem>>, vector<1x128xf32>
      %14 = vector.broadcast %13 : vector<1x128xf32> to vector<8x128xf32>
      %15 = arith.addf %12, %14 : vector<8x128xf32>
      %c0_14 = arith.constant 0 : index
      %c0_15 = arith.constant 0 : index
      %16 = vector.load %arg6[%c0_14, %c0_15] : memref<8x128xf32, #tpu.memory_space<vmem>>, vector<8x128xf32>
      tpu.vector_store %arg6[%c0_14, %c0_15], %15 {strides = array<i32>} : memref<8x128xf32, #tpu.memory_space<vmem>>, vector<8x128xf32>,
    } else {
    }
    return
  }
  func.func @transform_0(%arg0: i32, %arg1: i32, %arg2: i32) -> (i32, i32) {
    %c0_i32 = arith.constant 0 : i32
    return %arg0, %arg2 : i32, i32
  }
  func.func @transform_1(%arg0: i32, %arg1: i32, %arg2: i32) -> (i32, i32) {
    %c0_i32 = arith.constant 0 : i32
    return %arg2, %arg1 : i32, i32
  }
  func.func @transform_2(%arg0: i32, %arg1: i32, %arg2: i32) -> (i32, i32) {
    %c0_i32 = arith.constant 0 : i32
    %c0_i32_0 = arith.constant 0 : i32
    return %c0_i32, %arg1 : i32, i32
  }
  func.func @transform_3(%arg0: i32, %arg1: i32, %arg2: i32) -> (i32, i32) {
    %c0_i32 = arith.constant 0 : i32
    return %arg0, %arg1 : i32, i32
  }
}

</mosaic_0001>

<bundles_post_ra>
// kernel: discriminator_forward.4
= control target key start
LH: loop header
LB: loop body
LE: loop exit
PB: predicated region body
PF: predicated region fallthrough
CT: control target
= control target key end

     0   :  { %s1335_s12 = smov 0   ;;  %s1337_s13 = smov 0   ;;  %s1475_s0 = inlined_call_operand.vmem [shape: bf16[512,128], index: 0, kind: input, shape index: {}]   ;;  %s1476_s1 = inlined_call_operand.vmem [shape: bf16[128,128], index: 1, kind: input, shape index: {}]   ;;  %s1477_s2 = inlined_call_operand.vmem [shape: f32[1,128], index: 2, kind: input, shape index: {}]   ;;  %s1478_s3 = inlined_call_operand.vmem [shape: bf16[512,128], index: 3, kind: output, shape index: {}]  }
   0x1   :  { %s1339_s14 = smov 0  }
   0x2 LB: > { %s32_s15 = sadd.s32 1, %s1309_s13  ;;  %p1020_p0 = scmp.ge.s32.totalorder %s1313_s14, 1  ;;  %s1313_s14 = sphi %s1339_s14, %s13_s14   ;;  %s1309_s13 = sphi %s1337_s13, %s1480_s13   ;;  %s1305_s12 = sphi %s1335_s12, %s1479_s12  }
   0x3   : > { %p34_p1 = scmp.ge.s32.totalorder %s32_s15, 2  ;;  %p188_p2 = scmp.lt.s32.totalorder %s1313_s14, 3 }
   0x5   : > { %s1482_s15 = smov (%p34_p1, %s32_s15), 0  ;;  %p189_p3 = pnand %p1020_p0, %p188_p2 }
   0x6   : > { %s1021_s24 = sshll.u32 (!%p189_p3), %s1305_s12, 5 }
   0x7   : > { %192 = sbr.rel (%p189_p3) target bundleno = 242 (0xf2), region = 32  ;;  %p230_p4 = scmp.lt.s32.totalorder (!%p189_p3), %s1021_s24, 63 }
   0xc   : > { %v1146_v0 = vld [vmem:[%s1476_s1 + $0x38] sm:$0xff]  ;;  %v1145_v1 = vld [vmem:[%s1476_s1 + $0x30] sm:$0xff]  ;;  %v1144_v2 = vld [vmem:[%s1476_s1 + $0x28] sm:$0xff]  ;;  %s1484_s24 = smov (!%p230_p4, %s1021_s24), 63 }
   0xd   : > { %519 = vmatpush.bf16.msra.mxu0 %v1146_v0  ;;  %1242 = vmatpush.bf16.msra.mxu1 %v1146_v0  ;;  %v1143_v3 = vld [vmem:[%s1476_s1 + $0x20] sm:$0xff]  ;;  %v1142_v4 = vld [vmem:[%s1476_s1 + $0x18] sm:$0xff]  ;;  %v1141_v5 = vld [vmem:[%s1476_s1 + $0x10] sm:$0xff]  ;;  %s1022_s4 = sshll.u32 %s1484_s24, 2 }
   0xe   : > { %1243 = vmatpush.bf16.msra.mxu2 %v1146_v0  ;;  %1244 = vmatpush.bf16.msra.mxu3 %v1146_v0  ;;  %v1140_v6 = vld [vmem:[%s1476_s1 + $0x8] sm:$0xff]  ;;  %v1139_v7 = vld [vmem:[%s1476_s1] sm:$0xff]  ;;  %s1388_s9 = scalar_lea.vmem %s1475_s0, %s1022_s4  ;;  %s1422_s17 = scalar_lea.vmem %s1478_s3, %s1022_s4 }
   0xf   : > { %v1123_v8 = vld [vmem:[%s1388_s9] sm:$0xff]  ;;  %v1124_v12 = vld [vmem:[%s1388_s9 + $0x8] sm:$0xff]  ;;  %v1125_v16 = vld [vmem:[%s1388_s9 + $0x10] sm:$0xff] }
  0x10   : > { %v1127_v9 = vld [vmem:[%s1388_s9 + $0x20] sm:$0xff]  ;;  %v1128_v13 = vld [vmem:[%s1388_s9 + $0x28] sm:$0xff]  ;;  %v1129_v17 = vld [vmem:[%s1388_s9 + $0x30] sm:$0xff] }
  0x11   : > { %520 = vmatpush.bf16.msra.mxu0 %v1145_v1  ;;  %1245 = vmatpush.bf16.msra.mxu1 %v1145_v1  ;;  %v1131_v10 = vld [vmem:[%s1388_s9 + $0x40] sm:$0xff]  ;;  %v1132_v14 = vld [vmem:[%s1388_s9 + $0x48] sm:$0xff]  ;;  %v1133_v18 = vld [vmem:[%s1388_s9 + $0x50] sm:$0xff] }
  0x12   : > { %1246 = vmatpush.bf16.msra.mxu2 %v1145_v1  ;;  %1247 = vmatpush.bf16.msra.mxu3 %v1145_v1  ;;  %v1135_v11 = vld [vmem:[%s1388_s9 + $0x60] sm:$0xff]  ;;  %v1136_v15 = vld [vmem:[%s1388_s9 + $0x68] sm:$0xff]  ;;  %v1137_v19 = vld [vmem:[%s1388_s9 + $0x70] sm:$0xff] }
  0x13   : > { %v1126_v20 = vld [vmem:[%s1388_s9 + $0x18] sm:$0xff]  ;;  %v1409_v26 = vld [vmem:[%s1477_s2] ss:$0 sm:$0xff] }
  0x14   : > { %v1130_v21 = vld [vmem:[%s1388_s9 + $0x38] sm:$0xff] }
  0x15   : > { %521 = vmatpush.bf16.msra.mxu0 %v1144_v2  ;;  %1248 = vmatpush.bf16.msra.mxu1 %v1144_v2  ;;  %v1134_v22 = vld [vmem:[%s1388_s9 + $0x58] sm:$0xff] }
  0x16   : > { %1249 = vmatpush.bf16.msra.mxu2 %v1144_v2  ;;  %1250 = vmatpush.bf16.msra.mxu3 %v1144_v2  ;;  %v1138_v23 = vld [vmem:[%s1388_s9 + $0x78] sm:$0xff] }
  0x19   : > { %522 = vmatpush.bf16.msra.mxu0 %v1143_v3  ;;  %1251 = vmatpush.bf16.msra.mxu1 %v1143_v3 }
  0x1a   : > { %1252 = vmatpush.bf16.msra.mxu2 %v1143_v3  ;;  %1253 = vmatpush.bf16.msra.mxu3 %v1143_v3 }
  0x1d   : > { %523 = vmatpush.bf16.msra.mxu0 %v1142_v4  ;;  %1254 = vmatpush.bf16.msra.mxu1 %v1142_v4 }
  0x1e   : > { %1255 = vmatpush.bf16.msra.mxu2 %v1142_v4  ;;  %1256 = vmatpush.bf16.msra.mxu3 %v1142_v4 }
  0x21   : > { %524 = vmatpush.bf16.msra.mxu0 %v1141_v5  ;;  %1257 = vmatpush.bf16.msra.mxu1 %v1141_v5 }
  0x22   : > { %1258 = vmatpush.bf16.msra.mxu2 %v1141_v5  ;;  %1259 = vmatpush.bf16.msra.mxu3 %v1141_v5 }
  0x25   : > { %525 = vmatpush.bf16.msra.mxu0 %v1140_v6  ;;  %1260 = vmatpush.bf16.msra.mxu1 %v1140_v6 }
  0x26   : > { %1261 = vmatpush.bf16.msra.mxu2 %v1140_v6  ;;  %1262 = vmatpush.bf16.msra.mxu3 %v1140_v6 }
  0x29   : > { %526 = vmatpush.bf16.msra.mxu0 %v1139_v7  ;;  %1263 = vmatpush.bf16.msra.mxu1 %v1139_v7 }
  0x2a   : > { %1264 = vmatpush.bf16.msra.mxu2 %v1139_v7  ;;  %1265 = vmatpush.bf16.msra.mxu3 %v1139_v7 }
  0x2c   : > { %527 = vmatmul.bf16.vlgmr.msra.gmra.mxu0 %v1123_v8  ;;  %547 = vmatmul.bf16.vlgmr.msra.gmra.mxu1 %v1127_v9 }
  0x2d   : > { %567 = vmatmul.bf16.vlgmr.msra.gmra.mxu2 %v1131_v10  ;;  %587 = vmatmul.bf16.vlgmr.msra.gmra.mxu3 %v1135_v11 }
  0x3c   : > { %532 = vmatmul.bf16.gmra.mxu0 %v1124_v12  ;;  %552 = vmatmul.bf16.gmra.mxu1 %v1128_v13 }
  0x3d   : > { %572 = vmatmul.bf16.gmra.mxu2 %v1132_v14  ;;  %592 = vmatmul.bf16.gmra.mxu3 %v1136_v15 }
  0x4c   : > { %537 = vmatmul.bf16.gmra.mxu0 %v1125_v16  ;;  %557 = vmatmul.bf16.gmra.mxu1 %v1129_v17 }
  0x4d   : > { %577 = vmatmul.bf16.gmra.mxu2 %v1133_v18  ;;  %597 = vmatmul.bf16.gmra.mxu3 %v1137_v19 }
  0x5c   : > { %542 = vmatmul.bf16.gmra.mxu0 %v1126_v20  ;;  %562 = vmatmul.bf16.gmra.mxu1 %v1130_v21 }
  0x5d   : > { %582 = vmatmul.bf16.gmra.mxu2 %v1134_v22  ;;  %602 = vmatmul.bf16.gmra.mxu3 %v1138_v23 }
  0xa9   : > { %v528_v24 = vpop.f32.mrf.mxu0  ;;  %v548_v25 = vpop.f32.mrf.mxu1 }
  0xaa   : > { %v711_v27 = vadd.f32 %v1409_v26, %v528_v24  ;;  %v719_v28 = vadd.f32 %v1409_v26, %v548_v25 }
  0xac   : > { %v775_v33 = vmul.f32 0.2, %v711_v27  ;;  %v783_v34 = vmul.f32 0.2, %v719_v28  ;;  %vm743_vm0 = vcmp.gt.f32.partialorder %v711_v27, 0.0  ;;  %vm751_vm1 = vcmp.gt.f32.partialorder %v719_v28, 0.0 }
  0xae   : > { %v807_v41 = vsel %vm743_vm0, %v711_v27, %v775_v33  ;;  %v815_v42 = vsel %vm751_vm1, %v719_v28, %v783_v34 }
  0xb0   : > { %v568_v29 = vpop.f32.mrf.mxu2  ;;  %v588_v30 = vpop.f32.mrf.mxu3 }
  0xb1   : > { %v530_v31 = vpop.f32.mrf.mxu0  ;;  %v550_v32 = vpop.f32.mrf.mxu1  ;;  %v727_v39 = vadd.f32 %v1409_v26, %v568_v29  ;;  %v735_v40 = vadd.f32 %v1409_v26, %v588_v30 }
  0xb2   : > { %v712_v35 = vadd.f32 %v1409_v26, %v530_v31  ;;  %v720_v36 = vadd.f32 %v1409_v26, %v550_v32 }
  0xb3   : > { %v791_v49 = vmul.f32 0.2, %v727_v39  ;;  %v799_v50 = vmul.f32 0.2, %v735_v40  ;;  %vm759_vm4 = vcmp.gt.f32.partialorder %v727_v39, 0.0  ;;  %vm767_vm5 = vcmp.gt.f32.partialorder %v735_v40, 0.0 }
  0xb4   : > { %vm744_vm2 = vcmp.gt.f32.partialorder %v712_v35, 0.0  ;;  %v776_v37 = vmul.f32 0.2, %v712_v35  ;;  %vm752_vm3 = vcmp.gt.f32.partialorder %v720_v36, 0.0  ;;  %v784_v38 = vmul.f32 0.2, %v720_v36 }
  0xb5   : > { %v823_v57 = vsel %vm759_vm4, %v727_v39, %v791_v49  ;;  %v831_v58 = vsel %vm767_vm5, %v735_v40, %v799_v50 }
  0xb6   : > { %v808_v43 = vsel %vm744_vm2, %v712_v35, %v776_v37  ;;  %v816_v44 = vsel %vm752_vm3, %v720_v36, %v784_v38 }
  0xb7   : > { %v1150_v45 = vpack.c.bf16 %v808_v43, %v807_v41  ;;  %v1170_v46 = vpack.c.bf16 %v816_v44, %v815_v42 }
  0xb8   : > { %v570_v47 = vpop.f32.mrf.mxu2  ;;  %v590_v48 = vpop.f32.mrf.mxu3 }
  0xb9   : > { %1151 = vst [vmem:[%s1422_s17] sm:$0xff] %v1150_v45   ;;  %v728_v51 = vadd.f32 %v1409_v26, %v570_v47  ;;  %v736_v52 = vadd.f32 %v1409_v26, %v590_v48  ;;  %v533_v53 = vpop.f32.mrf.mxu0  ;;  %v553_v54 = vpop.f32.mrf.mxu1 }
  0xba   : > { %1230 = vst [vmem:[%s1422_s17 + $0x20] sm:$0xff] %v1170_v46   ;;  %v713_v63 = vadd.f32 %v1409_v26, %v533_v53  ;;  %v721_v0 = vadd.f32 %v1409_v26, %v553_v54 }
  0xbb   : > { %vm760_vm6 = vcmp.gt.f32.partialorder %v728_v51, 0.0  ;;  %v792_v55 = vmul.f32 0.2, %v728_v51  ;;  %vm768_vm7 = vcmp.gt.f32.partialorder %v736_v52, 0.0  ;;  %v800_v56 = vmul.f32 0.2, %v736_v52 }
  0xbc   : > { %v777_v5 = vmul.f32 0.2, %v713_v63  ;;  %v785_v6 = vmul.f32 0.2, %v721_v0  ;;  %vm745_vm8 = vcmp.gt.f32.partialorder %v713_v63, 0.0  ;;  %vm753_vm9 = vcmp.gt.f32.partialorder %v721_v0, 0.0 }
  0xbd   : > { %v824_v59 = vsel %vm760_vm6, %v728_v51, %v792_v55  ;;  %v832_v60 = vsel %vm768_vm7, %v736_v52, %v800_v56 }
  0xbe   : > { %v1190_v61 = vpack.c.bf16 %v824_v59, %v823_v57  ;;  %v1210_v62 = vpack.c.bf16 %v832_v60, %v831_v58  ;;  %v809_v13 = vsel %vm745_vm8, %v713_v63, %v777_v5  ;;  %v817_v14 = vsel %vm753_vm9, %v721_v0, %v785_v6 }
  0xc0   : > { %1234 = vst [vmem:[%s1422_s17 + $0x40] sm:$0xff] %v1190_v61   ;;  %v573_v1 = vpop.f32.mrf.mxu2  ;;  %v593_v2 = vpop.f32.mrf.mxu3 }
  0xc1   : > { %1238 = vst [vmem:[%s1422_s17 + $0x60] sm:$0xff] %v1210_v62   ;;  %v535_v3 = vpop.f32.mrf.mxu0  ;;  %v555_v4 = vpop.f32.mrf.mxu1  ;;  %v729_v11 = vadd.f32 %v1409_v26, %v573_v1  ;;  %v737_v12 = vadd.f32 %v1409_v26, %v593_v2 }
  0xc2   : > { %v714_v7 = vadd.f32 %v1409_v26, %v535_v3  ;;  %v722_v8 = vadd.f32 %v1409_v26, %v555_v4 }
  0xc3   : > { %v793_v21 = vmul.f32 0.2, %v729_v11  ;;  %v801_v22 = vmul.f32 0.2, %v737_v12  ;;  %vm761_vm12 = vcmp.gt.f32.partialorder %v729_v11, 0.0  ;;  %vm769_vm13 = vcmp.gt.f32.partialorder %v737_v12, 0.0 }
  0xc4   : > { %vm746_vm10 = vcmp.gt.f32.partialorder %v714_v7, 0.0  ;;  %v778_v9 = vmul.f32 0.2, %v714_v7  ;;  %vm754_vm11 = vcmp.gt.f32.partialorder %v722_v8, 0.0  ;;  %v786_v10 = vmul.f32 0.2, %v722_v8 }
  0xc5   : > { %v825_v30 = vsel %vm761_vm12, %v729_v11, %v793_v21  ;;  %v833_v31 = vsel %vm769_vm13, %v737_v12, %v801_v22 }
  0xc6   : > { %v810_v15 = vsel %vm746_vm10, %v714_v7, %v778_v9  ;;  %v818_v16 = vsel %vm754_vm11, %v722_v8, %v786_v10 }
  0xc7   : > { %v1155_v17 = vpack.c.bf16 %v810_v15, %v809_v13  ;;  %v1175_v18 = vpack.c.bf16 %v818_v16, %v817_v14 }
  0xc8   : > { %v575_v19 = vpop.f32.mrf.mxu2  ;;  %v595_v20 = vpop.f32.mrf.mxu3 }
  0xc9   : > { %1227 = vst [vmem:[%s1422_s17 + $0x8] sm:$0xff] %v1155_v17   ;;  %v730_v23 = vadd.f32 %v1409_v26, %v575_v19  ;;  %v738_v24 = vadd.f32 %v1409_v26, %v595_v20  ;;  %v538_v25 = vpop.f32.mrf.mxu0  ;;  %v558_v27 = vpop.f32.mrf.mxu1 }
  0xca   : > { %1231 = vst [vmem:[%s1422_s17 + $0x28] sm:$0xff] %v1175_v18   ;;  %v715_v36 = vadd.f32 %v1409_v26, %v538_v25  ;;  %v723_v37 = vadd.f32 %v1409_v26, %v558_v27 }
  0xcb   : > { %vm762_vm14 = vcmp.gt.f32.partialorder %v730_v23, 0.0  ;;  %v794_v28 = vmul.f32 0.2, %v730_v23  ;;  %vm770_vm15 = vcmp.gt.f32.partialorder %v738_v24, 0.0  ;;  %v802_v29 = vmul.f32 0.2, %v738_v24 }
  0xcc   : > { %v779_v42 = vmul.f32 0.2, %v715_v36  ;;  %v787_v43 = vmul.f32 0.2, %v723_v37  ;;  %vm747_vm0 = vcmp.gt.f32.partialorder %v715_v36, 0.0  ;;  %vm755_vm1 = vcmp.gt.f32.partialorder %v723_v37, 0.0 }
  0xcd   : > { %v826_v32 = vsel %vm762_vm14, %v730_v23, %v794_v28  ;;  %v834_v33 = vsel %vm770_vm15, %v738_v24, %v802_v29 }
  0xce   : > { %v1195_v34 = vpack.c.bf16 %v826_v32, %v825_v30  ;;  %v1215_v35 = vpack.c.bf16 %v834_v33, %v833_v31  ;;  %v811_v50 = vsel %vm747_vm0, %v715_v36, %v779_v42  ;;  %v819_v51 = vsel %vm755_vm1, %v723_v37, %v787_v43 }
  0xd0   : > { %1235 = vst [vmem:[%s1422_s17 + $0x48] sm:$0xff] %v1195_v34   ;;  %v578_v38 = vpop.f32.mrf.mxu2  ;;  %v598_v39 = vpop.f32.mrf.mxu3 }
  0xd1   : > { %1239 = vst [vmem:[%s1422_s17 + $0x68] sm:$0xff] %v1215_v35   ;;  %v540_v40 = vpop.f32.mrf.mxu0  ;;  %v560_v41 = vpop.f32.mrf.mxu1  ;;  %v731_v48 = vadd.f32 %v1409_v26, %v578_v38  ;;  %v739_v49 = vadd.f32 %v1409_v26, %v598_v39 }
  0xd2   : > { %v716_v44 = vadd.f32 %v1409_v26, %v540_v40  ;;  %v724_v45 = vadd.f32 %v1409_v26, %v560_v41 }
  0xd3   : > { %v795_v58 = vmul.f32 0.2, %v731_v48  ;;  %v803_v59 = vmul.f32 0.2, %v739_v49  ;;  %vm763_vm4 = vcmp.gt.f32.partialorder %v731_v48, 0.0  ;;  %vm771_vm5 = vcmp.gt.f32.partialorder %v739_v49, 0.0 }
  0xd4   : > { %vm748_vm2 = vcmp.gt.f32.partialorder %v716_v44, 0.0  ;;  %v780_v46 = vmul.f32 0.2, %v716_v44  ;;  %vm756_vm3 = vcmp.gt.f32.partialorder %v724_v45, 0.0  ;;  %v788_v47 = vmul.f32 0.2, %v724_v45 }
  0xd5   : > { %v827_v2 = vsel %vm763_vm4, %v731_v48, %v795_v58  ;;  %v835_v3 = vsel %vm771_vm5, %v739_v49, %v803_v59 }
  0xd6   : > { %v812_v52 = vsel %vm748_vm2, %v716_v44, %v780_v46  ;;  %v820_v53 = vsel %vm756_vm3, %v724_v45, %v788_v47 }
  0xd7   : > { %v1160_v54 = vpack.c.bf16 %v812_v52, %v811_v50  ;;  %v1180_v55 = vpack.c.bf16 %v820_v53, %v819_v51 }
  0xd8   : > { %v580_v56 = vpop.f32.mrf.mxu2  ;;  %v600_v57 = vpop.f32.mrf.mxu3 }
  0xd9   : > { %1228 = vst [vmem:[%s1422_s17 + $0x10] sm:$0xff] %v1160_v54   ;;  %v732_v60 = vadd.f32 %v1409_v26, %v580_v56  ;;  %v740_v61 = vadd.f32 %v1409_v26, %v600_v57  ;;  %v543_v62 = vpop.f32.mrf.mxu0  ;;  %v563_v63 = vpop.f32.mrf.mxu1 }
  0xda   : > { %1232 = vst [vmem:[%s1422_s17 + $0x30] sm:$0xff] %v1180_v55   ;;  %v717_v8 = vadd.f32 %v1409_v26, %v543_v62  ;;  %v725_v9 = vadd.f32 %v1409_v26, %v563_v63 }
  0xdb   : > { %vm764_vm6 = vcmp.gt.f32.partialorder %v732_v60, 0.0  ;;  %v796_v0 = vmul.f32 0.2, %v732_v60  ;;  %vm772_vm7 = vcmp.gt.f32.partialorder %v740_v61, 0.0  ;;  %v804_v1 = vmul.f32 0.2, %v740_v61 }
  0xdc   : > { %v781_v14 = vmul.f32 0.2, %v717_v8  ;;  %v789_v15 = vmul.f32 0.2, %v725_v9  ;;  %vm749_vm8 = vcmp.gt.f32.partialorder %v717_v8, 0.0  ;;  %vm757_vm9 = vcmp.gt.f32.partialorder %v725_v9, 0.0 }
  0xdd   : > { %v828_v4 = vsel %vm764_vm6, %v732_v60, %v796_v0  ;;  %v836_v5 = vsel %vm772_vm7, %v740_v61, %v804_v1 }
  0xde   : > { %v1200_v6 = vpack.c.bf16 %v828_v4, %v827_v2  ;;  %v1220_v7 = vpack.c.bf16 %v836_v5, %v835_v3  ;;  %v813_v22 = vsel %vm749_vm8, %v717_v8, %v781_v14  ;;  %v821_v23 = vsel %vm757_vm9, %v725_v9, %v789_v15 }
  0xe0   : > { %1236 = vst [vmem:[%s1422_s17 + $0x50] sm:$0xff] %v1200_v6   ;;  %v583_v10 = vpop.f32.mrf.mxu2  ;;  %v603_v11 = vpop.f32.mrf.mxu3 }
  0xe1   : > { %1240 = vst [vmem:[%s1422_s17 + $0x70] sm:$0xff] %v1220_v7   ;;  %v545_v12 = vpop.f32.mrf.mxu0  ;;  %v565_v13 = vpop.f32.mrf.mxu1  ;;  %v733_v20 = vadd.f32 %v1409_v26, %v583_v10  ;;  %v741_v21 = vadd.f32 %v1409_v26, %v603_v11 }
  0xe2   : > { %v718_v16 = vadd.f32 %v1409_v26, %v545_v12  ;;  %v726_v17 = vadd.f32 %v1409_v26, %v565_v13 }
  0xe3   : > { %v797_v31 = vmul.f32 0.2, %v733_v20  ;;  %v805_v32 = vmul.f32 0.2, %v741_v21  ;;  %vm765_vm12 = vcmp.gt.f32.partialorder %v733_v20, 0.0  ;;  %vm773_vm13 = vcmp.gt.f32.partialorder %v741_v21, 0.0 }
  0xe4   : > { %vm750_vm10 = vcmp.gt.f32.partialorder %v718_v16, 0.0  ;;  %v782_v18 = vmul.f32 0.2, %v718_v16  ;;  %vm758_vm11 = vcmp.gt.f32.partialorder %v726_v17, 0.0  ;;  %v790_v19 = vmul.f32 0.2, %v726_v17 }
  0xe5   : > { %v829_v37 = vsel %vm765_vm12, %v733_v20, %v797_v31  ;;  %v837_v38 = vsel %vm773_vm13, %v741_v21, %v805_v32 }
  0xe6   : > { %v814_v24 = vsel %vm750_vm10, %v718_v16, %v782_v18  ;;  %v822_v25 = vsel %vm758_vm11, %v726_v17, %v790_v19 }
  0xe7   : > { %v1165_v27 = vpack.c.bf16 %v814_v24, %v813_v22  ;;  %v1185_v28 = vpack.c.bf16 %v822_v25, %v821_v23 }
  0xe8   : > { %v585_v29 = vpop.f32.mrf.mxu2  ;;  %v605_v30 = vpop.f32.mrf.mxu3 }
  0xe9   : > { %1229 = vst [vmem:[%s1422_s17 + $0x18] sm:$0xff] %v1165_v27   ;;  %v734_v33 = vadd.f32 %v1409_v26, %v585_v29  ;;  %v742_v34 = vadd.f32 %v1409_v26, %v605_v30 }
  0xea   : > { %1233 = vst [vmem:[%s1422_s17 + $0x38] sm:$0xff] %v1185_v28  }
  0xeb   : > { %vm766_vm14 = vcmp.gt.f32.partialorder %v734_v33, 0.0  ;;  %v798_v35 = vmul.f32 0.2, %v734_v33  ;;  %vm774_vm15 = vcmp.gt.f32.partialorder %v742_v34, 0.0  ;;  %v806_v36 = vmul.f32 0.2, %v742_v34 }
  0xed   : > { %v830_v39 = vsel %vm766_vm14, %v734_v33, %v798_v35  ;;  %v838_v40 = vsel %vm774_vm15, %v742_v34, %v806_v36 }
  0xee   : > { %v1205_v41 = vpack.c.bf16 %v830_v39, %v829_v37  ;;  %v1225_v42 = vpack.c.bf16 %v838_v40, %v837_v38 }
  0xf0   : > { %1237 = vst [vmem:[%s1422_s17 + $0x58] sm:$0xff] %v1205_v41  }
  0xf1   : > { %1241 = vst [vmem:[%s1422_s17 + $0x78] sm:$0xff] %v1225_v42  }
  0xf2 PF: > { %s13_s14 = sadd.s32 1, %s1313_s14   ;;  %s1479_s12 = smov %s1309_s13 }
  0xf3   : > { %p10_p5 = scmp.ge.s32.totalorder %s13_s14, 4   ;;  %s1480_s13 = smov %s1482_s15 }
  0xf5   :  { %12 = sbr.rel (!%p10_p5) target bundleno = 2 (0x2), region = 76 }

// kernel: discriminator_forward.5
= control target key start
LH: loop header
LB: loop body
LE: loop exit
PB: predicated region body
PF: predicated region fallthrough
CT: control target
= control target key end

     0   :  { %s5470_s1 = inlined_call_operand.vmem [shape: bf16[2048,128], index: 1, kind: input, shape index: {}]   ;;  %s5471_s0 = inlined_call_operand.vmem [shape: bf16[128,2048], index: 0, kind: input, shape index: {}]   ;;  %s5472_s2 = inlined_call_operand.vmem [shape: f32[1,128], index: 2, kind: input, shape index: {}]   ;;  %s5473_s3 = inlined_call_operand.vmem [shape: bf16[128,128], index: 3, kind: output, shape index: {}]  }
   0x1   :  { %v3940_v0 = vld [vmem:[%s5470_s1 + $0x38] sm:$0xff]  ;;  %v3939_v4 = vld [vmem:[%s5470_s1 + $0x30] sm:$0xff]  ;;  %v3938_v8 = vld [vmem:[%s5470_s1 + $0x28] sm:$0xff] }
   0x2   :  { %v3948_v1 = vld [vmem:[%s5470_s1 + $0x78] sm:$0xff]  ;;  %1842 = vmatpush.bf16.msra.mxu0 %v3940_v0  ;;  %v3947_v5 = vld [vmem:[%s5470_s1 + $0x70] sm:$0xff]  ;;  %v3946_v9 = vld [vmem:[%s5470_s1 + $0x68] sm:$0xff] }
   0x3   :  { %v3956_v2 = vld [vmem:[%s5470_s1 + $0xb8] sm:$0xff]  ;;  %1891 = vmatpush.bf16.msra.mxu1 %v3948_v1  ;;  %v3955_v6 = vld [vmem:[%s5470_s1 + $0xb0] sm:$0xff]  ;;  %v3954_v10 = vld [vmem:[%s5470_s1 + $0xa8] sm:$0xff] }
   0x4   :  { %v3964_v3 = vld [vmem:[%s5470_s1 + $0xf8] sm:$0xff]  ;;  %1940 = vmatpush.bf16.msra.mxu2 %v3956_v2  ;;  %v3963_v7 = vld [vmem:[%s5470_s1 + $0xf0] sm:$0xff]  ;;  %v3962_v11 = vld [vmem:[%s5470_s1 + $0xe8] sm:$0xff] }
   0x5   :  { %1989 = vmatpush.bf16.msra.mxu3 %v3964_v3  ;;  %v3937_v12 = vld [vmem:[%s5470_s1 + $0x20] sm:$0xff]  ;;  %v3936_v16 = vld [vmem:[%s5470_s1 + $0x18] sm:$0xff]  ;;  %v3935_v20 = vld [vmem:[%s5470_s1 + $0x10] sm:$0xff] }
   0x6   :  { %1843 = vmatpush.bf16.msra.mxu0 %v3939_v4  ;;  %v3945_v13 = vld [vmem:[%s5470_s1 + $0x60] sm:$0xff]  ;;  %v3944_v17 = vld [vmem:[%s5470_s1 + $0x58] sm:$0xff]  ;;  %v3943_v21 = vld [vmem:[%s5470_s1 + $0x50] sm:$0xff] }
   0x7   :  { %1892 = vmatpush.bf16.msra.mxu1 %v3947_v5  ;;  %v3953_v14 = vld [vmem:[%s5470_s1 + $0xa0] sm:$0xff]  ;;  %v3952_v18 = vld [vmem:[%s5470_s1 + $0x98] sm:$0xff]  ;;  %v3951_v22 = vld [vmem:[%s5470_s1 + $0x90] sm:$0xff] }
   0x8   :  { %1941 = vmatpush.bf16.msra.mxu2 %v3955_v6  ;;  %v3961_v15 = vld [vmem:[%s5470_s1 + $0xe0] sm:$0xff]  ;;  %v3960_v19 = vld [vmem:[%s5470_s1 + $0xd8] sm:$0xff]  ;;  %v3959_v23 = vld [vmem:[%s5470_s1 + $0xd0] sm:$0xff] }
   0x9   :  { %1990 = vmatpush.bf16.msra.mxu3 %v3963_v7  ;;  %v3934_v24 = vld [vmem:[%s5470_s1 + $0x8] sm:$0xff]  ;;  %v3933_v28 = vld [vmem:[%s5470_s1] sm:$0xff]  ;;  %v3988_v40 = vld [vmem:[%s5470_s1 + $0x1b8] sm:$0xff] }
   0xa   :  { %1844 = vmatpush.bf16.msra.mxu0 %v3938_v8  ;;  %v3942_v25 = vld [vmem:[%s5470_s1 + $0x48] sm:$0xff]  ;;  %v3941_v29 = vld [vmem:[%s5470_s1 + $0x40] sm:$0xff]  ;;  %v3972_v41 = vld [vmem:[%s5470_s1 + $0x138] sm:$0xff] }
   0xb   :  { %1893 = vmatpush.bf16.msra.mxu1 %v3946_v9  ;;  %v3950_v26 = vld [vmem:[%s5470_s1 + $0x88] sm:$0xff]  ;;  %v3949_v30 = vld [vmem:[%s5470_s1 + $0x80] sm:$0xff]  ;;  %v3996_v46 = vld [vmem:[%s5470_s1 + $0x1f8] sm:$0xff] }
   0xc   :  { %1942 = vmatpush.bf16.msra.mxu2 %v3954_v10  ;;  %v3958_v27 = vld [vmem:[%s5470_s1 + $0xc8] sm:$0xff]  ;;  %v3957_v31 = vld [vmem:[%s5470_s1 + $0xc0] sm:$0xff]  ;;  %v3980_v47 = vld [vmem:[%s5470_s1 + $0x178] sm:$0xff] }
   0xd   :  { %1991 = vmatpush.bf16.msra.mxu3 %v3962_v11  ;;  %v2783_v32 = vld [vmem:[%s5471_s0] sm:$0xf]  ;;  %v3805_v34 = vld [vmem:[%s5471_s0 + $0x4] sm:$0xf]  ;;  %v2791_v36 = vld [vmem:[%s5471_s0 + $0x8] sm:$0xf] }
   0xe   :  { %1845 = vmatpush.bf16.msra.mxu0 %v3937_v12  ;;  %v3813_v33 = vld [vmem:[%s5471_s0 + $0x3c] sm:$0xf0]  ;;  %v2785_v35 = vld [vmem:[%s5471_s0 + $0x40] sm:$0xf0]  ;;  %v3814_v37 = vld [vmem:[%s5471_s0 + $0x44] sm:$0xf0] }
   0xf   :  { %1894 = vmatpush.bf16.msra.mxu1 %v3945_v13  ;;  %v3806_v38 = vld [vmem:[%s5471_s0 + $0xc] sm:$0xf]  ;;  %v2784_v42 = vor.u32 %v3813_v33, %v2783_v32  ;;  %v2788_v43 = vor.u32 %v3805_v34, %v2785_v35  ;;  %v2792_v44 = vor.u32 %v3814_v37, %v2791_v36  ;;  %v3987_v48 = vld [vmem:[%s5470_s1 + $0x1b0] sm:$0xff]  ;;  %v2847_v56 = vld [vmem:[%s5471_s0 + $0x80] sm:$0xf] }
  0x10   :  { %1943 = vmatpush.bf16.msra.mxu2 %v3953_v14  ;;  %v2793_v39 = vld [vmem:[%s5471_s0 + $0x48] sm:$0xf0]  ;;  %v3971_v49 = vld [vmem:[%s5470_s1 + $0x130] sm:$0xff]  ;;  %v3829_v57 = vld [vmem:[%s5471_s0 + $0xbc] sm:$0xf0] }
  0x11   :  { %1992 = vmatpush.bf16.msra.mxu3 %v3961_v15  ;;  %v2796_v45 = vor.u32 %v3806_v38, %v2793_v39  ;;  %v3995_v50 = vld [vmem:[%s5470_s1 + $0x1f0] sm:$0xff]  ;;  %v3986_v52 = vld [vmem:[%s5470_s1 + $0x1a8] sm:$0xff]  ;;  %v3821_v58 = vld [vmem:[%s5471_s0 + $0x84] sm:$0xf]  ;;  %v2848_v0 = vor.u32 %v3829_v57, %v2847_v56 }
  0x12   :  { %1846 = vmatpush.bf16.msra.mxu0 %v3936_v16  ;;  %v3979_v51 = vld [vmem:[%s5470_s1 + $0x170] sm:$0xff]  ;;  %v3970_v53 = vld [vmem:[%s5470_s1 + $0x128] sm:$0xff]  ;;  %v2849_v59 = vld [vmem:[%s5471_s0 + $0xc0] sm:$0xf0] }
  0x13   :  { %1895 = vmatpush.bf16.msra.mxu1 %v3944_v17  ;;  %v3994_v54 = vld [vmem:[%s5470_s1 + $0x1e8] sm:$0xff]  ;;  %v2852_v1 = vor.u32 %v3821_v58, %v2849_v59  ;;  %v3985_v4 = vld [vmem:[%s5470_s1 + $0x1a0] sm:$0xff]  ;;  %v3983_v36 = vld [vmem:[%s5470_s1 + $0x190] sm:$0xff] }
  0x14   :  { %1944 = vmatpush.bf16.msra.mxu2 %v3952_v18  ;;  %v3978_v55 = vld [vmem:[%s5470_s1 + $0x168] sm:$0xff]  ;;  %v3969_v5 = vld [vmem:[%s5470_s1 + $0x120] sm:$0xff]  ;;  %v3967_v37 = vld [vmem:[%s5470_s1 + $0x110] sm:$0xff] }
  0x15   :  { %1993 = vmatpush.bf16.msra.mxu3 %v3960_v19  ;;  %v2855_v60 = vld [vmem:[%s5471_s0 + $0x88] sm:$0xf]  ;;  %v3822_v62 = vld [vmem:[%s5471_s0 + $0x8c] sm:$0xf]  ;;  %v3993_v6 = vld [vmem:[%s5470_s1 + $0x1e0] sm:$0xff] }
  0x16   :  { %1847 = vmatpush.bf16.msra.mxu0 %v3935_v20  ;;  %v3830_v61 = vld [vmem:[%s5471_s0 + $0xc4] sm:$0xf0]  ;;  %v2857_v63 = vld [vmem:[%s5471_s0 + $0xc8] sm:$0xf0]  ;;  %v3977_v7 = vld [vmem:[%s5470_s1 + $0x160] sm:$0xff] }
  0x17   :  { %1896 = vmatpush.bf16.msra.mxu1 %v3943_v21  ;;  %v2856_v2 = vor.u32 %v3830_v61, %v2855_v60  ;;  %v2860_v3 = vor.u32 %v3822_v62, %v2857_v63  ;;  %v2911_v8 = vld [vmem:[%s5471_s0 + $0x100] sm:$0xf]  ;;  %v3837_v10 = vld [vmem:[%s5471_s0 + $0x104] sm:$0xf]  ;;  %v2919_v12 = vld [vmem:[%s5471_s0 + $0x108] sm:$0xf] }
  0x18   :  { %1945 = vmatpush.bf16.msra.mxu2 %v3951_v22  ;;  %v3845_v9 = vld [vmem:[%s5471_s0 + $0x13c] sm:$0xf0]  ;;  %v2913_v11 = vld [vmem:[%s5471_s0 + $0x140] sm:$0xf0]  ;;  %v3846_v13 = vld [vmem:[%s5471_s0 + $0x144] sm:$0xf0] }
  0x19   :  { %1994 = vmatpush.bf16.msra.mxu3 %v3959_v23  ;;  %v3838_v14 = vld [vmem:[%s5471_s0 + $0x10c] sm:$0xf]  ;;  %v2912_v16 = vor.u32 %v3845_v9, %v2911_v8  ;;  %v2916_v17 = vor.u32 %v3837_v10, %v2913_v11  ;;  %v2920_v18 = vor.u32 %v3846_v13, %v2919_v12  ;;  %v3984_v20 = vld [vmem:[%s5470_s1 + $0x198] sm:$0xff]  ;;  %v3991_v38 = vld [vmem:[%s5470_s1 + $0x1d0] sm:$0xff] }
  0x1a   :  { %1848 = vmatpush.bf16.msra.mxu0 %v3934_v24  ;;  %v2921_v15 = vld [vmem:[%s5471_s0 + $0x148] sm:$0xf0]  ;;  %v3968_v21 = vld [vmem:[%s5470_s1 + $0x118] sm:$0xff]  ;;  %v2975_v24 = vld [vmem:[%s5471_s0 + $0x180] sm:$0xf] }
  0x1b   :  { %1897 = vmatpush.bf16.msra.mxu1 %v3942_v25  ;;  %v2924_v19 = vor.u32 %v3838_v14, %v2921_v15  ;;  %v3992_v22 = vld [vmem:[%s5470_s1 + $0x1d8] sm:$0xff]  ;;  %v3861_v25 = vld [vmem:[%s5471_s0 + $0x1bc] sm:$0xf0]  ;;  %v3975_v39 = vld [vmem:[%s5470_s1 + $0x150] sm:$0xff] }
  0x1c   :  { %1946 = vmatpush.bf16.msra.mxu2 %v3950_v26  ;;  %v3976_v23 = vld [vmem:[%s5470_s1 + $0x158] sm:$0xff]  ;;  %v3853_v26 = vld [vmem:[%s5471_s0 + $0x184] sm:$0xf]  ;;  %v2976_v32 = vor.u32 %v3861_v25, %v2975_v24  ;;  %v3103_v56 = vld [vmem:[%s5471_s0 + $0x280] sm:$0xf] }
  0x1d   :  { %1995 = vmatpush.bf16.msra.mxu3 %v3958_v27  ;;  %v2977_v27 = vld [vmem:[%s5471_s0 + $0x1c0] sm:$0xf0]  ;;  %v3893_v57 = vld [vmem:[%s5471_s0 + $0x2bc] sm:$0xf0]  ;;  %v3111_v60 = vld [vmem:[%s5471_s0 + $0x288] sm:$0xf] }
  0x1e   :  { %1849 = vmatpush.bf16.msra.mxu0 %v3933_v28  ;;  %v2983_v28 = vld [vmem:[%s5471_s0 + $0x188] sm:$0xf]  ;;  %v2980_v33 = vor.u32 %v3853_v26, %v2977_v27  ;;  %v3885_v58 = vld [vmem:[%s5471_s0 + $0x284] sm:$0xf]  ;;  %v3886_v62 = vld [vmem:[%s5471_s0 + $0x28c] sm:$0xf] }
  0x1f   :  { %1898 = vmatpush.bf16.msra.mxu1 %v3941_v29  ;;  %v3862_v29 = vld [vmem:[%s5471_s0 + $0x1c4] sm:$0xf0]  ;;  %v3105_v59 = vld [vmem:[%s5471_s0 + $0x2c0] sm:$0xf0]  ;;  %v3113_v63 = vld [vmem:[%s5471_s0 + $0x2c8] sm:$0xf0] }
  0x20   :  { %1947 = vmatpush.bf16.msra.mxu2 %v3949_v30  ;;  %v3854_v30 = vld [vmem:[%s5471_s0 + $0x18c] sm:$0xf]  ;;  %v2984_v34 = vor.u32 %v3862_v29, %v2983_v28  ;;  %v3894_v61 = vld [vmem:[%s5471_s0 + $0x2c4] sm:$0xf0]  ;;  %v3167_v8 = vld [vmem:[%s5471_s0 + $0x300] sm:$0xf] }
  0x21   :  { %1996 = vmatpush.bf16.msra.mxu3 %v3957_v31  ;;  %1850 = vmatmul.bf16.vlgmr.msra.gmra.mxu0 %v2784_v42  ;;  %v2985_v31 = vld [vmem:[%s5471_s0 + $0x1c8] sm:$0xf0]  ;;  %v3869_v42 = vld [vmem:[%s5471_s0 + $0x204] sm:$0xf]  ;;  %v3909_v9 = vld [vmem:[%s5471_s0 + $0x33c] sm:$0xf0] }
  0x22   :  { %2038 = vmatpush.bf16.msrb.mxu0 %v3972_v41  ;;  %1899 = vmatmul.bf16.vlgmr.msra.gmra.mxu1 %v2788_v43  ;;  %v2988_v35 = vor.u32 %v3854_v30, %v2985_v31  ;;  %v3877_v41 = vld [vmem:[%s5471_s0 + $0x23c] sm:$0xf0]  ;;  %v3041_v43 = vld [vmem:[%s5471_s0 + $0x240] sm:$0xf0]  ;;  %v3175_v12 = vld [vmem:[%s5471_s0 + $0x308] sm:$0xf] }
  0x23   :  { %1948 = vmatmul.bf16.vlgmr.msra.gmra.mxu2 %v2792_v44  ;;  %2087 = vmatpush.bf16.msrb.mxu1 %v3980_v47  ;;  %v3047_v44 = vld [vmem:[%s5471_s0 + $0x208] sm:$0xf]  ;;  %v3049_v47 = vld [vmem:[%s5471_s0 + $0x248] sm:$0xf0]  ;;  %v3901_v10 = vld [vmem:[%s5471_s0 + $0x304] sm:$0xf] }
  0x24   :  { %2136 = vmatpush.bf16.msrb.mxu2 %v3988_v40  ;;  %1997 = vmatmul.bf16.vlgmr.msra.gmra.mxu3 %v2796_v45  ;;  %v3039_v40 = vld [vmem:[%s5471_s0 + $0x200] sm:$0xf]  ;;  %v3878_v45 = vld [vmem:[%s5471_s0 + $0x244] sm:$0xf0]  ;;  %v3169_v11 = vld [vmem:[%s5471_s0 + $0x340] sm:$0xf0] }
  0x25   :  { %2185 = vmatpush.bf16.msrb.mxu3 %v3996_v46  ;;  %v3870_v46 = vld [vmem:[%s5471_s0 + $0x20c] sm:$0xf]  ;;  %v3910_v13 = vld [vmem:[%s5471_s0 + $0x344] sm:$0xf0]  ;;  %v3231_v24 = vld [vmem:[%s5471_s0 + $0x380] sm:$0xf] }
  0x26   :  { %2039 = vmatpush.bf16.msrb.mxu0 %v3971_v49  ;;  %v3044_v49 = vor.u32 %v3869_v42, %v3041_v43  ;;  %v3902_v14 = vld [vmem:[%s5471_s0 + $0x30c] sm:$0xf]  ;;  %v3925_v25 = vld [vmem:[%s5471_s0 + $0x3bc] sm:$0xf0]  ;;  %v3917_v26 = vld [vmem:[%s5471_s0 + $0x384] sm:$0xf] }
  0x27   :  { %2088 = vmatpush.bf16.msrb.mxu1 %v3979_v51  ;;  %v3052_v51 = vor.u32 %v3870_v46, %v3049_v47  ;;  %v3177_v15 = vld [vmem:[%s5471_s0 + $0x348] sm:$0xf0]  ;;  %v3233_v27 = vld [vmem:[%s5471_s0 + $0x3c0] sm:$0xf0]  ;;  %v3239_v28 = vld [vmem:[%s5471_s0 + $0x388] sm:$0xf] }
  0x28   :  { %2137 = vmatpush.bf16.msrb.mxu2 %v3987_v48  ;;  %v3040_v48 = vor.u32 %v3877_v41, %v3039_v40  ;;  %v3926_v29 = vld [vmem:[%s5471_s0 + $0x3c4] sm:$0xf0]  ;;  %v3918_v30 = vld [vmem:[%s5471_s0 + $0x38c] sm:$0xf]  ;;  %v2799_v40 = vld [vmem:[%s5471_s0 + $0x10] sm:$0xf] }
  0x29   :  { %2186 = vmatpush.bf16.msrb.mxu3 %v3995_v50  ;;  %v3048_v50 = vor.u32 %v3878_v45, %v3047_v44  ;;  %v3241_v31 = vld [vmem:[%s5471_s0 + $0x3c8] sm:$0xf0]  ;;  %v3815_v41 = vld [vmem:[%s5471_s0 + $0x4c] sm:$0xf0]  ;;  %v3807_v42 = vld [vmem:[%s5471_s0 + $0x14] sm:$0xf] }
  0x2a   :  { %2040 = vmatpush.bf16.msrb.mxu0 %v3970_v53  ;;  %v3966_v53 = vld [vmem:[%s5470_s1 + $0x108] sm:$0xff]  ;;  %v2801_v43 = vld [vmem:[%s5471_s0 + $0x50] sm:$0xf0]  ;;  %v2807_v44 = vld [vmem:[%s5471_s0 + $0x18] sm:$0xf] }
  0x2b   :  { %2089 = vmatpush.bf16.msrb.mxu1 %v3978_v55  ;;  %v3974_v55 = vld [vmem:[%s5470_s1 + $0x148] sm:$0xff]  ;;  %v3816_v45 = vld [vmem:[%s5471_s0 + $0x54] sm:$0xf0]  ;;  %v3808_v46 = vld [vmem:[%s5471_s0 + $0x1c] sm:$0xf] }
  0x2c   :  { %2138 = vmatpush.bf16.msrb.mxu2 %v3986_v52  ;;  %v3982_v52 = vld [vmem:[%s5470_s1 + $0x188] sm:$0xff]  ;;  %v2809_v47 = vld [vmem:[%s5471_s0 + $0x58] sm:$0xf0] }
  0x2d   :  { %2187 = vmatpush.bf16.msrb.mxu3 %v3994_v54  ;;  %v3990_v54 = vld [vmem:[%s5470_s1 + $0x1c8] sm:$0xff] }
  0x2e   :  { %2041 = vmatpush.bf16.msrb.mxu0 %v3969_v5  ;;  %v3965_v5 = vld [vmem:[%s5470_s1 + $0x100] sm:$0xff] }
  0x2f   :  { %2090 = vmatpush.bf16.msrb.mxu1 %v3977_v7  ;;  %v3973_v7 = vld [vmem:[%s5470_s1 + $0x140] sm:$0xff] }
  0x30   :  { %2139 = vmatpush.bf16.msrb.mxu2 %v3985_v4  ;;  %v3981_v4 = vld [vmem:[%s5470_s1 + $0x180] sm:$0xff] }
  0x31   :  { %1855 = vmatmul.bf16.gmra.mxu0 %v2848_v0  ;;  %2188 = vmatpush.bf16.msrb.mxu3 %v3993_v6  ;;  %v3104_v0 = vor.u32 %v3893_v57, %v3103_v56  ;;  %v3989_v6 = vld [vmem:[%s5470_s1 + $0x1c0] sm:$0xff]  ;;  %v4002_v56 = vld [vmem:[%s5470_s1 + $0x228] sm:$0xff] }
  0x32   :  { %1904 = vmatmul.bf16.gmra.mxu1 %v2852_v1  ;;  %2042 = vmatpush.bf16.msrb.mxu0 %v3968_v21  ;;  %v3108_v1 = vor.u32 %v3885_v58, %v3105_v59  ;;  %v4004_v21 = vld [vmem:[%s5470_s1 + $0x238] sm:$0xff]  ;;  %v4026_v57 = vld [vmem:[%s5470_s1 + $0x2e8] sm:$0xff] }
  0x33   :  { %1953 = vmatmul.bf16.gmra.mxu2 %v2856_v2  ;;  %2091 = vmatpush.bf16.msrb.mxu1 %v3976_v23  ;;  %v3112_v2 = vor.u32 %v3894_v61, %v3111_v60  ;;  %v4012_v23 = vld [vmem:[%s5470_s1 + $0x278] sm:$0xff] }
  0x34   :  { %2002 = vmatmul.bf16.gmra.mxu3 %v2860_v3  ;;  %2140 = vmatpush.bf16.msrb.mxu2 %v3984_v20  ;;  %v3116_v3 = vor.u32 %v3886_v62, %v3113_v63  ;;  %v4020_v20 = vld [vmem:[%s5470_s1 + $0x2b8] sm:$0xff] }
  0x35   :  { %2189 = vmatpush.bf16.msrb.mxu3 %v3992_v22  ;;  %v4028_v22 = vld [vmem:[%s5470_s1 + $0x2f8] sm:$0xff] }
  0x36   :  { %2043 = vmatpush.bf16.msrb.mxu0 %v3967_v37  ;;  %v4003_v37 = vld [vmem:[%s5470_s1 + $0x230] sm:$0xff] }
  0x37   :  { %2092 = vmatpush.bf16.msrb.mxu1 %v3975_v39  ;;  %v4011_v39 = vld [vmem:[%s5470_s1 + $0x270] sm:$0xff] }
  0x38   :  { %2141 = vmatpush.bf16.msrb.mxu2 %v3983_v36  ;;  %v4019_v36 = vld [vmem:[%s5470_s1 + $0x2b0] sm:$0xff] }
  0x39   :  { %2190 = vmatpush.bf16.msrb.mxu3 %v3991_v38  ;;  %v4027_v38 = vld [vmem:[%s5470_s1 + $0x2f0] sm:$0xff] }
  0x3a   :  { %2044 = vmatpush.bf16.msrb.mxu0 %v3966_v53  ;;  %v2812_v53 = vor.u32 %v3808_v46, %v2809_v47 }
  0x3b   :  { %2093 = vmatpush.bf16.msrb.mxu1 %v3974_v55  ;;  %v4018_v55 = vld [vmem:[%s5470_s1 + $0x2a8] sm:$0xff] }
  0x3c   :  { %2142 = vmatpush.bf16.msrb.mxu2 %v3982_v52  ;;  %v2808_v52 = vor.u32 %v3816_v45, %v2807_v44 }
  0x3d   :  { %2191 = vmatpush.bf16.msrb.mxu3 %v3990_v54 }
  0x3e   :  { %2045 = vmatpush.bf16.msrb.mxu0 %v3965_v5  ;;  %v2865_v5 = vld [vmem:[%s5471_s0 + $0xd0] sm:$0xf0] }
  0x3f   :  { %2094 = vmatpush.bf16.msrb.mxu1 %v3973_v7  ;;  %v3832_v7 = vld [vmem:[%s5471_s0 + $0xd4] sm:$0xf0] }
  0x40   :  { %2143 = vmatpush.bf16.msrb.mxu2 %v3981_v4  ;;  %v3823_v4 = vld [vmem:[%s5471_s0 + $0x94] sm:$0xf] }
  0x41   :  { %1860 = vmatmul.bf16.gmra.mxu0 %v2912_v16  ;;  %2192 = vmatpush.bf16.msrb.mxu3 %v3989_v6  ;;  %v3168_v16 = vor.u32 %v3909_v9, %v3167_v8  ;;  %v2871_v6 = vld [vmem:[%s5471_s0 + $0x98] sm:$0xf]  ;;  %v3824_v8 = vld [vmem:[%s5471_s0 + $0x9c] sm:$0xf] }
  0x42   :  { %1909 = vmatmul.bf16.gmra.mxu1 %v2916_v17  ;;  %v3172_v17 = vor.u32 %v3901_v10, %v3169_v11  ;;  %2234 = vmatpush.bf16.msra.mxu0 %v4004_v21  ;;  %v2873_v9 = vld [vmem:[%s5471_s0 + $0xd8] sm:$0xf0]  ;;  %v4017_v21 = vld [vmem:[%s5470_s1 + $0x2a0] sm:$0xff] }
  0x43   :  { %1958 = vmatmul.bf16.gmra.mxu2 %v2920_v18  ;;  %v3176_v18 = vor.u32 %v3910_v13, %v3175_v12  ;;  %2283 = vmatpush.bf16.msra.mxu1 %v4012_v23  ;;  %v2868_v13 = vor.u32 %v3823_v4, %v2865_v5  ;;  %v4025_v23 = vld [vmem:[%s5470_s1 + $0x2e0] sm:$0xff]  ;;  %v3864_v4 = vld [vmem:[%s5471_s0 + $0x1d4] sm:$0xf0]  ;;  %v3856_v5 = vld [vmem:[%s5471_s0 + $0x19c] sm:$0xf] }
  0x44   :  { %2007 = vmatmul.bf16.gmra.mxu3 %v2924_v19  ;;  %v3180_v19 = vor.u32 %v3902_v14, %v3177_v15  ;;  %2332 = vmatpush.bf16.msra.mxu2 %v4020_v20 }
  0x45   :  { %2381 = vmatpush.bf16.msra.mxu3 %v4028_v22  ;;  %v4001_v22 = vld [vmem:[%s5470_s1 + $0x220] sm:$0xff] }
  0x46   :  { %2235 = vmatpush.bf16.msra.mxu0 %v4003_v37  ;;  %v3848_v37 = vld [vmem:[%s5471_s0 + $0x154] sm:$0xf0] }
  0x47   :  { %2284 = vmatpush.bf16.msra.mxu1 %v4011_v39  ;;  %v2937_v39 = vld [vmem:[%s5471_s0 + $0x158] sm:$0xf0] }
  0x48   :  { %2333 = vmatpush.bf16.msra.mxu2 %v4019_v36  ;;  %v2935_v36 = vld [vmem:[%s5471_s0 + $0x118] sm:$0xf] }
  0x49   :  { %2382 = vmatpush.bf16.msra.mxu3 %v4027_v38  ;;  %v3840_v38 = vld [vmem:[%s5471_s0 + $0x11c] sm:$0xf]  ;;  %v2936_v47 = vor.u32 %v3848_v37, %v2935_v36  ;;  %v3880_v36 = vld [vmem:[%s5471_s0 + $0x254] sm:$0xf0] }
  0x4a   :  { %2236 = vmatpush.bf16.msra.mxu0 %v4002_v56  ;;  %v3872_v37 = vld [vmem:[%s5471_s0 + $0x21c] sm:$0xf] }
  0x4c   :  { %2334 = vmatpush.bf16.msra.mxu2 %v4018_v55 }
  0x4d   :  { %2383 = vmatpush.bf16.msra.mxu3 %v4026_v57 }
  0x4e   :  { %2237 = vmatpush.bf16.msra.mxu0 %v4001_v22 }
  0x50   :  { %2335 = vmatpush.bf16.msra.mxu2 %v4017_v21  ;;  %v4023_v21 = vld [vmem:[%s5470_s1 + $0x2d0] sm:$0xff] }
  0x51   :  { %1865 = vmatmul.bf16.gmra.mxu0 %v2976_v32  ;;  %v3232_v32 = vor.u32 %v3925_v25, %v3231_v24  ;;  %2384 = vmatpush.bf16.msra.mxu3 %v4025_v23 }
  0x52   :  { %1914 = vmatmul.bf16.gmra.mxu1 %v2980_v33  ;;  %v3236_v33 = vor.u32 %v3917_v26, %v3233_v27 }
  0x53   :  { %1963 = vmatmul.bf16.gmra.mxu2 %v2984_v34  ;;  %v3240_v34 = vor.u32 %v3926_v29, %v3239_v28 }
  0x54   :  { %2012 = vmatmul.bf16.gmra.mxu3 %v2988_v35  ;;  %v3244_v35 = vor.u32 %v3918_v30, %v3241_v31  ;;  %v4009_v31 = vld [vmem:[%s5470_s1 + $0x260] sm:$0xff] }
  0x61   :  { %1870 = vmatmul.bf16.gmra.mxu0 %v3040_v48  ;;  %v2800_v48 = vor.u32 %v3815_v41, %v2799_v40 }
  0x62   :  { %1919 = vmatmul.bf16.gmra.mxu1 %v3044_v49  ;;  %v2804_v49 = vor.u32 %v3807_v42, %v2801_v43 }
  0x63   :  { %1968 = vmatmul.bf16.gmra.mxu2 %v3048_v50 }
  0x64   :  { %2017 = vmatmul.bf16.gmra.mxu3 %v3052_v51 }
  0x71   :  { %1875 = vmatmul.bf16.gmra.mxu0 %v3104_v0 }
  0x72   :  { %1924 = vmatmul.bf16.gmra.mxu1 %v3108_v1  ;;  %v4010_v1 = vld [vmem:[%s5470_s1 + $0x268] sm:$0xff] }
  0x73   :  { %1973 = vmatmul.bf16.gmra.mxu2 %v3112_v2  ;;  %v2863_v2 = vld [vmem:[%s5471_s0 + $0x90] sm:$0xf]  ;;  %2285 = vmatpush.bf16.msra.mxu1 %v4010_v1  ;;  %v3855_v1 = vld [vmem:[%s5471_s0 + $0x194] sm:$0xf] }
  0x74   :  { %2022 = vmatmul.bf16.gmra.mxu3 %v3116_v3  ;;  %v3831_v3 = vld [vmem:[%s5471_s0 + $0xcc] sm:$0xf0] }
  0x75   :  { %v2864_v12 = vor.u32 %v3831_v3, %v2863_v2  ;;  %v2993_v2 = vld [vmem:[%s5471_s0 + $0x1d0] sm:$0xf0]  ;;  %v2999_v3 = vld [vmem:[%s5471_s0 + $0x198] sm:$0xf] }
  0x77   :  { %2286 = vmatpush.bf16.msra.mxu1 %v4009_v31  ;;  %v3055_v31 = vld [vmem:[%s5471_s0 + $0x210] sm:$0xf] }
  0x81   :  { %1880 = vmatmul.bf16.gmra.mxu0 %v3168_v16 }
  0x82   :  { %1929 = vmatmul.bf16.gmra.mxu1 %v3172_v17  ;;  %v2872_v17 = vor.u32 %v3832_v7, %v2871_v6  ;;  %v3001_v6 = vld [vmem:[%s5471_s0 + $0x1d8] sm:$0xf0] }
  0x83   :  { %1978 = vmatmul.bf16.gmra.mxu2 %v3176_v18  ;;  %v2876_v18 = vor.u32 %v3824_v8, %v2873_v9 }
  0x84   :  { %2027 = vmatmul.bf16.gmra.mxu3 %v3180_v19 }
  0x91   :  { %1885 = vmatmul.bf16.gmra.mxu0 %v3232_v32  ;;  %v2927_v32 = vld [vmem:[%s5471_s0 + $0x110] sm:$0xf] }
  0x92   :  { %1934 = vmatmul.bf16.gmra.mxu1 %v3236_v33  ;;  %v3847_v33 = vld [vmem:[%s5471_s0 + $0x14c] sm:$0xf0] }
  0x93   :  { %1983 = vmatmul.bf16.gmra.mxu2 %v3240_v34  ;;  %v3839_v34 = vld [vmem:[%s5471_s0 + $0x114] sm:$0xf]  ;;  %v2928_v42 = vor.u32 %v3847_v33, %v2927_v32  ;;  %v3879_v32 = vld [vmem:[%s5471_s0 + $0x24c] sm:$0xf0] }
  0x94   :  { %2032 = vmatmul.bf16.gmra.mxu3 %v3244_v35  ;;  %v2929_v35 = vld [vmem:[%s5471_s0 + $0x150] sm:$0xf0] }
  0x95   :  { %v2932_v43 = vor.u32 %v3839_v34, %v2929_v35  ;;  %v3871_v33 = vld [vmem:[%s5471_s0 + $0x214] sm:$0xf]  ;;  %v3063_v35 = vld [vmem:[%s5471_s0 + $0x218] sm:$0xf] }
  0x96   :  { %v3057_v34 = vld [vmem:[%s5471_s0 + $0x250] sm:$0xf0] }
  0x9e   :  { %v1851_v50 = vpop.f32.mrf.mxu0 }
  0x9f   :  { %v1900_v51 = vpop.f32.mrf.mxu1 }
  0xa0   :  { %v1901_v54 = vadd.f32 %v1900_v51, %v1851_v50  ;;  %v4016_v51 = vld [vmem:[%s5470_s1 + $0x298] sm:$0xff] }
  0xa1   :  { %2046 = vmatmul.bf16.vlgmr.msrb.gmra.mxu0 %v2800_v48  ;;  %v2940_v48 = vor.u32 %v3840_v38, %v2937_v39  ;;  %2336 = vmatpush.bf16.msra.mxu2 %v4016_v51  ;;  %v3065_v38 = vld [vmem:[%s5471_s0 + $0x258] sm:$0xf0]  ;;  %v4014_v51 = vld [vmem:[%s5470_s1 + $0x288] sm:$0xff] }
  0xa2   :  { %2095 = vmatmul.bf16.vlgmr.msrb.gmra.mxu1 %v2804_v49 }
  0xa3   :  { %2144 = vmatmul.bf16.vlgmr.msrb.gmra.mxu2 %v2808_v52  ;;  %v4000_v52 = vld [vmem:[%s5470_s1 + $0x218] sm:$0xff] }
  0xa4   :  { %2193 = vmatmul.bf16.vlgmr.msrb.gmra.mxu3 %v2812_v53  ;;  %v4024_v53 = vld [vmem:[%s5470_s1 + $0x2d8] sm:$0xff]  ;;  %2238 = vmatpush.bf16.msra.mxu0 %v4000_v52  ;;  %v3998_v52 = vld [vmem:[%s5470_s1 + $0x208] sm:$0xff] }
  0xa5   :  { %2385 = vmatpush.bf16.msra.mxu3 %v4024_v53  ;;  %v4022_v53 = vld [vmem:[%s5470_s1 + $0x2c8] sm:$0xff] }
  0xa6   :  { %v1949_v58 = vpop.f32.mrf.mxu2  ;;  %v1853_v61 = vpop.f32.mrf.mxu0 }
  0xa7   :  { %v1998_v59 = vpop.f32.mrf.mxu3  ;;  %v1950_v60 = vadd.f32 %v1949_v58, %v1901_v54  ;;  %v1902_v62 = vpop.f32.mrf.mxu1 }
  0xa8   :  { %v1903_v63 = vadd.f32 %v1902_v62, %v1853_v61  ;;  %v4008_v61 = vld [vmem:[%s5470_s1 + $0x258] sm:$0xff]  ;;  %v2991_v62 = vld [vmem:[%s5471_s0 + $0x190] sm:$0xf] }
  0xa9   :  { %v4570_v0 = vadd.f32 %v1998_v59, %v1950_v60  ;;  %2287 = vmatpush.bf16.msra.mxu1 %v4008_v61  ;;  %2386 = vmatpush.bf16.msra.mxu3 %v4023_v21  ;;  %v4013_v21 = vld [vmem:[%s5470_s1 + $0x280] sm:$0xff] }
  0xad   :  { %2387 = vmatpush.bf16.msra.mxu3 %v4022_v53 }
  0xae   :  { %v1951_v10 = vpop.f32.mrf.mxu2  ;;  %v1856_v15 = vpop.f32.mrf.mxu0 }
  0xaf   :  { %v2000_v11 = vpop.f32.mrf.mxu3  ;;  %v1952_v14 = vadd.f32 %v1951_v10, %v1903_v63  ;;  %v1905_v16 = vpop.f32.mrf.mxu1  ;;  %v3863_v63 = vld [vmem:[%s5471_s0 + $0x1cc] sm:$0xf0]  ;;  %v2996_v10 = vor.u32 %v3855_v1, %v2993_v2  ;;  %v3887_v2 = vld [vmem:[%s5471_s0 + $0x294] sm:$0xf] }
  0xb0   :  { %v1906_v19 = vadd.f32 %v1905_v16, %v1856_v15  ;;  %v2992_v9 = vor.u32 %v3863_v63, %v2991_v62  ;;  %v3004_v15 = vor.u32 %v3856_v5, %v3001_v6  ;;  %v4006_v62 = vld [vmem:[%s5470_s1 + $0x248] sm:$0xff]  ;;  %v3119_v63 = vld [vmem:[%s5471_s0 + $0x290] sm:$0xf]  ;;  %v3896_v5 = vld [vmem:[%s5471_s0 + $0x2d4] sm:$0xf0] }
  0xb1   :  { %v4599_v20 = vadd.f32 %v2000_v11, %v1952_v14  ;;  %2051 = vmatmul.bf16.gmra.mxu0 %v2864_v12  ;;  %v3000_v14 = vor.u32 %v3864_v4, %v2999_v3  ;;  %v3895_v1 = vld [vmem:[%s5471_s0 + $0x2cc] sm:$0xf0]  ;;  %v3121_v3 = vld [vmem:[%s5471_s0 + $0x2d0] sm:$0xf0]  ;;  %v3127_v4 = vld [vmem:[%s5471_s0 + $0x298] sm:$0xf] }
  0xb2   :  { %2100 = vmatmul.bf16.gmra.mxu1 %v2868_v13  ;;  %v3888_v6 = vld [vmem:[%s5471_s0 + $0x29c] sm:$0xf] }
  0xb3   :  { %2149 = vmatmul.bf16.gmra.mxu2 %v2872_v17 }
  0xb4   :  { %2198 = vmatmul.bf16.gmra.mxu3 %v2876_v18  ;;  %v4015_v18 = vld [vmem:[%s5470_s1 + $0x290] sm:$0xff] }
  0xb5   :  { %2337 = vmatpush.bf16.msra.mxu2 %v4015_v18 }
  0xb6   :  { %v1954_v24 = vpop.f32.mrf.mxu2  ;;  %v1858_v27 = vpop.f32.mrf.mxu0 }
  0xb7   :  { %v2003_v25 = vpop.f32.mrf.mxu3  ;;  %v1955_v26 = vadd.f32 %v1954_v24, %v1906_v19  ;;  %v1907_v28 = vpop.f32.mrf.mxu1  ;;  %v3999_v19 = vld [vmem:[%s5470_s1 + $0x210] sm:$0xff] }
  0xb8   :  { %v1908_v29 = vadd.f32 %v1907_v28, %v1858_v27  ;;  %2239 = vmatpush.bf16.msra.mxu0 %v3999_v19 }
  0xb9   :  { %v4610_v30 = vadd.f32 %v2003_v25, %v1955_v26  ;;  %2338 = vmatpush.bf16.msra.mxu2 %v4014_v51 }
  0xbc   :  { %2240 = vmatpush.bf16.msra.mxu0 %v3998_v52 }
  0xbd   :  { %2339 = vmatpush.bf16.msra.mxu2 %v4013_v21 }
  0xbe   :  { %v1956_v40 = vpop.f32.mrf.mxu2  ;;  %v1861_v45 = vpop.f32.mrf.mxu0 }
  0xbf   :  { %v2005_v41 = vpop.f32.mrf.mxu3  ;;  %v1957_v44 = vadd.f32 %v1956_v40, %v1908_v29  ;;  %v1910_v46 = vpop.f32.mrf.mxu1  ;;  %v4007_v29 = vld [vmem:[%s5470_s1 + $0x250] sm:$0xff] }
  0xc0   :  { %v1911_v49 = vadd.f32 %v1910_v46, %v1861_v45  ;;  %2288 = vmatpush.bf16.msra.mxu1 %v4007_v29  ;;  %v3064_v46 = vor.u32 %v3880_v36, %v3063_v35  ;;  %v3911_v35 = vld [vmem:[%s5471_s0 + $0x34c] sm:$0xf0]  ;;  %v3903_v36 = vld [vmem:[%s5471_s0 + $0x314] sm:$0xf] }
  0xc1   :  { %v4639_v50 = vadd.f32 %v2005_v41, %v1957_v44  ;;  %2056 = vmatmul.bf16.gmra.mxu0 %v2928_v42  ;;  %v3056_v41 = vor.u32 %v3879_v32, %v3055_v31  ;;  %v3060_v42 = vor.u32 %v3871_v33, %v3057_v34  ;;  %v4005_v33 = vld [vmem:[%s5470_s1 + $0x240] sm:$0xff]  ;;  %v3183_v34 = vld [vmem:[%s5471_s0 + $0x310] sm:$0xf] }
  0xc2   :  { %2105 = vmatmul.bf16.gmra.mxu1 %v2932_v43 }
  0xc3   :  { %2154 = vmatmul.bf16.gmra.mxu2 %v2936_v47  ;;  %v3068_v47 = vor.u32 %v3872_v37, %v3065_v38  ;;  %v3185_v37 = vld [vmem:[%s5471_s0 + $0x350] sm:$0xf0]  ;;  %v3191_v38 = vld [vmem:[%s5471_s0 + $0x318] sm:$0xf] }
  0xc4   :  { %2203 = vmatmul.bf16.gmra.mxu3 %v2940_v48  ;;  %2289 = vmatpush.bf16.msra.mxu1 %v4006_v62 }
  0xc6   :  { %v1959_v54 = vpop.f32.mrf.mxu2  ;;  %v1863_v57 = vpop.f32.mrf.mxu0 }
  0xc7   :  { %v2008_v55 = vpop.f32.mrf.mxu3  ;;  %v1960_v56 = vadd.f32 %v1959_v54, %v1911_v49  ;;  %v1912_v58 = vpop.f32.mrf.mxu1 }
  0xc8   :  { %v1913_v59 = vadd.f32 %v1912_v58, %v1863_v57  ;;  %2290 = vmatpush.bf16.msra.mxu1 %v4005_v33 }
  0xc9   :  { %v4650_v60 = vadd.f32 %v2008_v55, %v1960_v56 }
  0xce   :  { %v1961_v7 = vpop.f32.mrf.mxu2  ;;  %v1866_v12 = vpop.f32.mrf.mxu0 }
  0xcf   :  { %v2010_v8 = vpop.f32.mrf.mxu3  ;;  %v1962_v11 = vadd.f32 %v1961_v7, %v1913_v59  ;;  %v1915_v13 = vpop.f32.mrf.mxu1  ;;  %v3129_v7 = vld [vmem:[%s5471_s0 + $0x2d8] sm:$0xf0] }
  0xd0   :  { %v1916_v16 = vadd.f32 %v1915_v13, %v1866_v12 }
  0xd1   :  { %v4679_v17 = vadd.f32 %v2010_v8, %v1962_v11  ;;  %2061 = vmatmul.bf16.gmra.mxu0 %v2992_v9  ;;  %v3124_v11 = vor.u32 %v3887_v2, %v3121_v3 }
  0xd2   :  { %2110 = vmatmul.bf16.gmra.mxu1 %v2996_v10  ;;  %v3120_v10 = vor.u32 %v3895_v1, %v3119_v63 }
  0xd3   :  { %2159 = vmatmul.bf16.gmra.mxu2 %v3000_v14 }
  0xd4   :  { %2208 = vmatmul.bf16.gmra.mxu3 %v3004_v15  ;;  %v3128_v15 = vor.u32 %v3896_v5, %v3127_v4  ;;  %v4044_v4 = vld [vmem:[%s5470_s1 + $0x378] sm:$0xff]  ;;  %v3247_v5 = vld [vmem:[%s5471_s0 + $0x390] sm:$0xf] }
  0xd5   :  { %2479 = vmatpush.bf16.msrb.mxu1 %v4044_v4  ;;  %v4050_v4 = vld [vmem:[%s5470_s1 + $0x3a8] sm:$0xff] }
  0xd6   :  { %v1964_v22 = vpop.f32.mrf.mxu2  ;;  %v1868_v25 = vpop.f32.mrf.mxu0 }
  0xd7   :  { %v2013_v23 = vpop.f32.mrf.mxu3  ;;  %v1965_v24 = vadd.f32 %v1964_v22, %v1916_v16  ;;  %v1917_v26 = vpop.f32.mrf.mxu1  ;;  %v3132_v16 = vor.u32 %v3888_v6, %v3129_v7  ;;  %v3997_v22 = vld [vmem:[%s5470_s1 + $0x200] sm:$0xff]  ;;  %v3927_v6 = vld [vmem:[%s5471_s0 + $0x3cc] sm:$0xf0]  ;;  %v3919_v7 = vld [vmem:[%s5471_s0 + $0x394] sm:$0xf] }
  0xd8   :  { %v1918_v27 = vadd.f32 %v1917_v26, %v1868_v25  ;;  %2241 = vmatpush.bf16.msra.mxu0 %v3997_v22 }
  0xd9   :  { %v4690_v28 = vadd.f32 %v2013_v23, %v1965_v24  ;;  %v4021_v23 = vld [vmem:[%s5470_s1 + $0x2c0] sm:$0xff] }
  0xda   :  { %2388 = vmatpush.bf16.msra.mxu3 %v4021_v23 }
  0xde   :  { %v1966_v39 = vpop.f32.mrf.mxu2  ;;  %v1871_v44 = vpop.f32.mrf.mxu0 }
  0xdf   :  { %v2015_v40 = vpop.f32.mrf.mxu3  ;;  %v1967_v43 = vadd.f32 %v1966_v39, %v1918_v27  ;;  %v1920_v45 = vpop.f32.mrf.mxu1  ;;  %v3912_v39 = vld [vmem:[%s5471_s0 + $0x354] sm:$0xf0] }
  0xe0   :  { %v1921_v48 = vadd.f32 %v1920_v45, %v1871_v44  ;;  %v3184_v44 = vor.u32 %v3911_v35, %v3183_v34  ;;  %v3188_v45 = vor.u32 %v3903_v36, %v3185_v37  ;;  %v3192_v51 = vor.u32 %v3912_v39, %v3191_v38 }
  0xe1   :  { %v4719_v49 = vadd.f32 %v2015_v40, %v1967_v43  ;;  %2066 = vmatmul.bf16.gmra.mxu0 %v3056_v41  ;;  %v3904_v40 = vld [vmem:[%s5471_s0 + $0x31c] sm:$0xf] }
  0xe2   :  { %2115 = vmatmul.bf16.gmra.mxu1 %v3060_v42  ;;  %v3193_v41 = vld [vmem:[%s5471_s0 + $0x358] sm:$0xf0] }
  0xe3   :  { %2164 = vmatmul.bf16.gmra.mxu2 %v3064_v46  ;;  %v3196_v52 = vor.u32 %v3904_v40, %v3193_v41  ;;  %v4043_v40 = vld [vmem:[%s5470_s1 + $0x370] sm:$0xff]  ;;  %v2815_v41 = vld [vmem:[%s5471_s0 + $0x20] sm:$0xf] }
  0xe4   :  { %2213 = vmatmul.bf16.gmra.mxu3 %v3068_v47  ;;  %2480 = vmatpush.bf16.msrb.mxu1 %v4043_v40 }
  0xe6   :  { %v1969_v54 = vpop.f32.mrf.mxu2  ;;  %v1873_v57 = vpop.f32.mrf.mxu0 }
  0xe7   :  { %v2018_v55 = vpop.f32.mrf.mxu3  ;;  %v1970_v56 = vadd.f32 %v1969_v54, %v1921_v48  ;;  %v1922_v58 = vpop.f32.mrf.mxu1 }
  0xe8   :  { %v1923_v59 = vadd.f32 %v1922_v58, %v1873_v57  ;;  %v4060_v57 = vld [vmem:[%s5470_s1 + $0x3f8] sm:$0xff] }
  0xe9   :  { %v4730_v61 = vadd.f32 %v2018_v55, %v1970_v56  ;;  %v4052_v55 = vld [vmem:[%s5470_s1 + $0x3b8] sm:$0xff]  ;;  %2577 = vmatpush.bf16.msrb.mxu3 %v4060_v57 }
  0xea   :  { %v4036_v56 = vld [vmem:[%s5470_s1 + $0x338] sm:$0xff]  ;;  %2528 = vmatpush.bf16.msrb.mxu2 %v4052_v55 }
  0xeb   :  { %2430 = vmatpush.bf16.msrb.mxu0 %v4036_v56 }
  0xee   :  { %v1971_v8 = vpop.f32.mrf.mxu2  ;;  %v1876_v13 = vpop.f32.mrf.mxu0 }
  0xef   :  { %v2020_v9 = vpop.f32.mrf.mxu3  ;;  %v1972_v12 = vadd.f32 %v1971_v8, %v1923_v59  ;;  %v1925_v14 = vpop.f32.mrf.mxu1  ;;  %v3249_v8 = vld [vmem:[%s5471_s0 + $0x3d0] sm:$0xf0] }
  0xf0   :  { %v1926_v18 = vadd.f32 %v1925_v14, %v1876_v13 }
  0xf1   :  { %v4759_v19 = vadd.f32 %v2020_v9, %v1972_v12  ;;  %2071 = vmatmul.bf16.gmra.mxu0 %v3120_v10  ;;  %v3255_v9 = vld [vmem:[%s5471_s0 + $0x398] sm:$0xf]  ;;  %v3257_v12 = vld [vmem:[%s5471_s0 + $0x3d8] sm:$0xf0] }
  0xf2   :  { %2120 = vmatmul.bf16.gmra.mxu1 %v3124_v11  ;;  %v3928_v10 = vld [vmem:[%s5471_s0 + $0x3d4] sm:$0xf0]  ;;  %v3920_v11 = vld [vmem:[%s5471_s0 + $0x39c] sm:$0xf] }
  0xf3   :  { %2169 = vmatmul.bf16.gmra.mxu2 %v3128_v15  ;;  %v3248_v15 = vor.u32 %v3927_v6, %v3247_v5  ;;  %v3256_v23 = vor.u32 %v3928_v10, %v3255_v9  ;;  %v4034_v5 = vld [vmem:[%s5470_s1 + $0x328] sm:$0xff] }
  0xf4   :  { %2218 = vmatmul.bf16.gmra.mxu3 %v3132_v16  ;;  %v3252_v16 = vor.u32 %v3919_v7, %v3249_v8  ;;  %v4058_v6 = vld [vmem:[%s5470_s1 + $0x3e8] sm:$0xff] }
  0xf6   :  { %v1974_v24 = vpop.f32.mrf.mxu2  ;;  %v1878_v27 = vpop.f32.mrf.mxu0 }
  0xf7   :  { %v2023_v25 = vpop.f32.mrf.mxu3  ;;  %v1975_v26 = vadd.f32 %v1974_v24, %v1926_v18  ;;  %v1927_v29 = vpop.f32.mrf.mxu1  ;;  %v3260_v24 = vor.u32 %v3920_v11, %v3257_v12 }
  0xf8   :  { %v1928_v31 = vadd.f32 %v1927_v29, %v1878_v27  ;;  %v4051_v27 = vld [vmem:[%s5470_s1 + $0x3b0] sm:$0xff] }
  0xf9   :  { %v4770_v32 = vadd.f32 %v2023_v25, %v1975_v26  ;;  %v4035_v29 = vld [vmem:[%s5470_s1 + $0x330] sm:$0xff]  ;;  %2529 = vmatpush.bf16.msrb.mxu2 %v4051_v27 }
  0xfa   :  { %2431 = vmatpush.bf16.msrb.mxu0 %v4035_v29 }
  0xfd   :  { %2530 = vmatpush.bf16.msrb.mxu2 %v4050_v4 }
  0xfe   :  { %v1976_v42 = vpop.f32.mrf.mxu2  ;;  %v1881_v47 = vpop.f32.mrf.mxu0  ;;  %2432 = vmatpush.bf16.msrb.mxu0 %v4034_v5 }
  0xff   :  { %v2025_v43 = vpop.f32.mrf.mxu3  ;;  %v1977_v46 = vadd.f32 %v1976_v42, %v1928_v31  ;;  %v1930_v48 = vpop.f32.mrf.mxu1  ;;  %v4059_v31 = vld [vmem:[%s5470_s1 + $0x3f0] sm:$0xff]  ;;  %v3817_v42 = vld [vmem:[%s5471_s0 + $0x5c] sm:$0xf0] }
 0x100   :  { %v1931_v53 = vadd.f32 %v1930_v48, %v1881_v47  ;;  %2578 = vmatpush.bf16.msrb.mxu3 %v4059_v31  ;;  %v3810_v47 = vld [vmem:[%s5471_s0 + $0x2c] sm:$0xf] }
 0x101   :  { %v4799_v54 = vadd.f32 %v2025_v43, %v1977_v46  ;;  %2076 = vmatmul.bf16.gmra.mxu0 %v3184_v44  ;;  %v3809_v43 = vld [vmem:[%s5471_s0 + $0x24] sm:$0xf]  ;;  %v3818_v46 = vld [vmem:[%s5471_s0 + $0x64] sm:$0xf0]  ;;  %v2825_v48 = vld [vmem:[%s5471_s0 + $0x68] sm:$0xf0] }
 0x102   :  { %2125 = vmatmul.bf16.gmra.mxu1 %v3188_v45  ;;  %v2817_v44 = vld [vmem:[%s5471_s0 + $0x60] sm:$0xf0]  ;;  %v2823_v45 = vld [vmem:[%s5471_s0 + $0x28] sm:$0xf] }
 0x103   :  { %2174 = vmatmul.bf16.gmra.mxu2 %v3192_v51  ;;  %v2820_v55 = vor.u32 %v3809_v43, %v2817_v44  ;;  %v4033_v43 = vld [vmem:[%s5470_s1 + $0x320] sm:$0xff] }
 0x104   :  { %2223 = vmatmul.bf16.gmra.mxu3 %v3196_v52  ;;  %v4057_v44 = vld [vmem:[%s5470_s1 + $0x3e0] sm:$0xff]  ;;  %2433 = vmatpush.bf16.msrb.mxu0 %v4033_v43 }
 0x105   :  { %2579 = vmatpush.bf16.msrb.mxu3 %v4058_v6 }
 0x106   :  { %v1979_v58 = vpop.f32.mrf.mxu2  ;;  %v1883_v63 = vpop.f32.mrf.mxu0 }
 0x107   :  { %v2028_v59 = vpop.f32.mrf.mxu3  ;;  %v1980_v62 = vadd.f32 %v1979_v58, %v1931_v53  ;;  %v1932_v1 = vpop.f32.mrf.mxu1  ;;  %v2816_v53 = vor.u32 %v3817_v42, %v2815_v41  ;;  %v4049_v42 = vld [vmem:[%s5470_s1 + $0x3a0] sm:$0xff] }
 0x108   :  { %v1933_v2 = vadd.f32 %v1932_v1, %v1883_v63  ;;  %2531 = vmatpush.bf16.msrb.mxu2 %v4049_v42 }
 0x109   :  { %v4810_v3 = vadd.f32 %v2028_v59, %v1980_v62  ;;  %v2824_v59 = vor.u32 %v3818_v46, %v2823_v45  ;;  %v2828_v62 = vor.u32 %v3810_v47, %v2825_v48  ;;  %2580 = vmatpush.bf16.msrb.mxu3 %v4057_v44 }
 0x10e   :  { %v1981_v13 = vpop.f32.mrf.mxu2  ;;  %v1886_v21 = vpop.f32.mrf.mxu0 }
 0x10f   :  { %v2030_v14 = vpop.f32.mrf.mxu3  ;;  %v1982_v18 = vadd.f32 %v1981_v13, %v1933_v2  ;;  %v1935_v22 = vpop.f32.mrf.mxu1  ;;  %v4042_v13 = vld [vmem:[%s5470_s1 + $0x368] sm:$0xff] }
 0x110   :  { %v1936_v25 = vadd.f32 %v1935_v22, %v1886_v21  ;;  %v2887_v21 = vld [vmem:[%s5471_s0 + $0xa8] sm:$0xf]  ;;  %2481 = vmatpush.bf16.msrb.mxu1 %v4042_v13 }
 0x111   :  { %v4839_v26 = vadd.f32 %v2030_v14, %v1982_v18  ;;  %2081 = vmatmul.bf16.gmra.mxu0 %v3248_v15  ;;  %v2879_v15 = vld [vmem:[%s5471_s0 + $0xa0] sm:$0xf]  ;;  %v3825_v18 = vld [vmem:[%s5471_s0 + $0xa4] sm:$0xf]  ;;  %v3834_v22 = vld [vmem:[%s5471_s0 + $0xe4] sm:$0xf0] }
 0x112   :  { %2130 = vmatmul.bf16.gmra.mxu1 %v3252_v16  ;;  %v3833_v16 = vld [vmem:[%s5471_s0 + $0xdc] sm:$0xf0] }
 0x113   :  { %2179 = vmatmul.bf16.gmra.mxu2 %v3256_v23  ;;  %v3826_v23 = vld [vmem:[%s5471_s0 + $0xac] sm:$0xf]  ;;  %v2880_v29 = vor.u32 %v3833_v16, %v2879_v15  ;;  %v4048_v16 = vld [vmem:[%s5470_s1 + $0x398] sm:$0xff] }
 0x114   :  { %2228 = vmatmul.bf16.gmra.mxu3 %v3260_v24  ;;  %v2889_v24 = vld [vmem:[%s5471_s0 + $0xe8] sm:$0xf0]  ;;  %2532 = vmatpush.bf16.msrb.mxu2 %v4048_v16 }
 0x116   :  { %v1984_v33 = vpop.f32.mrf.mxu2  ;;  %v1888_v36 = vpop.f32.mrf.mxu0 }
 0x117   :  { %v2033_v34 = vpop.f32.mrf.mxu3  ;;  %v1985_v35 = vadd.f32 %v1984_v33, %v1936_v25  ;;  %v1937_v37 = vpop.f32.mrf.mxu1 }
 0x118   :  { %v1938_v38 = vadd.f32 %v1937_v37, %v1888_v36  ;;  %v2888_v36 = vor.u32 %v3834_v22, %v2887_v21  ;;  %v2892_v37 = vor.u32 %v3826_v23, %v2889_v24 }
 0x119   :  { %v4850_v39 = vadd.f32 %v2033_v34, %v1985_v35 }
 0x11e   :  { %v1986_v51 = vpop.f32.mrf.mxu2  ;;  %v2047_v57 = vpop.f32.mrf.mxu0 }
 0x11f   :  { %v2035_v52 = vpop.f32.mrf.mxu3  ;;  %v1987_v56 = vadd.f32 %v1986_v51, %v1938_v38  ;;  %v2096_v58 = vpop.f32.mrf.mxu1  ;;  %v2048_v63 = vadd.f32 %v2047_v57, %v4570_v0  ;;  %v3849_v57 = vld [vmem:[%s5471_s0 + $0x15c] sm:$0xf0] }
 0x121   :  { %v4880_v1 = vadd.f32 %v2035_v52, %v1987_v56  ;;  %v2097_v2 = vadd.f32 %v2096_v58, %v2048_v63  ;;  %2242 = vmatmul.bf16.vlgmr.msra.gmra.mxu0 %v2816_v53  ;;  %v4041_v53 = vld [vmem:[%s5470_s1 + $0x360] sm:$0xff]  ;;  %v3842_v63 = vld [vmem:[%s5471_s0 + $0x12c] sm:$0xf] }
 0x122   :  { %2291 = vmatmul.bf16.vlgmr.msra.gmra.mxu1 %v2820_v55  ;;  %v2943_v56 = vld [vmem:[%s5471_s0 + $0x120] sm:$0xf]  ;;  %v3841_v58 = vld [vmem:[%s5471_s0 + $0x124] sm:$0xf] }
 0x123   :  { %2340 = vmatmul.bf16.vlgmr.msra.gmra.mxu2 %v2824_v59  ;;  %v2951_v59 = vld [vmem:[%s5471_s0 + $0x128] sm:$0xf]  ;;  %2482 = vmatpush.bf16.msrb.mxu1 %v4041_v53  ;;  %v2944_v6 = vor.u32 %v3849_v57, %v2943_v56  ;;  %v4047_v57 = vld [vmem:[%s5470_s1 + $0x390] sm:$0xff] }
 0x124   :  { %2389 = vmatmul.bf16.vlgmr.msra.gmra.mxu3 %v2828_v62  ;;  %v3850_v62 = vld [vmem:[%s5471_s0 + $0x164] sm:$0xf0]  ;;  %2533 = vmatpush.bf16.msrb.mxu2 %v4047_v57 }
 0x126   :  { %v2145_v0 = vpop.f32.mrf.mxu2  ;;  %v2049_v9 = vpop.f32.mrf.mxu0 }
 0x127   :  { %v2194_v7 = vpop.f32.mrf.mxu3  ;;  %v2146_v8 = vadd.f32 %v2145_v0, %v2097_v2  ;;  %v2098_v10 = vpop.f32.mrf.mxu1  ;;  %v2050_v11 = vadd.f32 %v2049_v9, %v4599_v20  ;;  %v2881_v20 = vld [vmem:[%s5471_s0 + $0xe0] sm:$0xf0]  ;;  %v2953_v2 = vld [vmem:[%s5471_s0 + $0x168] sm:$0xf0] }
 0x128   :  { %v2884_v31 = vor.u32 %v3825_v18, %v2881_v20  ;;  %v4032_v18 = vld [vmem:[%s5470_s1 + $0x318] sm:$0xff] }
 0x129   :  { %v4892_v12 = vadd.f32 %v2194_v7, %v2146_v8  ;;  %v2099_v14 = vadd.f32 %v2098_v10, %v2050_v11  ;;  %v2952_v10 = vor.u32 %v3850_v62, %v2951_v59  ;;  %v2956_v11 = vor.u32 %v3842_v63, %v2953_v2  ;;  %v4056_v20 = vld [vmem:[%s5470_s1 + $0x3d8] sm:$0xff]  ;;  %2434 = vmatpush.bf16.msrb.mxu0 %v4032_v18 }
 0x12a   :  { %2581 = vmatpush.bf16.msrb.mxu3 %v4056_v20 }
 0x12e   :  { %v2147_v25 = vpop.f32.mrf.mxu2  ;;  %v2052_v34 = vpop.f32.mrf.mxu0 }
 0x12f   :  { %v2196_v27 = vpop.f32.mrf.mxu3  ;;  %v2148_v33 = vadd.f32 %v2147_v25, %v2099_v14  ;;  %v2101_v35 = vpop.f32.mrf.mxu1  ;;  %v2053_v38 = vadd.f32 %v2052_v34, %v4610_v30  ;;  %v3865_v34 = vld [vmem:[%s5471_s0 + $0x1dc] sm:$0xf0] }
 0x131   :  { %v4922_v40 = vadd.f32 %v2196_v27, %v2148_v33  ;;  %v2102_v41 = vadd.f32 %v2101_v35, %v2053_v38  ;;  %2247 = vmatmul.bf16.gmra.mxu0 %v2880_v29  ;;  %v4040_v29 = vld [vmem:[%s5470_s1 + $0x358] sm:$0xff]  ;;  %v3007_v33 = vld [vmem:[%s5471_s0 + $0x1a0] sm:$0xf]  ;;  %v3857_v35 = vld [vmem:[%s5471_s0 + $0x1a4] sm:$0xf] }
 0x132   :  { %2296 = vmatmul.bf16.gmra.mxu1 %v2884_v31  ;;  %v3858_v38 = vld [vmem:[%s5471_s0 + $0x1ac] sm:$0xf]  ;;  %v3008_v44 = vor.u32 %v3865_v34, %v3007_v33 }
 0x133   :  { %2345 = vmatmul.bf16.gmra.mxu2 %v2888_v36  ;;  %v3015_v36 = vld [vmem:[%s5471_s0 + $0x1a8] sm:$0xf]  ;;  %2483 = vmatpush.bf16.msrb.mxu1 %v4040_v29 }
 0x134   :  { %2394 = vmatmul.bf16.gmra.mxu3 %v2892_v37  ;;  %v3866_v37 = vld [vmem:[%s5471_s0 + $0x1e4] sm:$0xf0] }
 0x135   :  { %v4046_v34 = vld [vmem:[%s5470_s1 + $0x388] sm:$0xff] }
 0x136   :  { %v2150_v30 = vpop.f32.mrf.mxu2  ;;  %v2054_v47 = vpop.f32.mrf.mxu0  ;;  %2534 = vmatpush.bf16.msrb.mxu2 %v4046_v34 }
 0x137   :  { %v2199_v45 = vpop.f32.mrf.mxu3  ;;  %v2151_v46 = vadd.f32 %v2150_v30, %v2102_v41  ;;  %v2103_v48 = vpop.f32.mrf.mxu1  ;;  %v2055_v51 = vadd.f32 %v2054_v47, %v4639_v50  ;;  %v2945_v50 = vld [vmem:[%s5471_s0 + $0x160] sm:$0xf0]  ;;  %v3017_v41 = vld [vmem:[%s5471_s0 + $0x1e8] sm:$0xf0] }
 0x138   :  { %v2948_v0 = vor.u32 %v3841_v58, %v2945_v50  ;;  %v4031_v58 = vld [vmem:[%s5470_s1 + $0x310] sm:$0xff] }
 0x139   :  { %v4934_v52 = vadd.f32 %v2199_v45, %v2151_v46  ;;  %v2104_v55 = vadd.f32 %v2103_v48, %v2055_v51  ;;  %v3016_v48 = vor.u32 %v3866_v37, %v3015_v36  ;;  %v3020_v51 = vor.u32 %v3858_v38, %v3017_v41  ;;  %v4055_v50 = vld [vmem:[%s5470_s1 + $0x3d0] sm:$0xff]  ;;  %2435 = vmatpush.bf16.msrb.mxu0 %v4031_v58 }
 0x13a   :  { %2582 = vmatpush.bf16.msrb.mxu3 %v4055_v50 }
 0x13e   :  { %v2152_v4 = vpop.f32.mrf.mxu2  ;;  %v2057_v8 = vpop.f32.mrf.mxu0 }
 0x13f   :  { %v2201_v5 = vpop.f32.mrf.mxu3  ;;  %v2153_v7 = vadd.f32 %v2152_v4, %v2104_v55  ;;  %v2106_v9 = vpop.f32.mrf.mxu1  ;;  %v2058_v13 = vadd.f32 %v2057_v8, %v4650_v60  ;;  %v3881_v8 = vld [vmem:[%s5471_s0 + $0x25c] sm:$0xf0] }
 0x141   :  { %v4964_v14 = vadd.f32 %v2201_v5, %v2153_v7  ;;  %v2107_v15 = vadd.f32 %v2106_v9, %v2058_v13  ;;  %2252 = vmatmul.bf16.gmra.mxu0 %v2944_v6  ;;  %v4039_v6 = vld [vmem:[%s5470_s1 + $0x350] sm:$0xff]  ;;  %v3071_v7 = vld [vmem:[%s5471_s0 + $0x220] sm:$0xf]  ;;  %v3873_v9 = vld [vmem:[%s5471_s0 + $0x224] sm:$0xf] }
 0x142   :  { %2301 = vmatmul.bf16.gmra.mxu1 %v2948_v0  ;;  %v3874_v13 = vld [vmem:[%s5471_s0 + $0x22c] sm:$0xf]  ;;  %v3072_v20 = vor.u32 %v3881_v8, %v3071_v7  ;;  %v4045_v8 = vld [vmem:[%s5470_s1 + $0x380] sm:$0xff] }
 0x143   :  { %2350 = vmatmul.bf16.gmra.mxu2 %v2952_v10  ;;  %v3079_v10 = vld [vmem:[%s5471_s0 + $0x228] sm:$0xf]  ;;  %2484 = vmatpush.bf16.msrb.mxu1 %v4039_v6 }
 0x144   :  { %2399 = vmatmul.bf16.gmra.mxu3 %v2956_v11  ;;  %v3882_v11 = vld [vmem:[%s5471_s0 + $0x264] sm:$0xf0]  ;;  %2535 = vmatpush.bf16.msrb.mxu2 %v4045_v8 }
 0x146   :  { %v2155_v60 = vpop.f32.mrf.mxu2  ;;  %v2059_v23 = vpop.f32.mrf.mxu0 }
 0x147   :  { %v2204_v21 = vpop.f32.mrf.mxu3  ;;  %v2156_v22 = vadd.f32 %v2155_v60, %v2107_v15  ;;  %v2108_v24 = vpop.f32.mrf.mxu1  ;;  %v2060_v25 = vadd.f32 %v2059_v23, %v4679_v17  ;;  %v3009_v17 = vld [vmem:[%s5471_s0 + $0x1e0] sm:$0xf0]  ;;  %v3081_v15 = vld [vmem:[%s5471_s0 + $0x268] sm:$0xf0] }
 0x148   :  { %v3012_v30 = vor.u32 %v3857_v35, %v3009_v17  ;;  %v4030_v35 = vld [vmem:[%s5470_s1 + $0x308] sm:$0xff] }
 0x149   :  { %v4976_v27 = vadd.f32 %v2204_v21, %v2156_v22  ;;  %v2109_v31 = vadd.f32 %v2108_v24, %v2060_v25  ;;  %v3080_v24 = vor.u32 %v3882_v11, %v3079_v10  ;;  %v3084_v25 = vor.u32 %v3874_v13, %v3081_v15  ;;  %v4054_v17 = vld [vmem:[%s5470_s1 + $0x3c8] sm:$0xff]  ;;  %2436 = vmatpush.bf16.msrb.mxu0 %v4030_v35 }
 0x14a   :  { %2583 = vmatpush.bf16.msrb.mxu3 %v4054_v17 }
 0x14e   :  { %v2157_v42 = vpop.f32.mrf.mxu2  ;;  %v2062_v46 = vpop.f32.mrf.mxu0 }
 0x14f   :  { %v2206_v43 = vpop.f32.mrf.mxu3  ;;  %v2158_v45 = vadd.f32 %v2157_v42, %v2109_v31  ;;  %v2111_v47 = vpop.f32.mrf.mxu1  ;;  %v2063_v53 = vadd.f32 %v2062_v46, %v4690_v28  ;;  %v3897_v46 = vld [vmem:[%s5471_s0 + $0x2dc] sm:$0xf0] }
 0x151   :  { %v5006_v55 = vadd.f32 %v2206_v43, %v2158_v45  ;;  %v2112_v56 = vadd.f32 %v2111_v47, %v2063_v53  ;;  %2257 = vmatmul.bf16.gmra.mxu0 %v3008_v44  ;;  %v4038_v44 = vld [vmem:[%s5470_s1 + $0x348] sm:$0xff]  ;;  %v3135_v45 = vld [vmem:[%s5471_s0 + $0x2a0] sm:$0xf]  ;;  %v3889_v47 = vld [vmem:[%s5471_s0 + $0x2a4] sm:$0xf] }
 0x152   :  { %2306 = vmatmul.bf16.gmra.mxu1 %v3012_v30  ;;  %v3890_v53 = vld [vmem:[%s5471_s0 + $0x2ac] sm:$0xf]  ;;  %v3136_v50 = vor.u32 %v3897_v46, %v3135_v45 }
 0x153   :  { %2355 = vmatmul.bf16.gmra.mxu2 %v3016_v48  ;;  %v3143_v48 = vld [vmem:[%s5471_s0 + $0x2a8] sm:$0xf]  ;;  %2485 = vmatpush.bf16.msrb.mxu1 %v4038_v44 }
 0x154   :  { %2404 = vmatmul.bf16.gmra.mxu3 %v3020_v51  ;;  %v3898_v51 = vld [vmem:[%s5471_s0 + $0x2e4] sm:$0xf0] }
 0x156   :  { %v2160_v28 = vpop.f32.mrf.mxu2  ;;  %v2064_v63 = vpop.f32.mrf.mxu0 }
 0x157   :  { %v2209_v59 = vpop.f32.mrf.mxu3  ;;  %v2161_v62 = vadd.f32 %v2160_v28, %v2112_v56  ;;  %v2113_v2 = vpop.f32.mrf.mxu1  ;;  %v2065_v4 = vadd.f32 %v2064_v63, %v4719_v49  ;;  %v3073_v49 = vld [vmem:[%s5471_s0 + $0x260] sm:$0xf0]  ;;  %v3145_v56 = vld [vmem:[%s5471_s0 + $0x2e8] sm:$0xf0] }
 0x158   :  { %v3076_v60 = vor.u32 %v3873_v9, %v3073_v49  ;;  %v4029_v9 = vld [vmem:[%s5470_s1 + $0x300] sm:$0xff] }
 0x159   :  { %v5018_v5 = vadd.f32 %v2209_v59, %v2161_v62  ;;  %v2114_v0 = vadd.f32 %v2113_v2, %v2065_v4  ;;  %v3144_v2 = vor.u32 %v3898_v51, %v3143_v48  ;;  %v3148_v4 = vor.u32 %v3890_v53, %v3145_v56  ;;  %v4053_v49 = vld [vmem:[%s5470_s1 + $0x3c0] sm:$0xff]  ;;  %2437 = vmatpush.bf16.msrb.mxu0 %v4029_v9 }
 0x15a   :  { %2584 = vmatpush.bf16.msrb.mxu3 %v4053_v49 }
 0x15e   :  { %v2162_v16 = vpop.f32.mrf.mxu2  ;;  %v2067_v22 = vpop.f32.mrf.mxu0 }
 0x15f   :  { %v2211_v18 = vpop.f32.mrf.mxu3  ;;  %v2163_v21 = vadd.f32 %v2162_v16, %v2114_v0  ;;  %v2116_v23 = vpop.f32.mrf.mxu1  ;;  %v2068_v29 = vadd.f32 %v2067_v22, %v4730_v61  ;;  %v3913_v22 = vld [vmem:[%s5471_s0 + $0x35c] sm:$0xf0] }
 0x161   :  { %v5048_v31 = vadd.f32 %v2211_v18, %v2163_v21  ;;  %v2117_v33 = vadd.f32 %v2116_v23, %v2068_v29  ;;  %2262 = vmatmul.bf16.gmra.mxu0 %v3072_v20  ;;  %v4037_v20 = vld [vmem:[%s5470_s1 + $0x340] sm:$0xff]  ;;  %v3906_v29 = vld [vmem:[%s5471_s0 + $0x32c] sm:$0xf] }
 0x162   :  { %2311 = vmatmul.bf16.gmra.mxu1 %v3076_v60  ;;  %v3199_v21 = vld [vmem:[%s5471_s0 + $0x320] sm:$0xf]  ;;  %v3905_v23 = vld [vmem:[%s5471_s0 + $0x324] sm:$0xf] }
 0x163   :  { %2360 = vmatmul.bf16.gmra.mxu2 %v3080_v24  ;;  %v3207_v24 = vld [vmem:[%s5471_s0 + $0x328] sm:$0xf]  ;;  %2486 = vmatpush.bf16.msrb.mxu1 %v4037_v20  ;;  %v3200_v17 = vor.u32 %v3913_v22, %v3199_v21 }
 0x164   :  { %2409 = vmatmul.bf16.gmra.mxu3 %v3084_v25  ;;  %v3914_v25 = vld [vmem:[%s5471_s0 + $0x364] sm:$0xf0] }
 0x166   :  { %v2165_v61 = vpop.f32.mrf.mxu2  ;;  %v2069_v38 = vpop.f32.mrf.mxu0 }
 0x167   :  { %v2214_v36 = vpop.f32.mrf.mxu3  ;;  %v2166_v37 = vadd.f32 %v2165_v61, %v2117_v33  ;;  %v2118_v41 = vpop.f32.mrf.mxu1  ;;  %v2070_v42 = vadd.f32 %v2069_v38, %v4759_v19  ;;  %v3137_v19 = vld [vmem:[%s5471_s0 + $0x2e0] sm:$0xf0]  ;;  %v3209_v33 = vld [vmem:[%s5471_s0 + $0x368] sm:$0xf0] }
 0x168   :  { %v3140_v28 = vor.u32 %v3889_v47, %v3137_v19 }
 0x169   :  { %v5060_v43 = vadd.f32 %v2214_v36, %v2166_v37  ;;  %v2119_v30 = vadd.f32 %v2118_v41, %v2070_v42  ;;  %v3208_v41 = vor.u32 %v3914_v25, %v3207_v24  ;;  %v3212_v42 = vor.u32 %v3906_v29, %v3209_v33  ;;  %v3819_v25 = vld [vmem:[%s5471_s0 + $0x6c] sm:$0xf0]  ;;  %v3811_v29 = vld [vmem:[%s5471_s0 + $0x34] sm:$0xf] }
 0x16a   :  { %v2833_v33 = vld [vmem:[%s5471_s0 + $0x70] sm:$0xf0] }
 0x16e   :  { %v2167_v57 = vpop.f32.mrf.mxu2  ;;  %v2072_v62 = vpop.f32.mrf.mxu0 }
 0x16f   :  { %v2216_v58 = vpop.f32.mrf.mxu3  ;;  %v2168_v59 = vadd.f32 %v2167_v57, %v2119_v30  ;;  %v2121_v63 = vpop.f32.mrf.mxu1  ;;  %v2073_v6 = vadd.f32 %v2072_v62, %v4770_v32  ;;  %v3922_v62 = vld [vmem:[%s5471_s0 + $0x3ac] sm:$0xf] }
 0x171   :  { %v5090_v0 = vadd.f32 %v2216_v58, %v2168_v59  ;;  %v2122_v7 = vadd.f32 %v2121_v63, %v2073_v6  ;;  %2267 = vmatmul.bf16.gmra.mxu0 %v3136_v50  ;;  %v3929_v58 = vld [vmem:[%s5471_s0 + $0x3dc] sm:$0xf0]  ;;  %v3921_v50 = vld [vmem:[%s5471_s0 + $0x3a4] sm:$0xf]  ;;  %v3930_v59 = vld [vmem:[%s5471_s0 + $0x3e4] sm:$0xf0] }
 0x172   :  { %2316 = vmatmul.bf16.gmra.mxu1 %v3140_v28  ;;  %v3265_v28 = vld [vmem:[%s5471_s0 + $0x3e0] sm:$0xf0]  ;;  %v3273_v63 = vld [vmem:[%s5471_s0 + $0x3e8] sm:$0xf0] }
 0x173   :  { %2365 = vmatmul.bf16.gmra.mxu2 %v3144_v2 }
 0x174   :  { %2414 = vmatmul.bf16.gmra.mxu3 %v3148_v4 }
 0x176   :  { %v2170_v32 = vpop.f32.mrf.mxu2  ;;  %v2074_v13 = vpop.f32.mrf.mxu0 }
 0x177   :  { %v2219_v10 = vpop.f32.mrf.mxu3  ;;  %v2171_v11 = vadd.f32 %v2170_v32, %v2122_v7  ;;  %v2123_v15 = vpop.f32.mrf.mxu1  ;;  %v2075_v16 = vadd.f32 %v2074_v13, %v4799_v54  ;;  %v3201_v54 = vld [vmem:[%s5471_s0 + $0x360] sm:$0xf0]  ;;  %v3268_v7 = vor.u32 %v3921_v50, %v3265_v28 }
 0x178   :  { %v3204_v61 = vor.u32 %v3905_v23, %v3201_v54 }
 0x179   :  { %v5102_v18 = vadd.f32 %v2219_v10, %v2171_v11  ;;  %v2124_v60 = vadd.f32 %v2123_v15, %v2075_v16  ;;  %v3276_v10 = vor.u32 %v3922_v62, %v3273_v63  ;;  %v3827_v62 = vld [vmem:[%s5471_s0 + $0xb4] sm:$0xf] }
 0x17a   :  { %v2897_v63 = vld [vmem:[%s5471_s0 + $0xf0] sm:$0xf0] }
 0x17e   :  { %v2172_v34 = vpop.f32.mrf.mxu2  ;;  %v2077_v37 = vpop.f32.mrf.mxu0 }
 0x17f   :  { %v2221_v35 = vpop.f32.mrf.mxu3  ;;  %v2173_v36 = vadd.f32 %v2172_v34, %v2124_v60  ;;  %v2126_v38 = vpop.f32.mrf.mxu1  ;;  %v2078_v44 = vadd.f32 %v2077_v37, %v4810_v3  ;;  %v3263_v3 = vld [vmem:[%s5471_s0 + $0x3a0] sm:$0xf]  ;;  %v3820_v34 = vld [vmem:[%s5471_s0 + $0x74] sm:$0xf0] }
 0x180   :  { %v3264_v6 = vor.u32 %v3929_v58, %v3263_v3 }
 0x181   :  { %v5132_v30 = vadd.f32 %v2221_v35, %v2173_v36  ;;  %v2127_v45 = vadd.f32 %v2126_v38, %v2078_v44  ;;  %2272 = vmatmul.bf16.gmra.mxu0 %v3200_v17  ;;  %v3812_v35 = vld [vmem:[%s5471_s0 + $0x3c] sm:$0xf]  ;;  %v2836_v38 = vor.u32 %v3811_v29, %v2833_v33 }
 0x182   :  { %2321 = vmatmul.bf16.gmra.mxu1 %v3204_v61  ;;  %v2841_v17 = vld [vmem:[%s5471_s0 + $0x78] sm:$0xf0] }
 0x183   :  { %2370 = vmatmul.bf16.gmra.mxu2 %v3208_v41 }
 0x184   :  { %2419 = vmatmul.bf16.gmra.mxu3 %v3212_v42 }
 0x186   :  { %v2175_v46 = vpop.f32.mrf.mxu2  ;;  %v2079_v48 = vpop.f32.mrf.mxu0 }
 0x187   :  { %v2224_v47 = vpop.f32.mrf.mxu3  ;;  %v2176_v19 = vadd.f32 %v2175_v46, %v2127_v45  ;;  %v2128_v51 = vpop.f32.mrf.mxu1  ;;  %v2080_v53 = vadd.f32 %v2079_v48, %v4839_v26  ;;  %v3271_v26 = vld [vmem:[%s5471_s0 + $0x3a8] sm:$0xf]  ;;  %v2844_v46 = vor.u32 %v3812_v35, %v2841_v17  ;;  %v3843_v35 = vld [vmem:[%s5471_s0 + $0x134] sm:$0xf] }
 0x188   :  { %v3272_v32 = vor.u32 %v3930_v59, %v3271_v26  ;;  %v3835_v59 = vld [vmem:[%s5471_s0 + $0xec] sm:$0xf0]  ;;  %v2961_v17 = vld [vmem:[%s5471_s0 + $0x170] sm:$0xf0] }
 0x189   :  { %v5135_v56 = vadd.f32 %v2224_v47, %v2176_v19  ;;  %v2129_v57 = vadd.f32 %v2128_v51, %v2080_v53 }
 0x18e   :  { %v2177_v2 = vpop.f32.mrf.mxu2  ;;  %v2082_v9 = vpop.f32.mrf.mxu0 }
 0x18f   :  { %v2226_v4 = vpop.f32.mrf.mxu3  ;;  %v2178_v8 = vadd.f32 %v2177_v2, %v2129_v57  ;;  %v2131_v49 = vpop.f32.mrf.mxu1  ;;  %v2083_v11 = vadd.f32 %v2082_v9, %v4850_v39  ;;  %v2831_v39 = vld [vmem:[%s5471_s0 + $0x30] sm:$0xf]  ;;  %v3836_v2 = vld [vmem:[%s5471_s0 + $0xf4] sm:$0xf0] }
 0x190   :  { %v2832_v37 = vor.u32 %v3819_v25, %v2831_v39 }
 0x191   :  { %v5162_v13 = vadd.f32 %v2226_v4, %v2178_v8  ;;  %v2132_v15 = vadd.f32 %v2131_v49, %v2083_v11  ;;  %2277 = vmatmul.bf16.gmra.mxu0 %v3264_v6  ;;  %v3828_v4 = vld [vmem:[%s5471_s0 + $0xbc] sm:$0xf]  ;;  %v2900_v49 = vor.u32 %v3827_v62, %v2897_v63 }
 0x192   :  { %2326 = vmatmul.bf16.gmra.mxu1 %v3268_v7  ;;  %v2905_v6 = vld [vmem:[%s5471_s0 + $0xf8] sm:$0xf0] }
 0x193   :  { %2375 = vmatmul.bf16.gmra.mxu2 %v3272_v32 }
 0x194   :  { %2424 = vmatmul.bf16.gmra.mxu3 %v3276_v10 }
 0x196   :  { %v2180_v16 = vpop.f32.mrf.mxu2  ;;  %v2084_v21 = vpop.f32.mrf.mxu0 }
 0x197   :  { %v2229_v20 = vpop.f32.mrf.mxu3  ;;  %v2181_v60 = vadd.f32 %v2180_v16, %v2132_v15  ;;  %v2133_v22 = vpop.f32.mrf.mxu1  ;;  %v2085_v23 = vadd.f32 %v2084_v21, %v4880_v1  ;;  %v2839_v1 = vld [vmem:[%s5471_s0 + $0x38] sm:$0xf]  ;;  %v2908_v16 = vor.u32 %v3828_v4, %v2905_v6  ;;  %v3859_v4 = vld [vmem:[%s5471_s0 + $0x1b4] sm:$0xf] }
 0x198   :  { %v2840_v45 = vor.u32 %v3820_v34, %v2839_v1  ;;  %v3851_v34 = vld [vmem:[%s5471_s0 + $0x16c] sm:$0xf0]  ;;  %v3025_v6 = vld [vmem:[%s5471_s0 + $0x1f0] sm:$0xf0] }
 0x199   :  { %v5165_v54 = vadd.f32 %v2229_v20, %v2181_v60  ;;  %v2134_v24 = vadd.f32 %v2133_v22, %v2085_v23 }
 0x19e   :  { %v2182_v61 = vpop.f32.mrf.mxu2  ;;  %v2243_v42 = vpop.f32.mrf.mxu0 }
 0x19f   :  { %v2231_v36 = vpop.f32.mrf.mxu3  ;;  %v2183_v41 = vadd.f32 %v2182_v61, %v2134_v24  ;;  %v2292_v44 = vpop.f32.mrf.mxu1  ;;  %v2244_v47 = vadd.f32 %v2243_v42, %v4892_v12  ;;  %v2895_v12 = vld [vmem:[%s5471_s0 + $0xb0] sm:$0xf]  ;;  %v3852_v61 = vld [vmem:[%s5471_s0 + $0x174] sm:$0xf0] }
 0x1a0   :  { %v2896_v9 = vor.u32 %v3835_v59, %v2895_v12 }
 0x1a1   :  { %v5192_v19 = vadd.f32 %v2231_v36, %v2183_v41  ;;  %v2293_v48 = vadd.f32 %v2292_v44, %v2244_v47  ;;  %2438 = vmatmul.bf16.vlgmr.msrb.gmra.mxu0 %v2832_v37  ;;  %v3844_v36 = vld [vmem:[%s5471_s0 + $0x13c] sm:$0xf]  ;;  %v2964_v44 = vor.u32 %v3843_v35, %v2961_v17 }
 0x1a2   :  { %2487 = vmatmul.bf16.vlgmr.msrb.gmra.mxu1 %v2836_v38  ;;  %v2969_v37 = vld [vmem:[%s5471_s0 + $0x178] sm:$0xf0] }
 0x1a3   :  { %2536 = vmatmul.bf16.vlgmr.msrb.gmra.mxu2 %v2840_v45 }
 0x1a4   :  { %2585 = vmatmul.bf16.vlgmr.msrb.gmra.mxu3 %v2844_v46 }
 0x1a6   :  { %v2341_v51 = vpop.f32.mrf.mxu2  ;;  %v2245_v3 = vpop.f32.mrf.mxu0 }
 0x1a7   :  { %v2390_v53 = vpop.f32.mrf.mxu3  ;;  %v2342_v57 = vadd.f32 %v2341_v51, %v2293_v48  ;;  %v2294_v58 = vpop.f32.mrf.mxu1  ;;  %v2246_v50 = vadd.f32 %v2245_v3, %v4922_v40  ;;  %v2903_v40 = vld [vmem:[%s5471_s0 + $0xb8] sm:$0xf]  ;;  %v2972_v51 = vor.u32 %v3844_v36, %v2969_v37  ;;  %v3875_v36 = vld [vmem:[%s5471_s0 + $0x234] sm:$0xf] }
 0x1a8   :  { %v2904_v15 = vor.u32 %v3836_v2, %v2903_v40  ;;  %v3867_v2 = vld [vmem:[%s5471_s0 + $0x1ec] sm:$0xf0]  ;;  %v3089_v37 = vld [vmem:[%s5471_s0 + $0x270] sm:$0xf0] }
 0x1a9   :  { %v5195_v28 = vadd.f32 %v2390_v53, %v2342_v57  ;;  %v2295_v26 = vadd.f32 %v2294_v58, %v2246_v50 }
 0x1ae   :  { %v2343_v7 = vpop.f32.mrf.mxu2  ;;  %v2248_v10 = vpop.f32.mrf.mxu0 }
 0x1af   :  { %v2392_v8 = vpop.f32.mrf.mxu3  ;;  %v2344_v32 = vadd.f32 %v2343_v7, %v2295_v26  ;;  %v2297_v11 = vpop.f32.mrf.mxu1  ;;  %v2249_v20 = vadd.f32 %v2248_v10, %v4934_v52  ;;  %v2959_v52 = vld [vmem:[%s5471_s0 + $0x130] sm:$0xf]  ;;  %v3868_v7 = vld [vmem:[%s5471_s0 + $0x1f4] sm:$0xf0] }
 0x1b0   :  { %v2960_v42 = vor.u32 %v3851_v34, %v2959_v52 }
 0x1b1   :  { %v5222_v60 = vadd.f32 %v2392_v8, %v2344_v32  ;;  %v2298_v21 = vadd.f32 %v2297_v11, %v2249_v20  ;;  %2443 = vmatmul.bf16.gmra.mxu0 %v2896_v9  ;;  %v3860_v8 = vld [vmem:[%s5471_s0 + $0x1bc] sm:$0xf]  ;;  %v3028_v11 = vor.u32 %v3859_v4, %v3025_v6 }
 0x1b2   :  { %2492 = vmatmul.bf16.gmra.mxu1 %v2900_v49  ;;  %v3033_v9 = vld [vmem:[%s5471_s0 + $0x1f8] sm:$0xf0] }
 0x1b3   :  { %2541 = vmatmul.bf16.gmra.mxu2 %v2904_v15 }
 0x1b4   :  { %2590 = vmatmul.bf16.gmra.mxu3 %v2908_v16 }
 0x1b6   :  { %v2346_v22 = vpop.f32.mrf.mxu2  ;;  %v2250_v39 = vpop.f32.mrf.mxu0 }
 0x1b7   :  { %v2395_v23 = vpop.f32.mrf.mxu3  ;;  %v2347_v24 = vadd.f32 %v2346_v22, %v2298_v21  ;;  %v2299_v25 = vpop.f32.mrf.mxu1  ;;  %v2251_v29 = vadd.f32 %v2250_v39, %v4964_v14  ;;  %v2967_v14 = vld [vmem:[%s5471_s0 + $0x138] sm:$0xf]  ;;  %v3036_v22 = vor.u32 %v3860_v8, %v3033_v9  ;;  %v3891_v8 = vld [vmem:[%s5471_s0 + $0x2b4] sm:$0xf] }
 0x1b8   :  { %v2968_v48 = vor.u32 %v3852_v61, %v2967_v14  ;;  %v3883_v61 = vld [vmem:[%s5471_s0 + $0x26c] sm:$0xf0]  ;;  %v3153_v9 = vld [vmem:[%s5471_s0 + $0x2f0] sm:$0xf0] }
 0x1b9   :  { %v5225_v33 = vadd.f32 %v2395_v23, %v2347_v24  ;;  %v2300_v1 = vadd.f32 %v2299_v25, %v2251_v29 }
 0x1be   :  { %v2348_v38 = vpop.f32.mrf.mxu2  ;;  %v2253_v46 = vpop.f32.mrf.mxu0 }
 0x1bf   :  { %v2397_v41 = vpop.f32.mrf.mxu3  ;;  %v2349_v45 = vadd.f32 %v2348_v38, %v2300_v1  ;;  %v2302_v47 = vpop.f32.mrf.mxu1  ;;  %v2254_v53 = vadd.f32 %v2253_v46, %v4976_v27  ;;  %v3023_v27 = vld [vmem:[%s5471_s0 + $0x1b0] sm:$0xf]  ;;  %v3884_v38 = vld [vmem:[%s5471_s0 + $0x274] sm:$0xf0] }
 0x1c0   :  { %v3024_v10 = vor.u32 %v3867_v2, %v3023_v27 }
 0x1c1   :  { %v5252_v57 = vadd.f32 %v2397_v41, %v2349_v45  ;;  %v2303_v3 = vadd.f32 %v2302_v47, %v2254_v53  ;;  %2448 = vmatmul.bf16.gmra.mxu0 %v2960_v42  ;;  %v3876_v41 = vld [vmem:[%s5471_s0 + $0x23c] sm:$0xf]  ;;  %v3092_v47 = vor.u32 %v3875_v36, %v3089_v37 }
 0x1c2   :  { %2497 = vmatmul.bf16.gmra.mxu1 %v2964_v44  ;;  %v3097_v42 = vld [vmem:[%s5471_s0 + $0x278] sm:$0xf0] }
 0x1c3   :  { %2546 = vmatmul.bf16.gmra.mxu2 %v2968_v48 }
 0x1c4   :  { %2595 = vmatmul.bf16.gmra.mxu3 %v2972_v51 }
 0x1c6   :  { %v2351_v58 = vpop.f32.mrf.mxu2  ;;  %v2255_v12 = vpop.f32.mrf.mxu0 }
 0x1c7   :  { %v2400_v50 = vpop.f32.mrf.mxu3  ;;  %v2352_v26 = vadd.f32 %v2351_v58, %v2303_v3  ;;  %v2304_v59 = vpop.f32.mrf.mxu1  ;;  %v2256_v62 = vadd.f32 %v2255_v12, %v5006_v55  ;;  %v3031_v55 = vld [vmem:[%s5471_s0 + $0x1b8] sm:$0xf]  ;;  %v3100_v58 = vor.u32 %v3876_v41, %v3097_v42  ;;  %v3907_v41 = vld [vmem:[%s5471_s0 + $0x334] sm:$0xf] }
 0x1c8   :  { %v3032_v21 = vor.u32 %v3868_v7, %v3031_v55  ;;  %v3899_v7 = vld [vmem:[%s5471_s0 + $0x2ec] sm:$0xf0]  ;;  %v3217_v42 = vld [vmem:[%s5471_s0 + $0x370] sm:$0xf0] }
 0x1c9   :  { %v5255_v63 = vadd.f32 %v2400_v50, %v2352_v26  ;;  %v2305_v40 = vadd.f32 %v2304_v59, %v2256_v62 }
 0x1ce   :  { %v2353_v49 = vpop.f32.mrf.mxu2  ;;  %v2258_v16 = vpop.f32.mrf.mxu0 }
 0x1cf   :  { %v2402_v32 = vpop.f32.mrf.mxu3  ;;  %v2354_v15 = vadd.f32 %v2353_v49, %v2305_v40  ;;  %v2307_v20 = vpop.f32.mrf.mxu1  ;;  %v2259_v23 = vadd.f32 %v2258_v16, %v5018_v5  ;;  %v3087_v5 = vld [vmem:[%s5471_s0 + $0x230] sm:$0xf]  ;;  %v3900_v49 = vld [vmem:[%s5471_s0 + $0x2f4] sm:$0xf0] }
 0x1d0   :  { %v3088_v46 = vor.u32 %v3883_v61, %v3087_v5 }
 0x1d1   :  { %v5282_v24 = vadd.f32 %v2402_v32, %v2354_v15  ;;  %v2308_v39 = vadd.f32 %v2307_v20, %v2259_v23  ;;  %2453 = vmatmul.bf16.gmra.mxu0 %v3024_v10  ;;  %v3892_v32 = vld [vmem:[%s5471_s0 + $0x2bc] sm:$0xf]  ;;  %v3156_v20 = vor.u32 %v3891_v8, %v3153_v9 }
 0x1d2   :  { %2502 = vmatmul.bf16.gmra.mxu1 %v3028_v11  ;;  %v3161_v10 = vld [vmem:[%s5471_s0 + $0x2f8] sm:$0xf0] }
 0x1d3   :  { %2551 = vmatmul.bf16.gmra.mxu2 %v3032_v21 }
 0x1d4   :  { %2600 = vmatmul.bf16.gmra.mxu3 %v3036_v22 }
 0x1d6   :  { %v2356_v25 = vpop.f32.mrf.mxu2  ;;  %v2260_v52 = vpop.f32.mrf.mxu0 }
 0x1d7   :  { %v2405_v29 = vpop.f32.mrf.mxu3  ;;  %v2357_v1 = vadd.f32 %v2356_v25, %v2308_v39  ;;  %v2309_v34 = vpop.f32.mrf.mxu1  ;;  %v2261_v35 = vadd.f32 %v2260_v52, %v5048_v31  ;;  %v3095_v31 = vld [vmem:[%s5471_s0 + $0x238] sm:$0xf]  ;;  %v3164_v25 = vor.u32 %v3892_v32, %v3161_v10  ;;  %v3923_v32 = vld [vmem:[%s5471_s0 + $0x3b4] sm:$0xf] }
 0x1d8   :  { %v3096_v3 = vor.u32 %v3884_v38, %v3095_v31  ;;  %v3915_v38 = vld [vmem:[%s5471_s0 + $0x36c] sm:$0xf0]  ;;  %v3281_v10 = vld [vmem:[%s5471_s0 + $0x3f0] sm:$0xf0] }
 0x1d9   :  { %v5285_v17 = vadd.f32 %v2405_v29, %v2357_v1  ;;  %v2310_v14 = vadd.f32 %v2309_v34, %v2261_v35 }
 0x1de   :  { %v2358_v44 = vpop.f32.mrf.mxu2  ;;  %v2263_v51 = vpop.f32.mrf.mxu0 }
 0x1df   :  { %v2407_v45 = vpop.f32.mrf.mxu3  ;;  %v2359_v48 = vadd.f32 %v2358_v44, %v2310_v14  ;;  %v2312_v53 = vpop.f32.mrf.mxu1  ;;  %v2264_v50 = vadd.f32 %v2263_v51, %v5060_v43  ;;  %v3151_v43 = vld [vmem:[%s5471_s0 + $0x2b0] sm:$0xf]  ;;  %v3916_v44 = vld [vmem:[%s5471_s0 + $0x374] sm:$0xf0] }
 0x1e0   :  { %v3152_v16 = vor.u32 %v3899_v7, %v3151_v43 }
 0x1e1   :  { %v5312_v26 = vadd.f32 %v2407_v45, %v2359_v48  ;;  %v2313_v12 = vadd.f32 %v2312_v53, %v2264_v50  ;;  %2458 = vmatmul.bf16.gmra.mxu0 %v3088_v46  ;;  %v3908_v45 = vld [vmem:[%s5471_s0 + $0x33c] sm:$0xf]  ;;  %v3220_v53 = vor.u32 %v3907_v41, %v3217_v42 }
 0x1e2   :  { %2507 = vmatmul.bf16.gmra.mxu1 %v3092_v47  ;;  %v3225_v46 = vld [vmem:[%s5471_s0 + $0x378] sm:$0xf0] }
 0x1e3   :  { %2556 = vmatmul.bf16.gmra.mxu2 %v3096_v3 }
 0x1e4   :  { %2605 = vmatmul.bf16.gmra.mxu3 %v3100_v58 }
 0x1e6   :  { %v2361_v59 = vpop.f32.mrf.mxu2  ;;  %v2265_v27 = vpop.f32.mrf.mxu0 }
 0x1e7   :  { %v2410_v62 = vpop.f32.mrf.mxu3  ;;  %v2362_v40 = vadd.f32 %v2361_v59, %v2313_v12  ;;  %v2314_v2 = vpop.f32.mrf.mxu1  ;;  %v2266_v4 = vadd.f32 %v2265_v27, %v5090_v0  ;;  %v3159_v0 = vld [vmem:[%s5471_s0 + $0x2b8] sm:$0xf]  ;;  %v3228_v59 = vor.u32 %v3908_v45, %v3225_v46 }
 0x1e8   :  { %v3160_v39 = vor.u32 %v3900_v49, %v3159_v0  ;;  %v3931_v49 = vld [vmem:[%s5471_s0 + $0x3ec] sm:$0xf0] }
 0x1e9   :  { %v5315_v6 = vadd.f32 %v2410_v62, %v2362_v40  ;;  %v2315_v55 = vadd.f32 %v2314_v2, %v2266_v4 }
 0x1ee   :  { %v2363_v11 = vpop.f32.mrf.mxu2  ;;  %v2268_v22 = vpop.f32.mrf.mxu0 }
 0x1ef   :  { %v2412_v15 = vpop.f32.mrf.mxu3  ;;  %v2364_v21 = vadd.f32 %v2363_v11, %v2315_v55  ;;  %v2317_v23 = vpop.f32.mrf.mxu1  ;;  %v2269_v29 = vadd.f32 %v2268_v22, %v5102_v18  ;;  %v3215_v18 = vld [vmem:[%s5471_s0 + $0x330] sm:$0xf]  ;;  %v3932_v11 = vld [vmem:[%s5471_s0 + $0x3f4] sm:$0xf0] }
 0x1f0   :  { %v3216_v51 = vor.u32 %v3915_v38, %v3215_v18 }
 0x1f1   :  { %v5342_v1 = vadd.f32 %v2412_v15, %v2364_v21  ;;  %v2318_v52 = vadd.f32 %v2317_v23, %v2269_v29  ;;  %2463 = vmatmul.bf16.gmra.mxu0 %v3152_v16  ;;  %v3924_v15 = vld [vmem:[%s5471_s0 + $0x3bc] sm:$0xf]  ;;  %v3284_v23 = vor.u32 %v3923_v32, %v3281_v10 }
 0x1f2   :  { %2512 = vmatmul.bf16.gmra.mxu1 %v3156_v20  ;;  %v3289_v16 = vld [vmem:[%s5471_s0 + $0x3f8] sm:$0xf0] }
 0x1f3   :  { %2561 = vmatmul.bf16.gmra.mxu2 %v3160_v39 }
 0x1f4   :  { %2610 = vmatmul.bf16.gmra.mxu3 %v3164_v25 }
 0x1f6   :  { %v2366_v34 = vpop.f32.mrf.mxu2  ;;  %v2270_v5 = vpop.f32.mrf.mxu0 }
 0x1f7   :  { %v2415_v35 = vpop.f32.mrf.mxu3  ;;  %v2367_v14 = vadd.f32 %v2366_v34, %v2318_v52  ;;  %v2319_v61 = vpop.f32.mrf.mxu1  ;;  %v2271_v36 = vadd.f32 %v2270_v5, %v5132_v30  ;;  %v3223_v30 = vld [vmem:[%s5471_s0 + $0x338] sm:$0xf]  ;;  %v3292_v34 = vor.u32 %v3924_v15, %v3289_v16 }
 0x1f8   :  { %v3224_v12 = vor.u32 %v3916_v44, %v3223_v30 }
 0x1f9   :  { %v5345_v37 = vadd.f32 %v2415_v35, %v2367_v14  ;;  %v2320_v31 = vadd.f32 %v2319_v61, %v2271_v36 }
 0x1fe   :  { %v2368_v47 = vpop.f32.mrf.mxu2  ;;  %v2273_v58 = vpop.f32.mrf.mxu0 }
 0x1ff   :  { %v2417_v48 = vpop.f32.mrf.mxu3  ;;  %v2369_v3 = vadd.f32 %v2368_v47, %v2320_v31  ;;  %v2322_v50 = vpop.f32.mrf.mxu1  ;;  %v2274_v62 = vadd.f32 %v2273_v58, %v5135_v56  ;;  %v3279_v56 = vld [vmem:[%s5471_s0 + $0x3b0] sm:$0xf] }
 0x200   :  { %v3280_v22 = vor.u32 %v3931_v49, %v3279_v56 }
 0x201   :  { %v5372_v40 = vadd.f32 %v2417_v48, %v2369_v3  ;;  %v2323_v27 = vadd.f32 %v2322_v50, %v2274_v62  ;;  %2468 = vmatmul.bf16.gmra.mxu0 %v3216_v51 }
 0x202   :  { %2517 = vmatmul.bf16.gmra.mxu1 %v3220_v53 }
 0x203   :  { %2566 = vmatmul.bf16.gmra.mxu2 %v3224_v12 }
 0x204   :  { %2615 = vmatmul.bf16.gmra.mxu3 %v3228_v59 }
 0x206   :  { %v2371_v2 = vpop.f32.mrf.mxu2  ;;  %v2275_v43 = vpop.f32.mrf.mxu0 }
 0x207   :  { %v2420_v4 = vpop.f32.mrf.mxu3  ;;  %v2372_v55 = vadd.f32 %v2371_v2, %v2323_v27  ;;  %v2324_v7 = vpop.f32.mrf.mxu1  ;;  %v2276_v8 = vadd.f32 %v2275_v43, %v5162_v13  ;;  %v3287_v13 = vld [vmem:[%s5471_s0 + $0x3b8] sm:$0xf]  ;;  %v5414_v27 = vld [vmem:[%s5472_s2] ss:$0 sm:$0xff] }
 0x208   :  { %v3288_v52 = vor.u32 %v3932_v11, %v3287_v13 }
 0x209   :  { %v5375_v9 = vadd.f32 %v2420_v4, %v2372_v55  ;;  %v2325_v0 = vadd.f32 %v2324_v7, %v2276_v8 }
 0x20e   :  { %v2373_v20 = vpop.f32.mrf.mxu2  ;;  %v2278_v25 = vpop.f32.mrf.mxu0 }
 0x20f   :  { %v2422_v21 = vpop.f32.mrf.mxu3  ;;  %v2374_v39 = vadd.f32 %v2373_v20, %v2325_v0  ;;  %v2327_v29 = vpop.f32.mrf.mxu1  ;;  %v2279_v35 = vadd.f32 %v2278_v25, %v5165_v54 }
 0x211   :  { %v5402_v14 = vadd.f32 %v2422_v21, %v2374_v39  ;;  %v2328_v5 = vadd.f32 %v2327_v29, %v2279_v35  ;;  %2473 = vmatmul.bf16.gmra.mxu0 %v3280_v22 }
 0x212   :  { %2522 = vmatmul.bf16.gmra.mxu1 %v3284_v23 }
 0x213   :  { %2571 = vmatmul.bf16.gmra.mxu2 %v3288_v52 }
 0x214   :  { %2620 = vmatmul.bf16.gmra.mxu3 %v3292_v34 }
 0x216   :  { %v2376_v61 = vpop.f32.mrf.mxu2  ;;  %v2280_v18 = vpop.f32.mrf.mxu0 }
 0x217   :  { %v2425_v36 = vpop.f32.mrf.mxu3  ;;  %v2377_v31 = vadd.f32 %v2376_v61, %v2328_v5  ;;  %v2329_v38 = vpop.f32.mrf.mxu1  ;;  %v2281_v41 = vadd.f32 %v2280_v18, %v5192_v19 }
 0x219   :  { %v5405_v42 = vadd.f32 %v2425_v36, %v2377_v31  ;;  %v2330_v30 = vadd.f32 %v2329_v38, %v2281_v41 }
 0x21e   :  { %v2378_v44 = vpop.f32.mrf.mxu2  ;;  %v2439_v46 = vpop.f32.mrf.mxu0 }
 0x21f   :  { %v2427_v45 = vpop.f32.mrf.mxu3  ;;  %v2379_v54 = vadd.f32 %v2378_v44, %v2330_v30  ;;  %v2488_v47 = vpop.f32.mrf.mxu1  ;;  %v2440_v51 = vadd.f32 %v2439_v46, %v5195_v28 }
 0x221   :  { %v5407_v48 = vadd.f32 %v2427_v45, %v2379_v54  ;;  %v2489_v53 = vadd.f32 %v2488_v47, %v2440_v51 }
 0x226   :  { %v2537_v3 = vpop.f32.mrf.mxu2  ;;  %v2441_v12 = vpop.f32.mrf.mxu0 }
 0x227   :  { %v2586_v58 = vpop.f32.mrf.mxu3  ;;  %v2538_v50 = vadd.f32 %v2537_v3, %v2489_v53  ;;  %v2490_v59 = vpop.f32.mrf.mxu1  ;;  %v2442_v19 = vadd.f32 %v2441_v12, %v5222_v60 }
 0x229   :  { %v2587_v62 = vadd.f32 %v2586_v58, %v2538_v50  ;;  %v2491_v2 = vadd.f32 %v2490_v59, %v2442_v19 }
 0x22b   :  { %v2681_v43 = vadd.f32 %v5414_v27, %v2587_v62 }
 0x22d   :  { %v2713_v49 = vmul.f32 0.2, %v2681_v43  ;;  %vm2697_vm0 = vcmp.gt.f32.partialorder %v2681_v43, 0.0 }
 0x22e   :  { %v2539_v4 = vpop.f32.mrf.mxu2  ;;  %v2444_v7 = vpop.f32.mrf.mxu0 }
 0x22f   :  { %v2588_v55 = vpop.f32.mrf.mxu3  ;;  %v2540_v28 = vadd.f32 %v2539_v4, %v2491_v2  ;;  %v2493_v8 = vpop.f32.mrf.mxu1  ;;  %v2445_v56 = vadd.f32 %v2444_v7, %v5225_v33  ;;  %v2729_v15 = vsel %vm2697_vm0, %v2681_v43, %v2713_v49 }
 0x231   :  { %v2589_v0 = vadd.f32 %v2588_v55, %v2540_v28  ;;  %v2494_v10 = vadd.f32 %v2493_v8, %v2445_v56 }
 0x233   :  { %v2682_v60 = vadd.f32 %v5414_v27, %v2589_v0 }
 0x235   :  { %vm2698_vm1 = vcmp.gt.f32.partialorder %v2682_v60, 0.0  ;;  %v2714_v32 = vmul.f32 0.2, %v2682_v60 }
 0x236   :  { %v2542_v13 = vpop.f32.mrf.mxu2  ;;  %v2446_v21 = vpop.f32.mrf.mxu0 }
 0x237   :  { %v2591_v11 = vpop.f32.mrf.mxu3  ;;  %v2730_v16 = vsel %vm2698_vm1, %v2682_v60, %v2714_v32  ;;  %v2543_v20 = vadd.f32 %v2542_v13, %v2494_v10  ;;  %v2495_v22 = vpop.f32.mrf.mxu1  ;;  %v2447_v39 = vadd.f32 %v2446_v21, %v5252_v57 }
 0x238   :  { %v4064_v23 = vpack.c.bf16 %v2730_v16, %v2729_v15 }
 0x239   :  { %v2592_v33 = vadd.f32 %v2591_v11, %v2543_v20  ;;  %v2496_v25 = vadd.f32 %v2495_v22, %v2447_v39 }
 0x23a   :  { %4065 = vst [vmem:[%s5473_s3] sm:$0xff] %v4064_v23  }
 0x23b   :  { %v2683_v34 = vadd.f32 %v5414_v27, %v2592_v33 }
 0x23d   :  { %v2715_v18 = vmul.f32 0.2, %v2683_v34  ;;  %vm2699_vm2 = vcmp.gt.f32.partialorder %v2683_v34, 0.0 }
 0x23e   :  { %v2544_v29 = vpop.f32.mrf.mxu2  ;;  %v2449_v5 = vpop.f32.mrf.mxu0 }
 0x23f   :  { %v2593_v52 = vpop.f32.mrf.mxu3  ;;  %v2545_v35 = vadd.f32 %v2544_v29, %v2496_v25  ;;  %v2498_v61 = vpop.f32.mrf.mxu1  ;;  %v2450_v31 = vadd.f32 %v2449_v5, %v5255_v63  ;;  %v2731_v45 = vsel %vm2699_vm2, %v2683_v34, %v2715_v18 }
 0x241   :  { %v2594_v36 = vadd.f32 %v2593_v52, %v2545_v35  ;;  %v2499_v41 = vadd.f32 %v2498_v61, %v2450_v31 }
 0x243   :  { %v2684_v38 = vadd.f32 %v5414_v27, %v2594_v36 }
 0x245   :  { %vm2700_vm3 = vcmp.gt.f32.partialorder %v2684_v38, 0.0  ;;  %v2716_v57 = vmul.f32 0.2, %v2684_v38 }
 0x246   :  { %v2547_v30 = vpop.f32.mrf.mxu2  ;;  %v2451_v47 = vpop.f32.mrf.mxu0 }
 0x247   :  { %v2596_v44 = vpop.f32.mrf.mxu3  ;;  %v2732_v54 = vsel %vm2700_vm3, %v2684_v38, %v2716_v57  ;;  %v2548_v46 = vadd.f32 %v2547_v30, %v2499_v41  ;;  %v2500_v51 = vpop.f32.mrf.mxu1  ;;  %v2452_v3 = vadd.f32 %v2451_v47, %v5282_v24 }
 0x248   :  { %v4069_v53 = vpack.c.bf16 %v2732_v54, %v2731_v45 }
 0x249   :  { %v2597_v63 = vadd.f32 %v2596_v44, %v2548_v46  ;;  %v2501_v58 = vadd.f32 %v2500_v51, %v2452_v3 }
 0x24a   :  { %4101 = vst [vmem:[%s5473_s3 + $0x8] sm:$0xff] %v4069_v53  }
 0x24b   :  { %v2685_v59 = vadd.f32 %v5414_v27, %v2597_v63 }
 0x24d   :  { %v2717_v43 = vmul.f32 0.2, %v2685_v59  ;;  %vm2701_vm4 = vcmp.gt.f32.partialorder %v2685_v59, 0.0 }
 0x24e   :  { %v2549_v50 = vpop.f32.mrf.mxu2  ;;  %v2454_v62 = vpop.f32.mrf.mxu0 }
 0x24f   :  { %v2598_v12 = vpop.f32.mrf.mxu3  ;;  %v2550_v19 = vadd.f32 %v2549_v50, %v2501_v58  ;;  %v2503_v2 = vpop.f32.mrf.mxu1  ;;  %v2455_v55 = vadd.f32 %v2454_v62, %v5285_v17  ;;  %v2733_v56 = vsel %vm2701_vm4, %v2685_v59, %v2717_v43 }
 0x251   :  { %v2599_v4 = vadd.f32 %v2598_v12, %v2550_v19  ;;  %v2504_v7 = vadd.f32 %v2503_v2, %v2455_v55 }
 0x253   :  { %v2686_v28 = vadd.f32 %v5414_v27, %v2599_v4 }
 0x255   :  { %vm2702_vm5 = vcmp.gt.f32.partialorder %v2686_v28, 0.0  ;;  %v2718_v24 = vmul.f32 0.2, %v2686_v28 }
 0x256   :  { %v2552_v8 = vpop.f32.mrf.mxu2  ;;  %v2456_v32 = vpop.f32.mrf.mxu0 }
 0x257   :  { %v2601_v0 = vpop.f32.mrf.mxu3  ;;  %v2734_v49 = vsel %vm2702_vm5, %v2686_v28, %v2718_v24  ;;  %v2553_v60 = vadd.f32 %v2552_v8, %v2504_v7  ;;  %v2505_v10 = vpop.f32.mrf.mxu1  ;;  %v2457_v11 = vadd.f32 %v2456_v32, %v5312_v26 }
 0x258   :  { %v4074_v13 = vpack.c.bf16 %v2734_v49, %v2733_v56 }
 0x259   :  { %v2602_v17 = vadd.f32 %v2601_v0, %v2553_v60  ;;  %v2506_v15 = vadd.f32 %v2505_v10, %v2457_v11 }
 0x25a   :  { %4102 = vst [vmem:[%s5473_s3 + $0x10] sm:$0xff] %v4074_v13  }
 0x25b   :  { %v2687_v21 = vadd.f32 %v5414_v27, %v2602_v17 }
 0x25d   :  { %v2719_v29 = vmul.f32 0.2, %v2687_v21  ;;  %vm2703_vm6 = vcmp.gt.f32.partialorder %v2687_v21, 0.0 }
 0x25e   :  { %v2554_v16 = vpop.f32.mrf.mxu2  ;;  %v2459_v23 = vpop.f32.mrf.mxu0 }
 0x25f   :  { %v2603_v20 = vpop.f32.mrf.mxu3  ;;  %v2555_v22 = vadd.f32 %v2554_v16, %v2506_v15  ;;  %v2508_v39 = vpop.f32.mrf.mxu1  ;;  %v2460_v25 = vadd.f32 %v2459_v23, %v5315_v6  ;;  %v2735_v61 = vsel %vm2703_vm6, %v2687_v21, %v2719_v29 }
 0x261   :  { %v2604_v33 = vadd.f32 %v2603_v20, %v2555_v22  ;;  %v2509_v34 = vadd.f32 %v2508_v39, %v2460_v25 }
 0x263   :  { %v2688_v52 = vadd.f32 %v5414_v27, %v2604_v33 }
 0x265   :  { %vm2704_vm7 = vcmp.gt.f32.partialorder %v2688_v52, 0.0  ;;  %v2720_v26 = vmul.f32 0.2, %v2688_v52 }
 0x266   :  { %v2557_v35 = vpop.f32.mrf.mxu2  ;;  %v2461_v18 = vpop.f32.mrf.mxu0 }
 0x267   :  { %v2606_v5 = vpop.f32.mrf.mxu3  ;;  %v2736_v36 = vsel %vm2704_vm7, %v2688_v52, %v2720_v26  ;;  %v2558_v31 = vadd.f32 %v2557_v35, %v2509_v34  ;;  %v2510_v38 = vpop.f32.mrf.mxu1  ;;  %v2462_v41 = vadd.f32 %v2461_v18, %v5342_v1 }
 0x268   :  { %v4079_v57 = vpack.c.bf16 %v2736_v36, %v2735_v61 }
 0x269   :  { %v2607_v6 = vadd.f32 %v2606_v5, %v2558_v31  ;;  %v2511_v30 = vadd.f32 %v2510_v38, %v2462_v41 }
 0x26a   :  { %4103 = vst [vmem:[%s5473_s3 + $0x18] sm:$0xff] %v4079_v57  }
 0x26b   :  { %v2689_v54 = vadd.f32 %v5414_v27, %v2607_v6 }
 0x26d   :  { %v2721_v63 = vmul.f32 0.2, %v2689_v54  ;;  %vm2705_vm8 = vcmp.gt.f32.partialorder %v2689_v54, 0.0 }
 0x26e   :  { %v2559_v44 = vpop.f32.mrf.mxu2  ;;  %v2464_v47 = vpop.f32.mrf.mxu0 }
 0x26f   :  { %v2608_v45 = vpop.f32.mrf.mxu3  ;;  %v2560_v46 = vadd.f32 %v2559_v44, %v2511_v30  ;;  %v2513_v51 = vpop.f32.mrf.mxu1  ;;  %v2465_v3 = vadd.f32 %v2464_v47, %v5345_v37  ;;  %v2737_v19 = vsel %vm2705_vm8, %v2689_v54, %v2721_v63 }
 0x271   :  { %v2609_v53 = vadd.f32 %v2608_v45, %v2560_v46  ;;  %v2514_v50 = vadd.f32 %v2513_v51, %v2465_v3 }
 0x273   :  { %v2690_v58 = vadd.f32 %v5414_v27, %v2609_v53 }
 0x275   :  { %vm2706_vm9 = vcmp.gt.f32.partialorder %v2690_v58, 0.0  ;;  %v2722_v1 = vmul.f32 0.2, %v2690_v58 }
 0x276   :  { %v2562_v12 = vpop.f32.mrf.mxu2  ;;  %v2466_v4 = vpop.f32.mrf.mxu0 }
 0x277   :  { %v2611_v59 = vpop.f32.mrf.mxu3  ;;  %v2738_v62 = vsel %vm2706_vm9, %v2690_v58, %v2722_v1  ;;  %v2563_v2 = vadd.f32 %v2562_v12, %v2514_v50  ;;  %v2515_v55 = vpop.f32.mrf.mxu1  ;;  %v2467_v28 = vadd.f32 %v2466_v4, %v5372_v40 }
 0x278   :  { %v4084_v43 = vpack.c.bf16 %v2738_v62, %v2737_v19 }
 0x279   :  { %v2612_v37 = vadd.f32 %v2611_v59, %v2563_v2  ;;  %v2516_v24 = vadd.f32 %v2515_v55, %v2467_v28 }
 0x27a   :  { %4104 = vst [vmem:[%s5473_s3 + $0x20] sm:$0xff] %v4084_v43  }
 0x27b   :  { %v2691_v0 = vadd.f32 %v5414_v27, %v2612_v37 }
 0x27d   :  { %v2723_v13 = vmul.f32 0.2, %v2691_v0  ;;  %vm2707_vm10 = vcmp.gt.f32.partialorder %v2691_v0, 0.0 }
 0x27e   :  { %v2564_v7 = vpop.f32.mrf.mxu2  ;;  %v2469_v49 = vpop.f32.mrf.mxu0 }
 0x27f   :  { %v2613_v8 = vpop.f32.mrf.mxu3  ;;  %v2565_v56 = vadd.f32 %v2564_v7, %v2516_v24  ;;  %v2518_v60 = vpop.f32.mrf.mxu1  ;;  %v2470_v10 = vadd.f32 %v2469_v49, %v5375_v9  ;;  %v2739_v20 = vsel %vm2707_vm10, %v2691_v0, %v2723_v13 }
 0x281   :  { %v2614_v32 = vadd.f32 %v2613_v8, %v2565_v56  ;;  %v2519_v17 = vadd.f32 %v2518_v60, %v2470_v10 }
 0x283   :  { %v2692_v11 = vadd.f32 %v5414_v27, %v2614_v32 }
 0x285   :  { %vm2708_vm11 = vcmp.gt.f32.partialorder %v2692_v11, 0.0  ;;  %v2724_v40 = vmul.f32 0.2, %v2692_v11 }
 0x286   :  { %v2567_v15 = vpop.f32.mrf.mxu2  ;;  %v2471_v23 = vpop.f32.mrf.mxu0 }
 0x287   :  { %v2616_v16 = vpop.f32.mrf.mxu3  ;;  %v2740_v21 = vsel %vm2708_vm11, %v2692_v11, %v2724_v40  ;;  %v2568_v22 = vadd.f32 %v2567_v15, %v2519_v17  ;;  %v2520_v33 = vpop.f32.mrf.mxu1  ;;  %v2472_v25 = vadd.f32 %v2471_v23, %v5402_v14 }
 0x288   :  { %v4089_v39 = vpack.c.bf16 %v2740_v21, %v2739_v20 }
 0x289   :  { %v2617_v9 = vadd.f32 %v2616_v16, %v2568_v22  ;;  %v2521_v29 = vadd.f32 %v2520_v33, %v2472_v25 }
 0x28a   :  { %4105 = vst [vmem:[%s5473_s3 + $0x28] sm:$0xff] %v4089_v39  }
 0x28b   :  { %v2693_v34 = vadd.f32 %v5414_v27, %v2617_v9 }
 0x28d   :  { %v2725_v18 = vmul.f32 0.2, %v2693_v34  ;;  %vm2709_vm12 = vcmp.gt.f32.partialorder %v2693_v34, 0.0 }
 0x28e   :  { %v2569_v52 = vpop.f32.mrf.mxu2  ;;  %v2474_v5 = vpop.f32.mrf.mxu0 }
 0x28f   :  { %v2618_v26 = vpop.f32.mrf.mxu3  ;;  %v2570_v35 = vadd.f32 %v2569_v52, %v2521_v29  ;;  %v2475_v36 = vadd.f32 %v2474_v5, %v5405_v42  ;;  %v2523_v31 = vpop.f32.mrf.mxu1  ;;  %v2741_v30 = vsel %vm2709_vm12, %v2693_v34, %v2725_v18 }
 0x291   :  { %v2619_v61 = vadd.f32 %v2618_v26, %v2570_v35  ;;  %v2524_v57 = vadd.f32 %v2523_v31, %v2475_v36 }
 0x293   :  { %v2694_v38 = vadd.f32 %v5414_v27, %v2619_v61 }
 0x295   :  { %vm2710_vm13 = vcmp.gt.f32.partialorder %v2694_v38, 0.0  ;;  %v2726_v14 = vmul.f32 0.2, %v2694_v38 }
 0x296   :  { %v2572_v41 = vpop.f32.mrf.mxu2  ;;  %v2476_v54 = vpop.f32.mrf.mxu0 }
 0x297   :  { %v2621_v6 = vpop.f32.mrf.mxu3  ;;  %v2742_v44 = vsel %vm2710_vm13, %v2694_v38, %v2726_v14  ;;  %v2573_v45 = vadd.f32 %v2572_v41, %v2524_v57  ;;  %v2477_v47 = vadd.f32 %v2476_v54, %v5407_v48  ;;  %v2525_v51 = vpop.f32.mrf.mxu1 }
 0x298   :  { %v4094_v46 = vpack.c.bf16 %v2742_v44, %v2741_v30 }
 0x299   :  { %v2622_v42 = vadd.f32 %v2621_v6, %v2573_v45  ;;  %v2526_v53 = vadd.f32 %v2525_v51, %v2477_v47 }
 0x29a   :  { %4106 = vst [vmem:[%s5473_s3 + $0x30] sm:$0xff] %v4094_v46  }
 0x29b   :  { %v2695_v63 = vadd.f32 %v5414_v27, %v2622_v42 }
 0x29d   :  { %v2727_v12 = vmul.f32 0.2, %v2695_v63  ;;  %vm2711_vm14 = vcmp.gt.f32.partialorder %v2695_v63, 0.0 }
 0x29e   :  { %v2574_v3 = vpop.f32.mrf.mxu2 }
 0x29f   :  { %v2575_v58 = vadd.f32 %v2574_v3, %v2526_v53  ;;  %v2623_v1 = vpop.f32.mrf.mxu3  ;;  %v2743_v48 = vsel %vm2711_vm14, %v2695_v63, %v2727_v12 }
 0x2a1   :  { %v2624_v50 = vadd.f32 %v2623_v1, %v2575_v58 }
 0x2a3   :  { %v2696_v59 = vadd.f32 %v5414_v27, %v2624_v50 }
 0x2a5   :  { %vm2712_vm15 = vcmp.gt.f32.partialorder %v2696_v59, 0.0  ;;  %v2728_v19 = vmul.f32 0.2, %v2696_v59 }
 0x2a7   :  { %v2744_v62 = vsel %vm2712_vm15, %v2696_v59, %v2728_v19 }
 0x2a8   :  { %v4099_v2 = vpack.c.bf16 %v2744_v62, %v2743_v48 }
 0x2aa   :  { %4107 = vst [vmem:[%s5473_s3 + $0x38] sm:$0xff] %v4099_v2  }

// kernel: discriminator_forward.6
= control target key start
LH: loop header
LB: loop body
LE: loop exit
PB: predicated region body
PF: predicated region fallthrough
CT: control target
= control target key end

     0   :  { %s3010_s1 = inlined_call_operand.vmem [shape: bf16[2048,128], index: 1, kind: input, shape index: {}]   ;;  %s3011_s0 = inlined_call_operand.vmem [shape: bf16[32,2048], index: 0, kind: input, shape index: {}]   ;;  %s3012_s2 = inlined_call_operand.vmem [shape: f32[1,128], index: 2, kind: input, shape index: {}]   ;;  %s3013_s3 = inlined_call_operand.vmem [shape: bf16[32,128], index: 3, kind: output, shape index: {}]  }
   0x1   :  { %v2272_v0 = vld [vmem:[%s3010_s1 + $0x38] sm:$0xff]  ;;  %v2271_v4 = vld [vmem:[%s3010_s1 + $0x30] sm:$0xff]  ;;  %v2270_v8 = vld [vmem:[%s3010_s1 + $0x28] sm:$0xff] }
   0x2   :  { %v2280_v1 = vld [vmem:[%s3010_s1 + $0x78] sm:$0xff]  ;;  %1242 = vmatpush.bf16.msra.mxu0 %v2272_v0  ;;  %v2279_v5 = vld [vmem:[%s3010_s1 + $0x70] sm:$0xff]  ;;  %v2278_v9 = vld [vmem:[%s3010_s1 + $0x68] sm:$0xff] }
   0x3   :  { %v2288_v2 = vld [vmem:[%s3010_s1 + $0xb8] sm:$0xff]  ;;  %1261 = vmatpush.bf16.msra.mxu1 %v2280_v1  ;;  %v2287_v6 = vld [vmem:[%s3010_s1 + $0xb0] sm:$0xff]  ;;  %v2286_v10 = vld [vmem:[%s3010_s1 + $0xa8] sm:$0xff] }
   0x4   :  { %v2296_v3 = vld [vmem:[%s3010_s1 + $0xf8] sm:$0xff]  ;;  %1280 = vmatpush.bf16.msra.mxu2 %v2288_v2  ;;  %v2295_v7 = vld [vmem:[%s3010_s1 + $0xf0] sm:$0xff]  ;;  %v2294_v11 = vld [vmem:[%s3010_s1 + $0xe8] sm:$0xff] }
   0x5   :  { %1299 = vmatpush.bf16.msra.mxu3 %v2296_v3  ;;  %v2269_v12 = vld [vmem:[%s3010_s1 + $0x20] sm:$0xff]  ;;  %v2268_v16 = vld [vmem:[%s3010_s1 + $0x18] sm:$0xff]  ;;  %v2267_v20 = vld [vmem:[%s3010_s1 + $0x10] sm:$0xff] }
   0x6   :  { %1243 = vmatpush.bf16.msra.mxu0 %v2271_v4  ;;  %v2277_v13 = vld [vmem:[%s3010_s1 + $0x60] sm:$0xff]  ;;  %v2276_v17 = vld [vmem:[%s3010_s1 + $0x58] sm:$0xff]  ;;  %v2275_v21 = vld [vmem:[%s3010_s1 + $0x50] sm:$0xff] }
   0x7   :  { %1262 = vmatpush.bf16.msra.mxu1 %v2279_v5  ;;  %v2285_v14 = vld [vmem:[%s3010_s1 + $0xa0] sm:$0xff]  ;;  %v2284_v18 = vld [vmem:[%s3010_s1 + $0x98] sm:$0xff]  ;;  %v2283_v22 = vld [vmem:[%s3010_s1 + $0x90] sm:$0xff] }
   0x8   :  { %1281 = vmatpush.bf16.msra.mxu2 %v2287_v6  ;;  %v2293_v15 = vld [vmem:[%s3010_s1 + $0xe0] sm:$0xff]  ;;  %v2292_v19 = vld [vmem:[%s3010_s1 + $0xd8] sm:$0xff]  ;;  %v2291_v23 = vld [vmem:[%s3010_s1 + $0xd0] sm:$0xff] }
   0x9   :  { %1300 = vmatpush.bf16.msra.mxu3 %v2295_v7  ;;  %v2266_v24 = vld [vmem:[%s3010_s1 + $0x8] sm:$0xff]  ;;  %v2265_v28 = vld [vmem:[%s3010_s1] sm:$0xff]  ;;  %v2320_v40 = vld [vmem:[%s3010_s1 + $0x1b8] sm:$0xff] }
   0xa   :  { %1244 = vmatpush.bf16.msra.mxu0 %v2270_v8  ;;  %v2274_v25 = vld [vmem:[%s3010_s1 + $0x48] sm:$0xff]  ;;  %v2273_v29 = vld [vmem:[%s3010_s1 + $0x40] sm:$0xff]  ;;  %v2304_v41 = vld [vmem:[%s3010_s1 + $0x138] sm:$0xff] }
   0xb   :  { %1263 = vmatpush.bf16.msra.mxu1 %v2278_v9  ;;  %v2282_v26 = vld [vmem:[%s3010_s1 + $0x88] sm:$0xff]  ;;  %v2281_v30 = vld [vmem:[%s3010_s1 + $0x80] sm:$0xff]  ;;  %v2312_v46 = vld [vmem:[%s3010_s1 + $0x178] sm:$0xff] }
   0xc   :  { %1282 = vmatpush.bf16.msra.mxu2 %v2286_v10  ;;  %v2290_v27 = vld [vmem:[%s3010_s1 + $0xc8] sm:$0xff]  ;;  %v2289_v31 = vld [vmem:[%s3010_s1 + $0xc0] sm:$0xff]  ;;  %v2328_v47 = vld [vmem:[%s3010_s1 + $0x1f8] sm:$0xff] }
   0xd   :  { %1301 = vmatpush.bf16.msra.mxu3 %v2294_v11  ;;  %v1595_v32 = vld [vmem:[%s3011_s0] sm:$0xf]  ;;  %v2233_v34 = vld [vmem:[%s3011_s0 + $0x4] sm:$0xf]  ;;  %v1603_v36 = vld [vmem:[%s3011_s0 + $0x8] sm:$0xf] }
   0xe   :  { %1245 = vmatpush.bf16.msra.mxu0 %v2269_v12  ;;  %v2241_v33 = vld [vmem:[%s3011_s0 + $0x3c] sm:$0xf0]  ;;  %v1597_v35 = vld [vmem:[%s3011_s0 + $0x40] sm:$0xf0]  ;;  %v2242_v37 = vld [vmem:[%s3011_s0 + $0x44] sm:$0xf0] }
   0xf   :  { %1264 = vmatpush.bf16.msra.mxu1 %v2277_v13  ;;  %v2234_v38 = vld [vmem:[%s3011_s0 + $0xc] sm:$0xf]  ;;  %v1596_v42 = vor.u32 %v2241_v33, %v1595_v32  ;;  %v1600_v43 = vor.u32 %v2233_v34, %v1597_v35  ;;  %v1604_v44 = vor.u32 %v2242_v37, %v1603_v36  ;;  %v2319_v48 = vld [vmem:[%s3010_s1 + $0x1b0] sm:$0xff]  ;;  %v2317_v56 = vld [vmem:[%s3010_s1 + $0x1a0] sm:$0xff] }
  0x10   :  { %1283 = vmatpush.bf16.msra.mxu2 %v2285_v14  ;;  %v1605_v39 = vld [vmem:[%s3011_s0 + $0x48] sm:$0xf0]  ;;  %v2303_v49 = vld [vmem:[%s3010_s1 + $0x130] sm:$0xff]  ;;  %v2301_v57 = vld [vmem:[%s3010_s1 + $0x120] sm:$0xff] }
  0x11   :  { %1302 = vmatpush.bf16.msra.mxu3 %v2293_v15  ;;  %v1608_v45 = vor.u32 %v2234_v38, %v1605_v39  ;;  %v2311_v50 = vld [vmem:[%s3010_s1 + $0x170] sm:$0xff]  ;;  %v2318_v52 = vld [vmem:[%s3010_s1 + $0x1a8] sm:$0xff]  ;;  %v2309_v58 = vld [vmem:[%s3010_s1 + $0x160] sm:$0xff] }
  0x12   :  { %1246 = vmatpush.bf16.msra.mxu0 %v2268_v16  ;;  %v2327_v51 = vld [vmem:[%s3010_s1 + $0x1f0] sm:$0xff]  ;;  %v2302_v53 = vld [vmem:[%s3010_s1 + $0x128] sm:$0xff]  ;;  %v2325_v59 = vld [vmem:[%s3010_s1 + $0x1e0] sm:$0xff] }
  0x13   :  { %1265 = vmatpush.bf16.msra.mxu1 %v2276_v17  ;;  %v2310_v54 = vld [vmem:[%s3010_s1 + $0x168] sm:$0xff]  ;;  %v1659_v60 = vld [vmem:[%s3011_s0 + $0x80] sm:$0xf]  ;;  %v2249_v62 = vld [vmem:[%s3011_s0 + $0x84] sm:$0xf] }
  0x14   :  { %1284 = vmatpush.bf16.msra.mxu2 %v2284_v18  ;;  %v2326_v55 = vld [vmem:[%s3010_s1 + $0x1e8] sm:$0xff]  ;;  %v2257_v61 = vld [vmem:[%s3011_s0 + $0xbc] sm:$0xf0]  ;;  %v1661_v63 = vld [vmem:[%s3011_s0 + $0xc0] sm:$0xf0] }
  0x15   :  { %1303 = vmatpush.bf16.msra.mxu3 %v2292_v19  ;;  %v1667_v0 = vld [vmem:[%s3011_s0 + $0x88] sm:$0xf]  ;;  %v2250_v2 = vld [vmem:[%s3011_s0 + $0x8c] sm:$0xf]  ;;  %v2316_v4 = vld [vmem:[%s3010_s1 + $0x198] sm:$0xff]  ;;  %v1660_v6 = vor.u32 %v2257_v61, %v1659_v60  ;;  %v1664_v7 = vor.u32 %v2249_v62, %v1661_v63 }
  0x16   :  { %1247 = vmatpush.bf16.msra.mxu0 %v2267_v20  ;;  %v2258_v1 = vld [vmem:[%s3011_s0 + $0xc4] sm:$0xf0]  ;;  %v1669_v3 = vld [vmem:[%s3011_s0 + $0xc8] sm:$0xf0]  ;;  %v2300_v5 = vld [vmem:[%s3010_s1 + $0x118] sm:$0xff] }
  0x17   :  { %1266 = vmatpush.bf16.msra.mxu1 %v2275_v21  ;;  %v1668_v8 = vor.u32 %v2258_v1, %v1667_v0  ;;  %v1672_v9 = vor.u32 %v2250_v2, %v1669_v3  ;;  %v2308_v10 = vld [vmem:[%s3010_s1 + $0x158] sm:$0xff]  ;;  %v2315_v12 = vld [vmem:[%s3010_s1 + $0x190] sm:$0xff]  ;;  %v2314_v16 = vld [vmem:[%s3010_s1 + $0x188] sm:$0xff] }
  0x18   :  { %1285 = vmatpush.bf16.msra.mxu2 %v2283_v22  ;;  %v2324_v11 = vld [vmem:[%s3010_s1 + $0x1d8] sm:$0xff]  ;;  %v2299_v13 = vld [vmem:[%s3010_s1 + $0x110] sm:$0xff]  ;;  %v2298_v17 = vld [vmem:[%s3010_s1 + $0x108] sm:$0xff] }
  0x19   :  { %1304 = vmatpush.bf16.msra.mxu3 %v2291_v23  ;;  %v2307_v14 = vld [vmem:[%s3010_s1 + $0x150] sm:$0xff]  ;;  %v2306_v18 = vld [vmem:[%s3010_s1 + $0x148] sm:$0xff]  ;;  %v2313_v20 = vld [vmem:[%s3010_s1 + $0x180] sm:$0xff] }
  0x1a   :  { %1248 = vmatpush.bf16.msra.mxu0 %v2266_v24  ;;  %v2323_v15 = vld [vmem:[%s3010_s1 + $0x1d0] sm:$0xff]  ;;  %v2322_v19 = vld [vmem:[%s3010_s1 + $0x1c8] sm:$0xff]  ;;  %v2297_v21 = vld [vmem:[%s3010_s1 + $0x100] sm:$0xff] }
  0x1b   :  { %1267 = vmatpush.bf16.msra.mxu1 %v2274_v25  ;;  %v2305_v22 = vld [vmem:[%s3010_s1 + $0x140] sm:$0xff]  ;;  %v1611_v24 = vld [vmem:[%s3011_s0 + $0x10] sm:$0xf]  ;;  %v2352_v25 = vld [vmem:[%s3010_s1 + $0x2b8] sm:$0xff] }
  0x1c   :  { %1286 = vmatpush.bf16.msra.mxu2 %v2282_v26  ;;  %v2321_v23 = vld [vmem:[%s3010_s1 + $0x1c0] sm:$0xff]  ;;  %v2336_v26 = vld [vmem:[%s3010_s1 + $0x238] sm:$0xff]  ;;  %v2351_v37 = vld [vmem:[%s3010_s1 + $0x2b0] sm:$0xff] }
  0x1d   :  { %1305 = vmatpush.bf16.msra.mxu3 %v2290_v27  ;;  %v2243_v27 = vld [vmem:[%s3011_s0 + $0x4c] sm:$0xf0]  ;;  %v2236_v32 = vld [vmem:[%s3011_s0 + $0x1c] sm:$0xf] }
  0x1e   :  { %1249 = vmatpush.bf16.msra.mxu0 %v2265_v28  ;;  %v2235_v28 = vld [vmem:[%s3011_s0 + $0x14] sm:$0xf]  ;;  %v1621_v33 = vld [vmem:[%s3011_s0 + $0x58] sm:$0xf0]  ;;  %v1612_v36 = vor.u32 %v2243_v27, %v1611_v24  ;;  %v1629_v24 = vld [vmem:[%s3011_s0 + $0x60] sm:$0xf0] }
  0x1f   :  { %1268 = vmatpush.bf16.msra.mxu1 %v2273_v29  ;;  %v1613_v29 = vld [vmem:[%s3011_s0 + $0x50] sm:$0xf0]  ;;  %v2344_v34 = vld [vmem:[%s3010_s1 + $0x278] sm:$0xff]  ;;  %v2238_v27 = vld [vmem:[%s3011_s0 + $0x2c] sm:$0xf] }
  0x20   :  { %1287 = vmatpush.bf16.msra.mxu2 %v2281_v30  ;;  %v1619_v30 = vld [vmem:[%s3011_s0 + $0x18] sm:$0xf]  ;;  %v1616_v38 = vor.u32 %v2235_v28, %v1613_v29  ;;  %v1685_v61 = vld [vmem:[%s3011_s0 + $0xd8] sm:$0xf0]  ;;  %v2347_v1 = vld [vmem:[%s3010_s1 + $0x290] sm:$0xff] }
  0x21   :  { %1306 = vmatpush.bf16.msra.mxu3 %v2289_v31  ;;  %1250 = vmatmul.bf16.vlgmr.msra.gmra.mxu0 %v1596_v42  ;;  %v2244_v31 = vld [vmem:[%s3011_s0 + $0x54] sm:$0xf0]  ;;  %v2343_v42 = vld [vmem:[%s3010_s1 + $0x270] sm:$0xff]  ;;  %v1637_v28 = vld [vmem:[%s3011_s0 + $0x68] sm:$0xf0] }
  0x22   :  { %1318 = vmatpush.bf16.msrb.mxu0 %v2304_v41  ;;  %1269 = vmatmul.bf16.vlgmr.msra.gmra.mxu1 %v1600_v43  ;;  %v2360_v35 = vld [vmem:[%s3010_s1 + $0x2f8] sm:$0xff]  ;;  %v1620_v39 = vor.u32 %v2244_v31, %v1619_v30  ;;  %v2335_v41 = vld [vmem:[%s3010_s1 + $0x230] sm:$0xff] }
  0x23   :  { %1288 = vmatmul.bf16.vlgmr.msra.gmra.mxu2 %v1604_v44  ;;  %1337 = vmatpush.bf16.msrb.mxu1 %v2312_v46  ;;  %v2359_v43 = vld [vmem:[%s3010_s1 + $0x2f0] sm:$0xff]  ;;  %v2350_v44 = vld [vmem:[%s3010_s1 + $0x2a8] sm:$0xff]  ;;  %v2332_v60 = vld [vmem:[%s3010_s1 + $0x218] sm:$0xff] }
  0x24   :  { %1356 = vmatpush.bf16.msrb.mxu2 %v2320_v40  ;;  %1307 = vmatmul.bf16.vlgmr.msra.gmra.mxu3 %v1608_v45  ;;  %v1624_v40 = vor.u32 %v2236_v32, %v1621_v33  ;;  %v2334_v45 = vld [vmem:[%s3010_s1 + $0x228] sm:$0xff]  ;;  %v2340_v62 = vld [vmem:[%s3010_s1 + $0x258] sm:$0xff]  ;;  %v2375_v30 = vld [vmem:[%s3010_s1 + $0x370] sm:$0xff]  ;;  %v1640_v33 = vor.u32 %v2238_v27, %v1637_v28 }
  0x25   :  { %1375 = vmatpush.bf16.msrb.mxu3 %v2328_v47  ;;  %v2342_v46 = vld [vmem:[%s3010_s1 + $0x268] sm:$0xff]  ;;  %v2356_v63 = vld [vmem:[%s3010_s1 + $0x2d8] sm:$0xff] }
  0x26   :  { %1319 = vmatpush.bf16.msrb.mxu0 %v2303_v49  ;;  %v2358_v47 = vld [vmem:[%s3010_s1 + $0x2e8] sm:$0xff]  ;;  %v2333_v49 = vld [vmem:[%s3010_s1 + $0x220] sm:$0xff]  ;;  %v1717_v27 = vld [vmem:[%s3011_s0 + $0xf8] sm:$0xf0] }
  0x27   :  { %1338 = vmatpush.bf16.msrb.mxu1 %v2311_v50  ;;  %v2341_v50 = vld [vmem:[%s3010_s1 + $0x260] sm:$0xff] }
  0x28   :  { %1357 = vmatpush.bf16.msrb.mxu2 %v2319_v48  ;;  %v2349_v48 = vld [vmem:[%s3010_s1 + $0x2a0] sm:$0xff] }
  0x29   :  { %1376 = vmatpush.bf16.msrb.mxu3 %v2327_v51  ;;  %v2357_v51 = vld [vmem:[%s3010_s1 + $0x2e0] sm:$0xff] }
  0x2a   :  { %1320 = vmatpush.bf16.msrb.mxu0 %v2302_v53  ;;  %v2259_v53 = vld [vmem:[%s3011_s0 + $0xcc] sm:$0xf0] }
  0x2b   :  { %1339 = vmatpush.bf16.msrb.mxu1 %v2310_v54  ;;  %v2348_v54 = vld [vmem:[%s3010_s1 + $0x298] sm:$0xff] }
  0x2c   :  { %1358 = vmatpush.bf16.msrb.mxu2 %v2318_v52  ;;  %v1675_v52 = vld [vmem:[%s3011_s0 + $0x90] sm:$0xf] }
  0x2d   :  { %1377 = vmatpush.bf16.msrb.mxu3 %v2326_v55  ;;  %v2251_v55 = vld [vmem:[%s3011_s0 + $0x94] sm:$0xf]  ;;  %v1676_v0 = vor.u32 %v2259_v53, %v1675_v52  ;;  %v2254_v52 = vld [vmem:[%s3011_s0 + $0xac] sm:$0xf]  ;;  %v2364_v53 = vld [vmem:[%s3010_s1 + $0x318] sm:$0xff] }
  0x2e   :  { %1321 = vmatpush.bf16.msrb.mxu0 %v2301_v57  ;;  %v1683_v57 = vld [vmem:[%s3011_s0 + $0x98] sm:$0xf] }
  0x2f   :  { %1340 = vmatpush.bf16.msrb.mxu1 %v2309_v58  ;;  %v2260_v58 = vld [vmem:[%s3011_s0 + $0xd4] sm:$0xf0] }
  0x30   :  { %1359 = vmatpush.bf16.msrb.mxu2 %v2317_v56  ;;  %v1677_v56 = vld [vmem:[%s3011_s0 + $0xd0] sm:$0xf0]  ;;  %v1684_v3 = vor.u32 %v2260_v58, %v1683_v57 }
  0x31   :  { %1378 = vmatpush.bf16.msrb.mxu3 %v2325_v59  ;;  %1255 = vmatmul.bf16.gmra.mxu0 %v1660_v6  ;;  %v2252_v59 = vld [vmem:[%s3011_s0 + $0x9c] sm:$0xf]  ;;  %v1680_v2 = vor.u32 %v2251_v55, %v1677_v56  ;;  %v2339_v6 = vld [vmem:[%s3010_s1 + $0x250] sm:$0xff] }
  0x32   :  { %1322 = vmatpush.bf16.msrb.mxu0 %v2300_v5  ;;  %1274 = vmatmul.bf16.gmra.mxu1 %v1664_v7  ;;  %v2331_v5 = vld [vmem:[%s3010_s1 + $0x210] sm:$0xff]  ;;  %v2388_v55 = vld [vmem:[%s3010_s1 + $0x3d8] sm:$0xff] }
  0x33   :  { %1293 = vmatmul.bf16.gmra.mxu2 %v1668_v8  ;;  %1341 = vmatpush.bf16.msrb.mxu1 %v2308_v10  ;;  %v2355_v7 = vld [vmem:[%s3010_s1 + $0x2d0] sm:$0xff]  ;;  %v2346_v8 = vld [vmem:[%s3010_s1 + $0x288] sm:$0xff] }
  0x34   :  { %1360 = vmatpush.bf16.msrb.mxu2 %v2316_v4  ;;  %1312 = vmatmul.bf16.gmra.mxu3 %v1672_v9  ;;  %v1688_v4 = vor.u32 %v2252_v59, %v1685_v61  ;;  %v2330_v9 = vld [vmem:[%s3010_s1 + $0x208] sm:$0xff]  ;;  %v2379_v56 = vld [vmem:[%s3010_s1 + $0x390] sm:$0xff] }
  0x35   :  { %1379 = vmatpush.bf16.msrb.mxu3 %v2324_v11  ;;  %v2338_v10 = vld [vmem:[%s3010_s1 + $0x248] sm:$0xff]  ;;  %v2371_v58 = vld [vmem:[%s3010_s1 + $0x350] sm:$0xff] }
  0x36   :  { %1323 = vmatpush.bf16.msrb.mxu0 %v2299_v13  ;;  %v2354_v11 = vld [vmem:[%s3010_s1 + $0x2c8] sm:$0xff]  ;;  %v2384_v13 = vld [vmem:[%s3010_s1 + $0x3b8] sm:$0xff] }
  0x37   :  { %1342 = vmatpush.bf16.msrb.mxu1 %v2307_v14  ;;  %v2329_v14 = vld [vmem:[%s3010_s1 + $0x200] sm:$0xff] }
  0x38   :  { %1361 = vmatpush.bf16.msrb.mxu2 %v2315_v12  ;;  %v2345_v12 = vld [vmem:[%s3010_s1 + $0x280] sm:$0xff] }
  0x39   :  { %1380 = vmatpush.bf16.msrb.mxu3 %v2323_v15  ;;  %v2337_v15 = vld [vmem:[%s3010_s1 + $0x240] sm:$0xff] }
  0x3a   :  { %1324 = vmatpush.bf16.msrb.mxu0 %v2298_v17  ;;  %v1627_v17 = vld [vmem:[%s3011_s0 + $0x20] sm:$0xf] }
  0x3b   :  { %1343 = vmatpush.bf16.msrb.mxu1 %v2306_v18  ;;  %v2245_v18 = vld [vmem:[%s3011_s0 + $0x5c] sm:$0xf0] }
  0x3c   :  { %1362 = vmatpush.bf16.msrb.mxu2 %v2314_v16  ;;  %v2353_v16 = vld [vmem:[%s3010_s1 + $0x2c0] sm:$0xff]  ;;  %v1628_v29 = vor.u32 %v2245_v18, %v1627_v17 }
  0x3d   :  { %1381 = vmatpush.bf16.msrb.mxu3 %v2322_v19  ;;  %v2368_v19 = vld [vmem:[%s3010_s1 + $0x338] sm:$0xff] }
  0x3e   :  { %1325 = vmatpush.bf16.msrb.mxu0 %v2297_v21  ;;  %v2237_v21 = vld [vmem:[%s3011_s0 + $0x24] sm:$0xf] }
  0x3f   :  { %1344 = vmatpush.bf16.msrb.mxu1 %v2305_v22  ;;  %v2392_v22 = vld [vmem:[%s3010_s1 + $0x3f8] sm:$0xff]  ;;  %v1632_v31 = vor.u32 %v2237_v21, %v1629_v24  ;;  %v2263_v21 = vld [vmem:[%s3011_s0 + $0xec] sm:$0xf0] }
  0x40   :  { %1363 = vmatpush.bf16.msrb.mxu2 %v2313_v20  ;;  %v2376_v20 = vld [vmem:[%s3010_s1 + $0x378] sm:$0xff] }
  0x41   :  { %1382 = vmatpush.bf16.msrb.mxu3 %v2321_v23  ;;  %1326 = vmatmul.bf16.vlgmr.msrb.gmra.mxu0 %v1612_v36  ;;  %v2383_v23 = vld [vmem:[%s3010_s1 + $0x3b0] sm:$0xff]  ;;  %v2382_v36 = vld [vmem:[%s3010_s1 + $0x3a8] sm:$0xff]  ;;  %v1715_v24 = vld [vmem:[%s3011_s0 + $0xb8] sm:$0xf] }
  0x42   :  { %1394 = vmatpush.bf16.msra.mxu0 %v2336_v26  ;;  %1345 = vmatmul.bf16.vlgmr.msrb.gmra.mxu1 %v1616_v38  ;;  %v2246_v26 = vld [vmem:[%s3011_s0 + $0x64] sm:$0xf0] }
  0x43   :  { %1413 = vmatpush.bf16.msra.mxu1 %v2344_v34  ;;  %1364 = vmatmul.bf16.vlgmr.msrb.gmra.mxu2 %v1620_v39  ;;  %v2367_v34 = vld [vmem:[%s3010_s1 + $0x330] sm:$0xff]  ;;  %v2366_v38 = vld [vmem:[%s3010_s1 + $0x328] sm:$0xff] }
  0x44   :  { %1432 = vmatpush.bf16.msra.mxu2 %v2352_v25  ;;  %1383 = vmatmul.bf16.vlgmr.msrb.gmra.mxu3 %v1624_v40  ;;  %v1635_v25 = vld [vmem:[%s3011_s0 + $0x28] sm:$0xf]  ;;  %v2381_v40 = vld [vmem:[%s3010_s1 + $0x3a0] sm:$0xff] }
  0x45   :  { %1451 = vmatpush.bf16.msra.mxu3 %v2360_v35  ;;  %v1636_v32 = vor.u32 %v2246_v26, %v1635_v25  ;;  %v2391_v35 = vld [vmem:[%s3010_s1 + $0x3f0] sm:$0xff]  ;;  %v2390_v39 = vld [vmem:[%s3010_s1 + $0x3e8] sm:$0xff]  ;;  %v2264_v25 = vld [vmem:[%s3011_s0 + $0xf4] sm:$0xf0] }
  0x46   :  { %1395 = vmatpush.bf16.msra.mxu0 %v2335_v41  ;;  %v2373_v41 = vld [vmem:[%s3010_s1 + $0x360] sm:$0xff]  ;;  %v2256_v26 = vld [vmem:[%s3011_s0 + $0xbc] sm:$0xf] }
  0x47   :  { %1414 = vmatpush.bf16.msra.mxu1 %v2343_v42  ;;  %v2365_v42 = vld [vmem:[%s3010_s1 + $0x320] sm:$0xff] }
  0x48   :  { %1433 = vmatpush.bf16.msra.mxu2 %v2351_v37  ;;  %v2374_v37 = vld [vmem:[%s3010_s1 + $0x368] sm:$0xff] }
  0x49   :  { %1452 = vmatpush.bf16.msra.mxu3 %v2359_v43  ;;  %v2389_v43 = vld [vmem:[%s3010_s1 + $0x3e0] sm:$0xff] }
  0x4a   :  { %1396 = vmatpush.bf16.msra.mxu0 %v2334_v45  ;;  %v1691_v45 = vld [vmem:[%s3011_s0 + $0xa0] sm:$0xf] }
  0x4b   :  { %1415 = vmatpush.bf16.msra.mxu1 %v2342_v46  ;;  %v2261_v46 = vld [vmem:[%s3011_s0 + $0xdc] sm:$0xf0] }
  0x4c   :  { %1434 = vmatpush.bf16.msra.mxu2 %v2350_v44  ;;  %v2380_v44 = vld [vmem:[%s3010_s1 + $0x398] sm:$0xff]  ;;  %v1692_v57 = vor.u32 %v2261_v46, %v1691_v45 }
  0x4d   :  { %1453 = vmatpush.bf16.msra.mxu3 %v2358_v47  ;;  %v2372_v47 = vld [vmem:[%s3010_s1 + $0x358] sm:$0xff] }
  0x4e   :  { %1397 = vmatpush.bf16.msra.mxu0 %v2333_v49  ;;  %v1693_v49 = vld [vmem:[%s3011_s0 + $0xe0] sm:$0xf0] }
  0x4f   :  { %1416 = vmatpush.bf16.msra.mxu1 %v2341_v50  ;;  %v1699_v50 = vld [vmem:[%s3011_s0 + $0xa8] sm:$0xf] }
  0x50   :  { %1435 = vmatpush.bf16.msra.mxu2 %v2349_v48  ;;  %v2253_v48 = vld [vmem:[%s3011_s0 + $0xa4] sm:$0xf] }
  0x51   :  { %1454 = vmatpush.bf16.msra.mxu3 %v2357_v51  ;;  %1331 = vmatmul.bf16.gmra.mxu0 %v1676_v0  ;;  %v2262_v51 = vld [vmem:[%s3011_s0 + $0xe4] sm:$0xf0]  ;;  %v1696_v59 = vor.u32 %v2253_v48, %v1693_v49 }
  0x52   :  { %1398 = vmatpush.bf16.msra.mxu0 %v2332_v60  ;;  %1350 = vmatmul.bf16.gmra.mxu1 %v1680_v2  ;;  %v1700_v60 = vor.u32 %v2262_v51, %v1699_v50  ;;  %v2378_v0 = vld [vmem:[%s3010_s1 + $0x388] sm:$0xff] }
  0x53   :  { %1417 = vmatpush.bf16.msra.mxu1 %v2340_v62  ;;  %1369 = vmatmul.bf16.gmra.mxu2 %v1684_v3  ;;  %v2363_v62 = vld [vmem:[%s3010_s1 + $0x310] sm:$0xff]  ;;  %v2362_v2 = vld [vmem:[%s3010_s1 + $0x308] sm:$0xff] }
  0x54   :  { %1436 = vmatpush.bf16.msra.mxu2 %v2348_v54  ;;  %1388 = vmatmul.bf16.gmra.mxu3 %v1688_v4  ;;  %v1701_v54 = vld [vmem:[%s3011_s0 + $0xe8] sm:$0xf0]  ;;  %v2377_v4 = vld [vmem:[%s3010_s1 + $0x380] sm:$0xff] }
  0x55   :  { %1455 = vmatpush.bf16.msra.mxu3 %v2356_v63  ;;  %v1704_v61 = vor.u32 %v2254_v52, %v1701_v54  ;;  %v2387_v63 = vld [vmem:[%s3010_s1 + $0x3d0] sm:$0xff]  ;;  %v2386_v3 = vld [vmem:[%s3010_s1 + $0x3c8] sm:$0xff] }
  0x56   :  { %1399 = vmatpush.bf16.msra.mxu0 %v2331_v5  ;;  %v2369_v5 = vld [vmem:[%s3010_s1 + $0x340] sm:$0xff] }
  0x57   :  { %1418 = vmatpush.bf16.msra.mxu1 %v2339_v6  ;;  %v2361_v6 = vld [vmem:[%s3010_s1 + $0x300] sm:$0xff] }
  0x58   :  { %1437 = vmatpush.bf16.msra.mxu2 %v2347_v1  ;;  %v2370_v1 = vld [vmem:[%s3010_s1 + $0x348] sm:$0xff] }
  0x59   :  { %1456 = vmatpush.bf16.msra.mxu3 %v2355_v7  ;;  %v2385_v7 = vld [vmem:[%s3010_s1 + $0x3c0] sm:$0xff] }
  0x5a   :  { %1400 = vmatpush.bf16.msra.mxu0 %v2330_v9  ;;  %v2247_v9 = vld [vmem:[%s3011_s0 + $0x6c] sm:$0xf0] }
  0x5b   :  { %1419 = vmatpush.bf16.msra.mxu1 %v2338_v10  ;;  %v2239_v10 = vld [vmem:[%s3011_s0 + $0x34] sm:$0xf] }
  0x5c   :  { %1438 = vmatpush.bf16.msra.mxu2 %v2346_v8  ;;  %v1643_v8 = vld [vmem:[%s3011_s0 + $0x30] sm:$0xf] }
  0x5d   :  { %1457 = vmatpush.bf16.msra.mxu3 %v2354_v11  ;;  %v1645_v11 = vld [vmem:[%s3011_s0 + $0x70] sm:$0xf0] }
  0x5e   :  { %1401 = vmatpush.bf16.msra.mxu0 %v2329_v14  ;;  %v2240_v14 = vld [vmem:[%s3011_s0 + $0x3c] sm:$0xf]  ;;  %v1648_v17 = vor.u32 %v2239_v10, %v1645_v11 }
  0x5f   :  { %1420 = vmatpush.bf16.msra.mxu1 %v2337_v15  ;;  %v1653_v15 = vld [vmem:[%s3011_s0 + $0x78] sm:$0xf0] }
  0x60   :  { %1439 = vmatpush.bf16.msra.mxu2 %v2345_v12  ;;  %v1651_v12 = vld [vmem:[%s3011_s0 + $0x38] sm:$0xf] }
  0x61   :  { %1458 = vmatpush.bf16.msra.mxu3 %v2353_v16  ;;  %1402 = vmatmul.bf16.vlgmr.msra.gmra.mxu0 %v1628_v29  ;;  %v1644_v16 = vor.u32 %v2247_v9, %v1643_v8 }
  0x62   :  { %1470 = vmatpush.bf16.msrb.mxu0 %v2368_v19  ;;  %1421 = vmatmul.bf16.vlgmr.msra.gmra.mxu1 %v1632_v31  ;;  %v1656_v19 = vor.u32 %v2240_v14, %v1653_v15  ;;  %v1720_v31 = vor.u32 %v2256_v26, %v1717_v27 }
  0x63   :  { %1489 = vmatpush.bf16.msrb.mxu1 %v2376_v20  ;;  %1440 = vmatmul.bf16.vlgmr.msra.gmra.mxu2 %v1636_v32  ;;  %v1707_v20 = vld [vmem:[%s3011_s0 + $0xb0] sm:$0xf] }
  0x64   :  { %1508 = vmatpush.bf16.msrb.mxu2 %v2384_v13  ;;  %1459 = vmatmul.bf16.vlgmr.msra.gmra.mxu3 %v1640_v33  ;;  %v2248_v13 = vld [vmem:[%s3011_s0 + $0x74] sm:$0xf0]  ;;  %v1708_v28 = vor.u32 %v2263_v21, %v1707_v20 }
  0x65   :  { %1527 = vmatpush.bf16.msrb.mxu3 %v2392_v22  ;;  %v1652_v18 = vor.u32 %v2248_v13, %v1651_v12  ;;  %v2255_v22 = vld [vmem:[%s3011_s0 + $0xb4] sm:$0xf] }
  0x66   :  { %1471 = vmatpush.bf16.msrb.mxu0 %v2367_v34 }
  0x67   :  { %1490 = vmatpush.bf16.msrb.mxu1 %v2375_v30  ;;  %v1716_v30 = vor.u32 %v2264_v25, %v1715_v24 }
  0x68   :  { %1509 = vmatpush.bf16.msrb.mxu2 %v2383_v23  ;;  %v1709_v23 = vld [vmem:[%s3011_s0 + $0xf0] sm:$0xf0] }
  0x69   :  { %1528 = vmatpush.bf16.msrb.mxu3 %v2391_v35  ;;  %v1712_v29 = vor.u32 %v2255_v22, %v1709_v23 }
  0x6a   :  { %1472 = vmatpush.bf16.msrb.mxu0 %v2366_v38 }
  0x6b   :  { %1491 = vmatpush.bf16.msrb.mxu1 %v2374_v37 }
  0x6c   :  { %1510 = vmatpush.bf16.msrb.mxu2 %v2382_v36 }
  0x6d   :  { %1529 = vmatpush.bf16.msrb.mxu3 %v2390_v39 }
  0x6e   :  { %1473 = vmatpush.bf16.msrb.mxu0 %v2365_v42 }
  0x6f   :  { %1492 = vmatpush.bf16.msrb.mxu1 %v2373_v41 }
  0x70   :  { %1511 = vmatpush.bf16.msrb.mxu2 %v2381_v40 }
  0x71   :  { %1530 = vmatpush.bf16.msrb.mxu3 %v2389_v43  ;;  %1407 = vmatmul.bf16.gmra.mxu0 %v1692_v57 }
  0x72   :  { %1474 = vmatpush.bf16.msrb.mxu0 %v2364_v53  ;;  %1426 = vmatmul.bf16.gmra.mxu1 %v1696_v59 }
  0x73   :  { %1493 = vmatpush.bf16.msrb.mxu1 %v2372_v47  ;;  %1445 = vmatmul.bf16.gmra.mxu2 %v1700_v60 }
  0x74   :  { %1512 = vmatpush.bf16.msrb.mxu2 %v2380_v44  ;;  %1464 = vmatmul.bf16.gmra.mxu3 %v1704_v61 }
  0x75   :  { %1531 = vmatpush.bf16.msrb.mxu3 %v2388_v55 }
  0x76   :  { %1475 = vmatpush.bf16.msrb.mxu0 %v2363_v62 }
  0x77   :  { %1494 = vmatpush.bf16.msrb.mxu1 %v2371_v58 }
  0x78   :  { %1513 = vmatpush.bf16.msrb.mxu2 %v2379_v56 }
  0x79   :  { %1532 = vmatpush.bf16.msrb.mxu3 %v2387_v63 }
  0x7a   :  { %1476 = vmatpush.bf16.msrb.mxu0 %v2362_v2 }
  0x7b   :  { %1495 = vmatpush.bf16.msrb.mxu1 %v2370_v1 }
  0x7c   :  { %1514 = vmatpush.bf16.msrb.mxu2 %v2378_v0 }
  0x7d   :  { %1533 = vmatpush.bf16.msrb.mxu3 %v2386_v3 }
  0x7e   :  { %1477 = vmatpush.bf16.msrb.mxu0 %v2361_v6 }
  0x7f   :  { %1496 = vmatpush.bf16.msrb.mxu1 %v2369_v5 }
  0x80   :  { %1515 = vmatpush.bf16.msrb.mxu2 %v2377_v4 }
  0x81   :  { %1534 = vmatpush.bf16.msrb.mxu3 %v2385_v7  ;;  %1478 = vmatmul.bf16.vlgmr.msrb.gmra.mxu0 %v1644_v16 }
  0x82   :  { %1497 = vmatmul.bf16.vlgmr.msrb.gmra.mxu1 %v1648_v17 }
  0x83   :  { %1516 = vmatmul.bf16.vlgmr.msrb.gmra.mxu2 %v1652_v18 }
  0x84   :  { %1535 = vmatmul.bf16.vlgmr.msrb.gmra.mxu3 %v1656_v19 }
  0x91   :  { %1483 = vmatmul.bf16.gmra.mxu0 %v1708_v28 }
  0x92   :  { %1502 = vmatmul.bf16.gmra.mxu1 %v1712_v29 }
  0x93   :  { %1521 = vmatmul.bf16.gmra.mxu2 %v1716_v30 }
  0x94   :  { %1540 = vmatmul.bf16.gmra.mxu3 %v1720_v31 }
  0x9e   :  { %v1251_v32 = vpop.f32.mrf.mxu0 }
  0x9f   :  { %v1270_v33 = vpop.f32.mrf.mxu1 }
  0xa0   :  { %v1271_v34 = vadd.f32 %v1270_v33, %v1251_v32 }
  0xa6   :  { %v1289_v35 = vpop.f32.mrf.mxu2  ;;  %v1253_v38 = vpop.f32.mrf.mxu0 }
  0xa7   :  { %v1308_v36 = vpop.f32.mrf.mxu3  ;;  %v1290_v37 = vadd.f32 %v1289_v35, %v1271_v34  ;;  %v1272_v39 = vpop.f32.mrf.mxu1 }
  0xa8   :  { %v1273_v40 = vadd.f32 %v1272_v39, %v1253_v38 }
  0xa9   :  { %v1309_v41 = vadd.f32 %v1308_v36, %v1290_v37 }
  0xae   :  { %v1291_v42 = vpop.f32.mrf.mxu2  ;;  %v1256_v45 = vpop.f32.mrf.mxu0 }
  0xaf   :  { %v1310_v43 = vpop.f32.mrf.mxu3  ;;  %v1292_v44 = vadd.f32 %v1291_v42, %v1273_v40  ;;  %v1275_v46 = vpop.f32.mrf.mxu1 }
  0xb0   :  { %v1276_v47 = vadd.f32 %v1275_v46, %v1256_v45 }
  0xb1   :  { %v1311_v48 = vadd.f32 %v1310_v43, %v1292_v44 }
  0xb6   :  { %v1294_v49 = vpop.f32.mrf.mxu2  ;;  %v1258_v52 = vpop.f32.mrf.mxu0 }
  0xb7   :  { %v1313_v50 = vpop.f32.mrf.mxu3  ;;  %v1295_v51 = vadd.f32 %v1294_v49, %v1276_v47  ;;  %v1277_v53 = vpop.f32.mrf.mxu1 }
  0xb8   :  { %v1278_v54 = vadd.f32 %v1277_v53, %v1258_v52 }
  0xb9   :  { %v1314_v55 = vadd.f32 %v1313_v50, %v1295_v51 }
  0xbe   :  { %v1296_v56 = vpop.f32.mrf.mxu2  ;;  %v1327_v59 = vpop.f32.mrf.mxu0 }
  0xbf   :  { %v1315_v57 = vpop.f32.mrf.mxu3  ;;  %v1297_v58 = vadd.f32 %v1296_v56, %v1278_v54  ;;  %v1346_v60 = vpop.f32.mrf.mxu1  ;;  %v1328_v18 = vadd.f32 %v1327_v59, %v1309_v41 }
  0xc1   :  { %v1316_v61 = vadd.f32 %v1315_v57, %v1297_v58  ;;  %v1347_v19 = vadd.f32 %v1346_v60, %v1328_v18 }
  0xc6   :  { %v1365_v62 = vpop.f32.mrf.mxu2  ;;  %v1329_v0 = vpop.f32.mrf.mxu0 }
  0xc7   :  { %v1384_v63 = vpop.f32.mrf.mxu3  ;;  %v1348_v1 = vpop.f32.mrf.mxu1  ;;  %v1366_v21 = vadd.f32 %v1365_v62, %v1347_v19  ;;  %v1330_v25 = vadd.f32 %v1329_v0, %v1311_v48 }
  0xc9   :  { %v1385_v26 = vadd.f32 %v1384_v63, %v1366_v21  ;;  %v1349_v27 = vadd.f32 %v1348_v1, %v1330_v25 }
  0xce   :  { %v1367_v2 = vpop.f32.mrf.mxu2  ;;  %v1332_v4 = vpop.f32.mrf.mxu0 }
  0xcf   :  { %v1386_v3 = vpop.f32.mrf.mxu3  ;;  %v1351_v5 = vpop.f32.mrf.mxu1  ;;  %v1368_v30 = vadd.f32 %v1367_v2, %v1349_v27  ;;  %v1333_v34 = vadd.f32 %v1332_v4, %v1314_v55 }
  0xd1   :  { %v1387_v36 = vadd.f32 %v1386_v3, %v1368_v30  ;;  %v1352_v38 = vadd.f32 %v1351_v5, %v1333_v34 }
  0xd6   :  { %v1370_v6 = vpop.f32.mrf.mxu2  ;;  %v1334_v8 = vpop.f32.mrf.mxu0 }
  0xd7   :  { %v1389_v7 = vpop.f32.mrf.mxu3  ;;  %v1353_v9 = vpop.f32.mrf.mxu1  ;;  %v1371_v41 = vadd.f32 %v1370_v6, %v1352_v38  ;;  %v1335_v46 = vadd.f32 %v1334_v8, %v1316_v61  ;;  %v2404_v61 = vld [vmem:[%s3012_s2] ss:$0 sm:$0xff] }
  0xd9   :  { %v1390_v49 = vadd.f32 %v1389_v7, %v1371_v41  ;;  %v1354_v51 = vadd.f32 %v1353_v9, %v1335_v46 }
  0xde   :  { %v1372_v10 = vpop.f32.mrf.mxu2  ;;  %v1403_v12 = vpop.f32.mrf.mxu0 }
  0xdf   :  { %v1391_v11 = vpop.f32.mrf.mxu3  ;;  %v1422_v13 = vpop.f32.mrf.mxu1  ;;  %v1404_v28 = vadd.f32 %v1403_v12, %v1385_v26  ;;  %v1373_v55 = vadd.f32 %v1372_v10, %v1354_v51 }
  0xe1   :  { %v1423_v35 = vadd.f32 %v1422_v13, %v1404_v28  ;;  %v1392_v0 = vadd.f32 %v1391_v11, %v1373_v55 }
  0xe6   :  { %v1441_v14 = vpop.f32.mrf.mxu2  ;;  %v1405_v16 = vpop.f32.mrf.mxu0 }
  0xe7   :  { %v1460_v15 = vpop.f32.mrf.mxu3  ;;  %v1424_v17 = vpop.f32.mrf.mxu1  ;;  %v1442_v37 = vadd.f32 %v1441_v14, %v1423_v35  ;;  %v1406_v39 = vadd.f32 %v1405_v16, %v1387_v36 }
  0xe9   :  { %v1461_v42 = vadd.f32 %v1460_v15, %v1442_v37  ;;  %v1425_v47 = vadd.f32 %v1424_v17, %v1406_v39 }
  0xee   :  { %v1443_v20 = vpop.f32.mrf.mxu2  ;;  %v1408_v23 = vpop.f32.mrf.mxu0 }
  0xef   :  { %v1462_v22 = vpop.f32.mrf.mxu3  ;;  %v1427_v24 = vpop.f32.mrf.mxu1  ;;  %v1444_v50 = vadd.f32 %v1443_v20, %v1425_v47  ;;  %v1409_v52 = vadd.f32 %v1408_v23, %v1390_v49 }
  0xf1   :  { %v1463_v56 = vadd.f32 %v1462_v22, %v1444_v50  ;;  %v1428_v62 = vadd.f32 %v1427_v24, %v1409_v52 }
  0xf6   :  { %v1446_v29 = vpop.f32.mrf.mxu2  ;;  %v1410_v32 = vpop.f32.mrf.mxu0 }
  0xf7   :  { %v1465_v31 = vpop.f32.mrf.mxu3  ;;  %v1429_v33 = vpop.f32.mrf.mxu1  ;;  %v1447_v1 = vadd.f32 %v1446_v29, %v1428_v62  ;;  %v1411_v3 = vadd.f32 %v1410_v32, %v1392_v0 }
  0xf9   :  { %v1466_v6 = vadd.f32 %v1465_v31, %v1447_v1  ;;  %v1430_v12 = vadd.f32 %v1429_v33, %v1411_v3 }
  0xfe   :  { %v1448_v40 = vpop.f32.mrf.mxu2  ;;  %v1479_v44 = vpop.f32.mrf.mxu0 }
  0xff   :  { %v1467_v43 = vpop.f32.mrf.mxu3  ;;  %v1498_v45 = vpop.f32.mrf.mxu1  ;;  %v1480_v48 = vadd.f32 %v1479_v44, %v1461_v42  ;;  %v1449_v16 = vadd.f32 %v1448_v40, %v1430_v12 }
 0x101   :  { %v1499_v53 = vadd.f32 %v1498_v45, %v1480_v48  ;;  %v1468_v21 = vadd.f32 %v1467_v43, %v1449_v16 }
 0x106   :  { %v1517_v54 = vpop.f32.mrf.mxu2  ;;  %v1481_v59 = vpop.f32.mrf.mxu0 }
 0x107   :  { %v1518_v57 = vadd.f32 %v1517_v54, %v1499_v53  ;;  %v1536_v58 = vpop.f32.mrf.mxu3  ;;  %v1500_v60 = vpop.f32.mrf.mxu1  ;;  %v1482_v63 = vadd.f32 %v1481_v59, %v1463_v56 }
 0x109   :  { %v1537_v2 = vadd.f32 %v1536_v58, %v1518_v57  ;;  %v1501_v4 = vadd.f32 %v1500_v60, %v1482_v63 }
 0x10b   :  { %v1565_v7 = vadd.f32 %v2404_v61, %v1537_v2 }
 0x10d   :  { %v1573_v11 = vmul.f32 0.2, %v1565_v7  ;;  %vm1569_vm0 = vcmp.gt.f32.partialorder %v1565_v7, 0.0 }
 0x10e   :  { %v1519_v5 = vpop.f32.mrf.mxu2  ;;  %v1484_v10 = vpop.f32.mrf.mxu0 }
 0x10f   :  { %v1520_v8 = vadd.f32 %v1519_v5, %v1501_v4  ;;  %v1538_v9 = vpop.f32.mrf.mxu3  ;;  %v1485_v14 = vadd.f32 %v1484_v10, %v1466_v6  ;;  %v1503_v15 = vpop.f32.mrf.mxu1  ;;  %v1577_v22 = vsel %vm1569_vm0, %v1565_v7, %v1573_v11 }
 0x111   :  { %v1539_v13 = vadd.f32 %v1538_v9, %v1520_v8  ;;  %v1504_v19 = vadd.f32 %v1503_v15, %v1485_v14 }
 0x113   :  { %v1566_v17 = vadd.f32 %v2404_v61, %v1539_v13 }
 0x115   :  { %vm1570_vm1 = vcmp.gt.f32.partialorder %v1566_v17, 0.0  ;;  %v1574_v18 = vmul.f32 0.2, %v1566_v17 }
 0x116   :  { %v1522_v20 = vpop.f32.mrf.mxu2  ;;  %v1486_v26 = vpop.f32.mrf.mxu0 }
 0x117   :  { %v1578_v23 = vsel %vm1570_vm1, %v1566_v17, %v1574_v18  ;;  %v1523_v24 = vadd.f32 %v1522_v20, %v1504_v19  ;;  %v1541_v25 = vpop.f32.mrf.mxu3  ;;  %v1487_v28 = vadd.f32 %v1486_v26, %v1468_v21  ;;  %v1505_v30 = vpop.f32.mrf.mxu1 }
 0x118   :  { %v2396_v27 = vpack.c.bf16 %v1578_v23, %v1577_v22 }
 0x119   :  { %v1542_v29 = vadd.f32 %v1541_v25, %v1523_v24  ;;  %v1506_v31 = vadd.f32 %v1505_v30, %v1487_v28 }
 0x11a   :  { %2397 = vst [vmem:[%s3013_s3] sm:$0xff] %v2396_v27  }
 0x11b   :  { %v1567_v33 = vadd.f32 %v2404_v61, %v1542_v29 }
 0x11d   :  { %v1575_v37 = vmul.f32 0.2, %v1567_v33  ;;  %vm1571_vm2 = vcmp.gt.f32.partialorder %v1567_v33, 0.0 }
 0x11e   :  { %v1524_v32 = vpop.f32.mrf.mxu2 }
 0x11f   :  { %v1525_v34 = vadd.f32 %v1524_v32, %v1506_v31  ;;  %v1543_v35 = vpop.f32.mrf.mxu3  ;;  %v1579_v40 = vsel %vm1571_vm2, %v1567_v33, %v1575_v37 }
 0x121   :  { %v1544_v36 = vadd.f32 %v1543_v35, %v1525_v34 }
 0x123   :  { %v1568_v38 = vadd.f32 %v2404_v61, %v1544_v36 }
 0x125   :  { %vm1572_vm3 = vcmp.gt.f32.partialorder %v1568_v38, 0.0  ;;  %v1576_v39 = vmul.f32 0.2, %v1568_v38 }
 0x127   :  { %v1580_v41 = vsel %vm1572_vm3, %v1568_v38, %v1576_v39 }
 0x128   :  { %v2401_v42 = vpack.c.bf16 %v1580_v41, %v1579_v40 }
 0x12a   :  { %2403 = vst [vmem:[%s3013_s3 + $0x8] sm:$0xff] %v2401_v42  }

// kernel: discriminator_forward.7
= control target key start
LH: loop header
LB: loop body
LE: loop exit
PB: predicated region body
PF: predicated region fallthrough
CT: control target
= control target key end

     0   :  { %s2407_s1 = inlined_call_operand.vmem [shape: bf16[2048,128], index: 1, kind: input, shape index: {}]   ;;  %s2408_s0 = inlined_call_operand.vmem [shape: bf16[8,2048], index: 0, kind: input, shape index: {}]   ;;  %s2409_s2 = inlined_call_operand.vmem [shape: f32[1,128], index: 2, kind: input, shape index: {}]   ;;  %s2410_s3 = inlined_call_operand.vmem [shape: f32[8,128], index: 3, kind: output, shape index: {}]  }
   0x1   :  { %v1851_v0 = vld [vmem:[%s2407_s1 + $0x38] sm:$0xff]  ;;  %v1850_v4 = vld [vmem:[%s2407_s1 + $0x30] sm:$0xff]  ;;  %v1849_v8 = vld [vmem:[%s2407_s1 + $0x28] sm:$0xff] }
   0x2   :  { %v1859_v1 = vld [vmem:[%s2407_s1 + $0x78] sm:$0xff]  ;;  %1108 = vmatpush.bf16.msra.mxu0 %v1851_v0  ;;  %v1858_v5 = vld [vmem:[%s2407_s1 + $0x70] sm:$0xff]  ;;  %v1857_v9 = vld [vmem:[%s2407_s1 + $0x68] sm:$0xff] }
   0x3   :  { %v1867_v2 = vld [vmem:[%s2407_s1 + $0xb8] sm:$0xff]  ;;  %1121 = vmatpush.bf16.msra.mxu1 %v1859_v1  ;;  %v1866_v6 = vld [vmem:[%s2407_s1 + $0xb0] sm:$0xff]  ;;  %v1865_v10 = vld [vmem:[%s2407_s1 + $0xa8] sm:$0xff] }
   0x4   :  { %v1875_v3 = vld [vmem:[%s2407_s1 + $0xf8] sm:$0xff]  ;;  %1134 = vmatpush.bf16.msra.mxu2 %v1867_v2  ;;  %v1874_v7 = vld [vmem:[%s2407_s1 + $0xf0] sm:$0xff]  ;;  %v1873_v11 = vld [vmem:[%s2407_s1 + $0xe8] sm:$0xff] }
   0x5   :  { %1147 = vmatpush.bf16.msra.mxu3 %v1875_v3  ;;  %v1848_v12 = vld [vmem:[%s2407_s1 + $0x20] sm:$0xff]  ;;  %v1847_v16 = vld [vmem:[%s2407_s1 + $0x18] sm:$0xff]  ;;  %v1846_v20 = vld [vmem:[%s2407_s1 + $0x10] sm:$0xff] }
   0x6   :  { %1109 = vmatpush.bf16.msra.mxu0 %v1850_v4  ;;  %v1856_v13 = vld [vmem:[%s2407_s1 + $0x60] sm:$0xff]  ;;  %v1855_v17 = vld [vmem:[%s2407_s1 + $0x58] sm:$0xff]  ;;  %v1854_v21 = vld [vmem:[%s2407_s1 + $0x50] sm:$0xff] }
   0x7   :  { %1122 = vmatpush.bf16.msra.mxu1 %v1858_v5  ;;  %v1864_v14 = vld [vmem:[%s2407_s1 + $0xa0] sm:$0xff]  ;;  %v1863_v18 = vld [vmem:[%s2407_s1 + $0x98] sm:$0xff]  ;;  %v1862_v22 = vld [vmem:[%s2407_s1 + $0x90] sm:$0xff] }
   0x8   :  { %1135 = vmatpush.bf16.msra.mxu2 %v1866_v6  ;;  %v1872_v15 = vld [vmem:[%s2407_s1 + $0xe0] sm:$0xff]  ;;  %v1871_v19 = vld [vmem:[%s2407_s1 + $0xd8] sm:$0xff]  ;;  %v1870_v23 = vld [vmem:[%s2407_s1 + $0xd0] sm:$0xff] }
   0x9   :  { %1148 = vmatpush.bf16.msra.mxu3 %v1874_v7  ;;  %v1845_v24 = vld [vmem:[%s2407_s1 + $0x8] sm:$0xff]  ;;  %v20_v29 = vld [vmem:[%s2408_s0] sm:$0xff]  ;;  %v1883_v38 = vld [vmem:[%s2407_s1 + $0x138] sm:$0xff] }
   0xa   :  { %1110 = vmatpush.bf16.msra.mxu0 %v1849_v8  ;;  %v1853_v25 = vld [vmem:[%s2407_s1 + $0x48] sm:$0xff]  ;;  %v1844_v30 = vld [vmem:[%s2407_s1] sm:$0xff]  ;;  %v292_v33 = vunpack.c.l.b16 %v20_v29  ;;  %v293_v37 = vunpack.c.h.b16 %v20_v29  ;;  %v1891_v39 = vld [vmem:[%s2407_s1 + $0x178] sm:$0xff] }
   0xb   :  { %1123 = vmatpush.bf16.msra.mxu1 %v1857_v9  ;;  %v1861_v26 = vld [vmem:[%s2407_s1 + $0x88] sm:$0xff]  ;;  %v1852_v31 = vld [vmem:[%s2407_s1 + $0x40] sm:$0xff]  ;;  %v1899_v40 = vld [vmem:[%s2407_s1 + $0x1b8] sm:$0xff] }
   0xc   :  { %1136 = vmatpush.bf16.msra.mxu2 %v1865_v10  ;;  %v1869_v27 = vld [vmem:[%s2407_s1 + $0xc8] sm:$0xff]  ;;  %v1860_v34 = vld [vmem:[%s2407_s1 + $0x80] sm:$0xff]  ;;  %v1907_v41 = vld [vmem:[%s2407_s1 + $0x1f8] sm:$0xff]  ;;  %v308_v43 = vpack.c.b16 %v292_v33, %v292_v33  ;;  %v309_v45 = vpack.c.b16 %v293_v37, %v293_v37 }
   0xd   :  { %1149 = vmatpush.bf16.msra.mxu3 %v1873_v11  ;;  %v21_v28 = vld [vmem:[%s2408_s0 + $0x8] sm:$0xff]  ;;  %v1868_v35 = vld [vmem:[%s2407_s1 + $0xc0] sm:$0xff]  ;;  %v1882_v46 = vld [vmem:[%s2407_s1 + $0x130] sm:$0xff] }
   0xe   :  { %1111 = vmatpush.bf16.msra.mxu0 %v1848_v12  ;;  %v294_v32 = vunpack.c.l.b16 %v21_v28  ;;  %v295_v36 = vunpack.c.h.b16 %v21_v28  ;;  %v1890_v47 = vld [vmem:[%s2407_s1 + $0x170] sm:$0xff]  ;;  %v1881_v50 = vld [vmem:[%s2407_s1 + $0x128] sm:$0xff]  ;;  %v1880_v54 = vld [vmem:[%s2407_s1 + $0x120] sm:$0xff] }
   0xf   :  { %1124 = vmatpush.bf16.msra.mxu1 %v1856_v13  ;;  %v1898_v48 = vld [vmem:[%s2407_s1 + $0x1b0] sm:$0xff]  ;;  %v1889_v51 = vld [vmem:[%s2407_s1 + $0x168] sm:$0xff]  ;;  %v1888_v55 = vld [vmem:[%s2407_s1 + $0x160] sm:$0xff] }
  0x10   :  { %1137 = vmatpush.bf16.msra.mxu2 %v1864_v14  ;;  %v310_v42 = vpack.c.b16 %v294_v32, %v294_v32  ;;  %v311_v44 = vpack.c.b16 %v295_v36, %v295_v36  ;;  %v1906_v49 = vld [vmem:[%s2407_s1 + $0x1f0] sm:$0xff]  ;;  %v1897_v52 = vld [vmem:[%s2407_s1 + $0x1a8] sm:$0xff]  ;;  %v1896_v56 = vld [vmem:[%s2407_s1 + $0x1a0] sm:$0xff] }
  0x11   :  { %1150 = vmatpush.bf16.msra.mxu3 %v1872_v15  ;;  %v1905_v53 = vld [vmem:[%s2407_s1 + $0x1e8] sm:$0xff]  ;;  %v1904_v57 = vld [vmem:[%s2407_s1 + $0x1e0] sm:$0xff]  ;;  %v1879_v58 = vld [vmem:[%s2407_s1 + $0x118] sm:$0xff] }
  0x12   :  { %1112 = vmatpush.bf16.msra.mxu0 %v1847_v16  ;;  %v1887_v59 = vld [vmem:[%s2407_s1 + $0x158] sm:$0xff]  ;;  %v1878_v62 = vld [vmem:[%s2407_s1 + $0x110] sm:$0xff]  ;;  %v1877_v2 = vld [vmem:[%s2407_s1 + $0x108] sm:$0xff] }
  0x13   :  { %1125 = vmatpush.bf16.msra.mxu1 %v1855_v17  ;;  %v1895_v60 = vld [vmem:[%s2407_s1 + $0x198] sm:$0xff]  ;;  %v1886_v63 = vld [vmem:[%s2407_s1 + $0x150] sm:$0xff]  ;;  %v1885_v3 = vld [vmem:[%s2407_s1 + $0x148] sm:$0xff] }
  0x14   :  { %1138 = vmatpush.bf16.msra.mxu2 %v1863_v18  ;;  %v1903_v61 = vld [vmem:[%s2407_s1 + $0x1d8] sm:$0xff]  ;;  %v1894_v0 = vld [vmem:[%s2407_s1 + $0x190] sm:$0xff]  ;;  %v1893_v4 = vld [vmem:[%s2407_s1 + $0x188] sm:$0xff] }
  0x15   :  { %1151 = vmatpush.bf16.msra.mxu3 %v1871_v19  ;;  %v1902_v1 = vld [vmem:[%s2407_s1 + $0x1d0] sm:$0xff]  ;;  %v1901_v5 = vld [vmem:[%s2407_s1 + $0x1c8] sm:$0xff]  ;;  %v23_v6 = vld [vmem:[%s2408_s0 + $0x18] sm:$0xff] }
  0x16   :  { %1113 = vmatpush.bf16.msra.mxu0 %v1846_v20  ;;  %v22_v7 = vld [vmem:[%s2408_s0 + $0x10] sm:$0xff]  ;;  %v1876_v8 = vld [vmem:[%s2407_s1 + $0x100] sm:$0xff]  ;;  %v298_v10 = vunpack.c.l.b16 %v23_v6  ;;  %v299_v14 = vunpack.c.h.b16 %v23_v6  ;;  %v1915_v16 = vld [vmem:[%s2407_s1 + $0x238] sm:$0xff] }
  0x17   :  { %1126 = vmatpush.bf16.msra.mxu1 %v1854_v21  ;;  %v1884_v9 = vld [vmem:[%s2407_s1 + $0x140] sm:$0xff]  ;;  %v296_v11 = vunpack.c.l.b16 %v22_v7  ;;  %v297_v15 = vunpack.c.h.b16 %v22_v7  ;;  %v1923_v17 = vld [vmem:[%s2407_s1 + $0x278] sm:$0xff]  ;;  %v1913_v28 = vld [vmem:[%s2407_s1 + $0x228] sm:$0xff] }
  0x18   :  { %1139 = vmatpush.bf16.msra.mxu2 %v1862_v22  ;;  %v1892_v12 = vld [vmem:[%s2407_s1 + $0x180] sm:$0xff]  ;;  %v1931_v18 = vld [vmem:[%s2407_s1 + $0x2b8] sm:$0xff]  ;;  %v314_v20 = vpack.c.b16 %v298_v10, %v298_v10  ;;  %v315_v22 = vpack.c.b16 %v299_v14, %v299_v14  ;;  %v1921_v29 = vld [vmem:[%s2407_s1 + $0x268] sm:$0xff] }
  0x19   :  { %1152 = vmatpush.bf16.msra.mxu3 %v1870_v23  ;;  %v1900_v13 = vld [vmem:[%s2407_s1 + $0x1c0] sm:$0xff]  ;;  %v1939_v19 = vld [vmem:[%s2407_s1 + $0x2f8] sm:$0xff]  ;;  %v312_v21 = vpack.c.b16 %v296_v11, %v296_v11  ;;  %v313_v23 = vpack.c.b16 %v297_v15, %v297_v15  ;;  %v1945_v6 = vld [vmem:[%s2407_s1 + $0x328] sm:$0xff] }
  0x1a   :  { %1114 = vmatpush.bf16.msra.mxu0 %v1845_v24  ;;  %v1914_v24 = vld [vmem:[%s2407_s1 + $0x230] sm:$0xff]  ;;  %v1912_v32 = vld [vmem:[%s2407_s1 + $0x220] sm:$0xff]  ;;  %v1911_v36 = vld [vmem:[%s2407_s1 + $0x218] sm:$0xff] }
  0x1b   :  { %1127 = vmatpush.bf16.msra.mxu1 %v1853_v25  ;;  %v1922_v25 = vld [vmem:[%s2407_s1 + $0x270] sm:$0xff]  ;;  %v1920_v33 = vld [vmem:[%s2407_s1 + $0x260] sm:$0xff]  ;;  %v1919_v37 = vld [vmem:[%s2407_s1 + $0x258] sm:$0xff] }
  0x1c   :  { %1140 = vmatpush.bf16.msra.mxu2 %v1861_v26  ;;  %v1930_v26 = vld [vmem:[%s2407_s1 + $0x2b0] sm:$0xff]  ;;  %v1953_v7 = vld [vmem:[%s2407_s1 + $0x368] sm:$0xff]  ;;  %v1944_v10 = vld [vmem:[%s2407_s1 + $0x320] sm:$0xff] }
  0x1d   :  { %1153 = vmatpush.bf16.msra.mxu3 %v1869_v27  ;;  %v1938_v27 = vld [vmem:[%s2407_s1 + $0x2f0] sm:$0xff]  ;;  %v1952_v11 = vld [vmem:[%s2407_s1 + $0x360] sm:$0xff]  ;;  %v1943_v14 = vld [vmem:[%s2407_s1 + $0x318] sm:$0xff] }
  0x1e   :  { %1115 = vmatpush.bf16.msra.mxu0 %v1844_v30  ;;  %v1929_v30 = vld [vmem:[%s2407_s1 + $0x2a8] sm:$0xff]  ;;  %v1951_v15 = vld [vmem:[%s2407_s1 + $0x358] sm:$0xff] }
  0x1f   :  { %1128 = vmatpush.bf16.msra.mxu1 %v1852_v31  ;;  %v1937_v31 = vld [vmem:[%s2407_s1 + $0x2e8] sm:$0xff] }
  0x20   :  { %1141 = vmatpush.bf16.msra.mxu2 %v1860_v34  ;;  %v1928_v34 = vld [vmem:[%s2407_s1 + $0x2a0] sm:$0xff] }
  0x21   :  { %1154 = vmatpush.bf16.msra.mxu3 %v1868_v35  ;;  %1116 = vmatmul.bf16.vlgmr.msra.gmra.mxu0 %v308_v43  ;;  %v1936_v35 = vld [vmem:[%s2407_s1 + $0x2e0] sm:$0xff]  ;;  %v1934_v43 = vld [vmem:[%s2407_s1 + $0x2d0] sm:$0xff] }
  0x22   :  { %1160 = vmatpush.bf16.msrb.mxu0 %v1883_v38  ;;  %1129 = vmatmul.bf16.vlgmr.msra.gmra.mxu1 %v309_v45  ;;  %v1927_v38 = vld [vmem:[%s2407_s1 + $0x298] sm:$0xff]  ;;  %v1917_v45 = vld [vmem:[%s2407_s1 + $0x248] sm:$0xff] }
  0x23   :  { %1173 = vmatpush.bf16.msrb.mxu1 %v1891_v39  ;;  %1142 = vmatmul.bf16.vlgmr.msra.gmra.mxu2 %v310_v42  ;;  %v1935_v39 = vld [vmem:[%s2407_s1 + $0x2d8] sm:$0xff]  ;;  %v1926_v42 = vld [vmem:[%s2407_s1 + $0x290] sm:$0xff] }
  0x24   :  { %1186 = vmatpush.bf16.msrb.mxu2 %v1899_v40  ;;  %1155 = vmatmul.bf16.vlgmr.msra.gmra.mxu3 %v311_v44  ;;  %v1910_v40 = vld [vmem:[%s2407_s1 + $0x210] sm:$0xff]  ;;  %v1909_v44 = vld [vmem:[%s2407_s1 + $0x208] sm:$0xff] }
  0x25   :  { %1199 = vmatpush.bf16.msrb.mxu3 %v1907_v41  ;;  %v1918_v41 = vld [vmem:[%s2407_s1 + $0x250] sm:$0xff] }
  0x26   :  { %1161 = vmatpush.bf16.msrb.mxu0 %v1882_v46  ;;  %v1925_v46 = vld [vmem:[%s2407_s1 + $0x288] sm:$0xff] }
  0x27   :  { %1174 = vmatpush.bf16.msrb.mxu1 %v1890_v47  ;;  %v1933_v47 = vld [vmem:[%s2407_s1 + $0x2c8] sm:$0xff] }
  0x28   :  { %1187 = vmatpush.bf16.msrb.mxu2 %v1898_v48  ;;  %v24_v48 = vld [vmem:[%s2408_s0 + $0x20] sm:$0xff] }
  0x29   :  { %1200 = vmatpush.bf16.msrb.mxu3 %v1906_v49  ;;  %v25_v49 = vld [vmem:[%s2408_s0 + $0x28] sm:$0xff] }
  0x2a   :  { %1162 = vmatpush.bf16.msrb.mxu0 %v1881_v50  ;;  %v1908_v50 = vld [vmem:[%s2407_s1 + $0x200] sm:$0xff] }
  0x2b   :  { %1175 = vmatpush.bf16.msrb.mxu1 %v1889_v51  ;;  %v1916_v51 = vld [vmem:[%s2407_s1 + $0x240] sm:$0xff] }
  0x2c   :  { %1188 = vmatpush.bf16.msrb.mxu2 %v1897_v52  ;;  %v300_v52 = vunpack.c.l.b16 %v24_v48 }
  0x2d   :  { %1201 = vmatpush.bf16.msrb.mxu3 %v1905_v53  ;;  %v302_v53 = vunpack.c.l.b16 %v25_v49 }
  0x2e   :  { %1163 = vmatpush.bf16.msrb.mxu0 %v1880_v54  ;;  %v1924_v54 = vld [vmem:[%s2407_s1 + $0x280] sm:$0xff] }
  0x2f   :  { %1176 = vmatpush.bf16.msrb.mxu1 %v1888_v55  ;;  %v1932_v55 = vld [vmem:[%s2407_s1 + $0x2c0] sm:$0xff] }
  0x30   :  { %1189 = vmatpush.bf16.msrb.mxu2 %v1896_v56  ;;  %v301_v56 = vunpack.c.h.b16 %v24_v48 }
  0x31   :  { %1202 = vmatpush.bf16.msrb.mxu3 %v1904_v57  ;;  %v303_v57 = vunpack.c.h.b16 %v25_v49 }
  0x32   :  { %1164 = vmatpush.bf16.msrb.mxu0 %v1879_v58  ;;  %v1947_v58 = vld [vmem:[%s2407_s1 + $0x338] sm:$0xff] }
  0x33   :  { %1177 = vmatpush.bf16.msrb.mxu1 %v1887_v59  ;;  %v1955_v59 = vld [vmem:[%s2407_s1 + $0x378] sm:$0xff] }
  0x34   :  { %1190 = vmatpush.bf16.msrb.mxu2 %v1895_v60  ;;  %v1963_v60 = vld [vmem:[%s2407_s1 + $0x3b8] sm:$0xff] }
  0x35   :  { %1203 = vmatpush.bf16.msrb.mxu3 %v1903_v61  ;;  %v1971_v61 = vld [vmem:[%s2407_s1 + $0x3f8] sm:$0xff] }
  0x36   :  { %1165 = vmatpush.bf16.msrb.mxu0 %v1878_v62  ;;  %v316_v62 = vpack.c.b16 %v300_v52, %v300_v52 }
  0x37   :  { %1178 = vmatpush.bf16.msrb.mxu1 %v1886_v63  ;;  %v318_v63 = vpack.c.b16 %v302_v53, %v302_v53 }
  0x38   :  { %1191 = vmatpush.bf16.msrb.mxu2 %v1894_v0  ;;  %v317_v0 = vpack.c.b16 %v301_v56, %v301_v56 }
  0x39   :  { %1204 = vmatpush.bf16.msrb.mxu3 %v1902_v1  ;;  %v319_v1 = vpack.c.b16 %v303_v57, %v303_v57 }
  0x3a   :  { %1166 = vmatpush.bf16.msrb.mxu0 %v1877_v2  ;;  %v1946_v2 = vld [vmem:[%s2407_s1 + $0x330] sm:$0xff] }
  0x3b   :  { %1179 = vmatpush.bf16.msrb.mxu1 %v1885_v3  ;;  %v1954_v3 = vld [vmem:[%s2407_s1 + $0x370] sm:$0xff] }
  0x3c   :  { %1192 = vmatpush.bf16.msrb.mxu2 %v1893_v4  ;;  %v1962_v4 = vld [vmem:[%s2407_s1 + $0x3b0] sm:$0xff] }
  0x3d   :  { %1205 = vmatpush.bf16.msrb.mxu3 %v1901_v5  ;;  %v1970_v5 = vld [vmem:[%s2407_s1 + $0x3f0] sm:$0xff] }
  0x3e   :  { %1167 = vmatpush.bf16.msrb.mxu0 %v1876_v8  ;;  %v1961_v8 = vld [vmem:[%s2407_s1 + $0x3a8] sm:$0xff] }
  0x3f   :  { %1180 = vmatpush.bf16.msrb.mxu1 %v1884_v9  ;;  %v1969_v9 = vld [vmem:[%s2407_s1 + $0x3e8] sm:$0xff] }
  0x40   :  { %1193 = vmatpush.bf16.msrb.mxu2 %v1892_v12  ;;  %v1960_v12 = vld [vmem:[%s2407_s1 + $0x3a0] sm:$0xff] }
  0x41   :  { %1206 = vmatpush.bf16.msrb.mxu3 %v1900_v13  ;;  %1168 = vmatmul.bf16.vlgmr.msrb.gmra.mxu0 %v312_v21  ;;  %v1968_v13 = vld [vmem:[%s2407_s1 + $0x3e0] sm:$0xff]  ;;  %v1966_v21 = vld [vmem:[%s2407_s1 + $0x3d0] sm:$0xff] }
  0x42   :  { %1212 = vmatpush.bf16.msra.mxu0 %v1915_v16  ;;  %1181 = vmatmul.bf16.vlgmr.msrb.gmra.mxu1 %v313_v23  ;;  %v1959_v16 = vld [vmem:[%s2407_s1 + $0x398] sm:$0xff]  ;;  %v1949_v23 = vld [vmem:[%s2407_s1 + $0x348] sm:$0xff] }
  0x43   :  { %1225 = vmatpush.bf16.msra.mxu1 %v1923_v17  ;;  %1194 = vmatmul.bf16.vlgmr.msrb.gmra.mxu2 %v314_v20  ;;  %v1967_v17 = vld [vmem:[%s2407_s1 + $0x3d8] sm:$0xff]  ;;  %v1958_v20 = vld [vmem:[%s2407_s1 + $0x390] sm:$0xff] }
  0x44   :  { %1238 = vmatpush.bf16.msra.mxu2 %v1931_v18  ;;  %1207 = vmatmul.bf16.vlgmr.msrb.gmra.mxu3 %v315_v22  ;;  %v1942_v18 = vld [vmem:[%s2407_s1 + $0x310] sm:$0xff]  ;;  %v1941_v22 = vld [vmem:[%s2407_s1 + $0x308] sm:$0xff] }
  0x45   :  { %1251 = vmatpush.bf16.msra.mxu3 %v1939_v19  ;;  %v1950_v19 = vld [vmem:[%s2407_s1 + $0x350] sm:$0xff] }
  0x46   :  { %1213 = vmatpush.bf16.msra.mxu0 %v1914_v24  ;;  %v26_v24 = vld [vmem:[%s2408_s0 + $0x30] sm:$0xff] }
  0x47   :  { %1226 = vmatpush.bf16.msra.mxu1 %v1922_v25  ;;  %v1957_v25 = vld [vmem:[%s2407_s1 + $0x388] sm:$0xff] }
  0x48   :  { %1239 = vmatpush.bf16.msra.mxu2 %v1930_v26  ;;  %v1965_v26 = vld [vmem:[%s2407_s1 + $0x3c8] sm:$0xff] }
  0x49   :  { %1252 = vmatpush.bf16.msra.mxu3 %v1938_v27  ;;  %v27_v27 = vld [vmem:[%s2408_s0 + $0x38] sm:$0xff] }
  0x4a   :  { %1214 = vmatpush.bf16.msra.mxu0 %v1913_v28  ;;  %v304_v28 = vunpack.c.l.b16 %v26_v24 }
  0x4b   :  { %1227 = vmatpush.bf16.msra.mxu1 %v1921_v29  ;;  %v305_v29 = vunpack.c.h.b16 %v26_v24 }
  0x4c   :  { %1240 = vmatpush.bf16.msra.mxu2 %v1929_v30  ;;  %v1940_v30 = vld [vmem:[%s2407_s1 + $0x300] sm:$0xff] }
  0x4d   :  { %1253 = vmatpush.bf16.msra.mxu3 %v1937_v31  ;;  %v1948_v31 = vld [vmem:[%s2407_s1 + $0x340] sm:$0xff] }
  0x4e   :  { %1215 = vmatpush.bf16.msra.mxu0 %v1912_v32  ;;  %v306_v32 = vunpack.c.l.b16 %v27_v27 }
  0x4f   :  { %1228 = vmatpush.bf16.msra.mxu1 %v1920_v33  ;;  %v307_v33 = vunpack.c.h.b16 %v27_v27 }
  0x50   :  { %1241 = vmatpush.bf16.msra.mxu2 %v1928_v34  ;;  %v1956_v34 = vld [vmem:[%s2407_s1 + $0x380] sm:$0xff] }
  0x51   :  { %1254 = vmatpush.bf16.msra.mxu3 %v1936_v35  ;;  %v1964_v35 = vld [vmem:[%s2407_s1 + $0x3c0] sm:$0xff] }
  0x52   :  { %1216 = vmatpush.bf16.msra.mxu0 %v1911_v36  ;;  %v320_v36 = vpack.c.b16 %v304_v28, %v304_v28 }
  0x53   :  { %1229 = vmatpush.bf16.msra.mxu1 %v1919_v37  ;;  %v321_v37 = vpack.c.b16 %v305_v29, %v305_v29 }
  0x54   :  { %1242 = vmatpush.bf16.msra.mxu2 %v1927_v38  ;;  %v322_v38 = vpack.c.b16 %v306_v32, %v306_v32 }
  0x55   :  { %1255 = vmatpush.bf16.msra.mxu3 %v1935_v39  ;;  %v323_v39 = vpack.c.b16 %v307_v33, %v307_v33 }
  0x56   :  { %1217 = vmatpush.bf16.msra.mxu0 %v1910_v40 }
  0x57   :  { %1230 = vmatpush.bf16.msra.mxu1 %v1918_v41 }
  0x58   :  { %1243 = vmatpush.bf16.msra.mxu2 %v1926_v42 }
  0x59   :  { %1256 = vmatpush.bf16.msra.mxu3 %v1934_v43 }
  0x5a   :  { %1218 = vmatpush.bf16.msra.mxu0 %v1909_v44 }
  0x5b   :  { %1231 = vmatpush.bf16.msra.mxu1 %v1917_v45 }
  0x5c   :  { %1244 = vmatpush.bf16.msra.mxu2 %v1925_v46 }
  0x5d   :  { %1257 = vmatpush.bf16.msra.mxu3 %v1933_v47 }
  0x5e   :  { %1219 = vmatpush.bf16.msra.mxu0 %v1908_v50 }
  0x5f   :  { %1232 = vmatpush.bf16.msra.mxu1 %v1916_v51 }
  0x60   :  { %1245 = vmatpush.bf16.msra.mxu2 %v1924_v54 }
  0x61   :  { %1258 = vmatpush.bf16.msra.mxu3 %v1932_v55  ;;  %1220 = vmatmul.bf16.vlgmr.msra.gmra.mxu0 %v316_v62 }
  0x62   :  { %1264 = vmatpush.bf16.msrb.mxu0 %v1947_v58  ;;  %1233 = vmatmul.bf16.vlgmr.msra.gmra.mxu1 %v317_v0 }
  0x63   :  { %1277 = vmatpush.bf16.msrb.mxu1 %v1955_v59  ;;  %1246 = vmatmul.bf16.vlgmr.msra.gmra.mxu2 %v318_v63 }
  0x64   :  { %1290 = vmatpush.bf16.msrb.mxu2 %v1963_v60  ;;  %1259 = vmatmul.bf16.vlgmr.msra.gmra.mxu3 %v319_v1 }
  0x65   :  { %1303 = vmatpush.bf16.msrb.mxu3 %v1971_v61 }
  0x66   :  { %1265 = vmatpush.bf16.msrb.mxu0 %v1946_v2 }
  0x67   :  { %1278 = vmatpush.bf16.msrb.mxu1 %v1954_v3 }
  0x68   :  { %1291 = vmatpush.bf16.msrb.mxu2 %v1962_v4 }
  0x69   :  { %1304 = vmatpush.bf16.msrb.mxu3 %v1970_v5 }
  0x6a   :  { %1266 = vmatpush.bf16.msrb.mxu0 %v1945_v6 }
  0x6b   :  { %1279 = vmatpush.bf16.msrb.mxu1 %v1953_v7 }
  0x6c   :  { %1292 = vmatpush.bf16.msrb.mxu2 %v1961_v8 }
  0x6d   :  { %1305 = vmatpush.bf16.msrb.mxu3 %v1969_v9 }
  0x6e   :  { %1267 = vmatpush.bf16.msrb.mxu0 %v1944_v10 }
  0x6f   :  { %1280 = vmatpush.bf16.msrb.mxu1 %v1952_v11 }
  0x70   :  { %1293 = vmatpush.bf16.msrb.mxu2 %v1960_v12 }
  0x71   :  { %1306 = vmatpush.bf16.msrb.mxu3 %v1968_v13 }
  0x72   :  { %1268 = vmatpush.bf16.msrb.mxu0 %v1943_v14 }
  0x73   :  { %1281 = vmatpush.bf16.msrb.mxu1 %v1951_v15 }
  0x74   :  { %1294 = vmatpush.bf16.msrb.mxu2 %v1959_v16 }
  0x75   :  { %1307 = vmatpush.bf16.msrb.mxu3 %v1967_v17 }
  0x76   :  { %1269 = vmatpush.bf16.msrb.mxu0 %v1942_v18  ;;  %v1972_v18 = vld [vmem:[%s2409_s2] ss:$0 sm:$0xff] }
  0x77   :  { %1282 = vmatpush.bf16.msrb.mxu1 %v1950_v19 }
  0x78   :  { %1295 = vmatpush.bf16.msrb.mxu2 %v1958_v20 }
  0x79   :  { %1308 = vmatpush.bf16.msrb.mxu3 %v1966_v21 }
  0x7a   :  { %1270 = vmatpush.bf16.msrb.mxu0 %v1941_v22 }
  0x7b   :  { %1283 = vmatpush.bf16.msrb.mxu1 %v1949_v23 }
  0x7c   :  { %1296 = vmatpush.bf16.msrb.mxu2 %v1957_v25 }
  0x7d   :  { %1309 = vmatpush.bf16.msrb.mxu3 %v1965_v26 }
  0x7e   :  { %1271 = vmatpush.bf16.msrb.mxu0 %v1940_v30 }
  0x7f   :  { %1284 = vmatpush.bf16.msrb.mxu1 %v1948_v31 }
  0x80   :  { %1297 = vmatpush.bf16.msrb.mxu2 %v1956_v34 }
  0x81   :  { %1310 = vmatpush.bf16.msrb.mxu3 %v1964_v35  ;;  %1272 = vmatmul.bf16.vlgmr.msrb.gmra.mxu0 %v320_v36 }
  0x82   :  { %1285 = vmatmul.bf16.vlgmr.msrb.gmra.mxu1 %v321_v37 }
  0x83   :  { %1298 = vmatmul.bf16.vlgmr.msrb.gmra.mxu2 %v322_v38 }
  0x84   :  { %1311 = vmatmul.bf16.vlgmr.msrb.gmra.mxu3 %v323_v39 }
  0x9e   :  { %v1117_v40 = vpop.f32.mrf.mxu0 }
  0x9f   :  { %v1130_v41 = vpop.f32.mrf.mxu1 }
  0xa0   :  { %v1131_v42 = vadd.f32 %v1130_v41, %v1117_v40 }
  0xa6   :  { %v1143_v43 = vpop.f32.mrf.mxu2  ;;  %v1119_v46 = vpop.f32.mrf.mxu0 }
  0xa7   :  { %v1144_v44 = vadd.f32 %v1143_v43, %v1131_v42  ;;  %v1156_v45 = vpop.f32.mrf.mxu3  ;;  %v1132_v48 = vpop.f32.mrf.mxu1 }
  0xa9   :  { %v1157_v47 = vadd.f32 %v1156_v45, %v1144_v44 }
  0xae   :  { %v1145_v49 = vpop.f32.mrf.mxu2 }
  0xaf   :  { %v1158_v50 = vpop.f32.mrf.mxu3 }
  0xbe   :  { %v1169_v51 = vpop.f32.mrf.mxu0 }
  0xbf   :  { %v1182_v52 = vpop.f32.mrf.mxu1  ;;  %v1170_v61 = vadd.f32 %v1169_v51, %v1157_v47 }
  0xc1   :  { %v1183_v1 = vadd.f32 %v1182_v52, %v1170_v61 }
  0xc6   :  { %v1195_v53 = vpop.f32.mrf.mxu2  ;;  %v1171_v55 = vpop.f32.mrf.mxu0 }
  0xc7   :  { %v1208_v54 = vpop.f32.mrf.mxu3  ;;  %v1184_v56 = vpop.f32.mrf.mxu1  ;;  %v1196_v3 = vadd.f32 %v1195_v53, %v1183_v1 }
  0xc9   :  { %v1209_v6 = vadd.f32 %v1208_v54, %v1196_v3 }
  0xce   :  { %v1197_v57 = vpop.f32.mrf.mxu2 }
  0xcf   :  { %v1210_v58 = vpop.f32.mrf.mxu3 }
  0xde   :  { %v1221_v59 = vpop.f32.mrf.mxu0 }
  0xdf   :  { %v1234_v60 = vpop.f32.mrf.mxu1  ;;  %v1222_v7 = vadd.f32 %v1221_v59, %v1209_v6 }
  0xe1   :  { %v1235_v8 = vadd.f32 %v1234_v60, %v1222_v7 }
  0xe6   :  { %v1247_v62 = vpop.f32.mrf.mxu2  ;;  %v1223_v0 = vpop.f32.mrf.mxu0 }
  0xe7   :  { %v1260_v63 = vpop.f32.mrf.mxu3  ;;  %v1236_v2 = vpop.f32.mrf.mxu1  ;;  %v1248_v9 = vadd.f32 %v1247_v62, %v1235_v8 }
  0xe9   :  { %v1261_v10 = vadd.f32 %v1260_v63, %v1248_v9 }
  0xee   :  { %v1249_v4 = vpop.f32.mrf.mxu2 }
  0xef   :  { %v1262_v5 = vpop.f32.mrf.mxu3 }
  0xfe   :  { %v1273_v11 = vpop.f32.mrf.mxu0 }
  0xff   :  { %v1286_v12 = vpop.f32.mrf.mxu1  ;;  %v1274_v13 = vadd.f32 %v1273_v11, %v1261_v10 }
 0x101   :  { %v1287_v14 = vadd.f32 %v1286_v12, %v1274_v13 }
 0x106   :  { %v1299_v15 = vpop.f32.mrf.mxu2  ;;  %v1275_v19 = vpop.f32.mrf.mxu0 }
 0x107   :  { %v1312_v16 = vpop.f32.mrf.mxu3  ;;  %v1300_v17 = vadd.f32 %v1299_v15, %v1287_v14  ;;  %v1288_v20 = vpop.f32.mrf.mxu1 }
 0x109   :  { %v1313_v21 = vadd.f32 %v1312_v16, %v1300_v17 }
 0x10b   :  { %v1326_v22 = vadd.f32 %v1972_v18, %v1313_v21 }
 0x10d   :  { %1327 = vst [vmem:[%s2410_s3] sm:$0xff] %v1326_v22 }
 0x10e   :  { %v1301_v23 = vpop.f32.mrf.mxu2 }
 0x10f   :  { %v1314_v24 = vpop.f32.mrf.mxu3 }

</bundles_post_ra>
